<compile_context>
chip_gen: v7x
topology: tpu7x:2x2x1
jax: 0.10.0
libtpu: 0.0.40
codegen_flags: <defaults>
</compile_context>

<pallas_src>
import functools
import math

import numpy as np
import jax
import jax.numpy as jnp
from jax.experimental import pallas as pl
from jax.experimental.pallas import tpu as pltpu

_NEG = -1e30          # finite "minus infinity" (avoids NaN on fully-masked rows)
_EPS = 1e-5


# ---------------------------------------------------------------------------
# BlockSpec / compiler-params helpers
# ---------------------------------------------------------------------------

def _const_spec(shape):
    """Whole-array block, same block every grid step (stays VMEM-resident)."""
    nd = len(shape)
    return pl.BlockSpec(tuple(shape), lambda *_, nd=nd: (0,) * nd)


def _batch_spec(shape):
    """Block over the leading batch dim; full extent on the remaining dims."""
    nd = len(shape)
    return pl.BlockSpec((1,) + tuple(shape[1:]),
                        lambda b, *_, nd=nd: (b,) + (0,) * (nd - 1))


@functools.lru_cache(maxsize=None)
def _vmem_limit_bytes():
    cap = 64 * 1024 * 1024
    try:
        info = pltpu.get_tpu_info()
        cap = int(getattr(info, "vmem_capacity_bytes", cap))
    except Exception:
        pass
    # ~3/4 of physical per-core VMEM, capped: ~96 MiB on v5e/v6e, ~48 MiB on v7x
    return max(32 * 1024 * 1024, min((cap * 3) // 4, 100 * 1024 * 1024))


def _mosaic_params(grid_len):
    return pltpu.CompilerParams(
        dimension_semantics=("parallel",) + ("arbitrary",) * (grid_len - 1),
        vmem_limit_bytes=_vmem_limit_bytes(),
    )


# ---------------------------------------------------------------------------
# Shared in-kernel multi-head attention core
# (projected q/k/v -> attention -> concat heads -> single out-proj matmul
#  -> residual -> LayerNorm -> query-pad zero-fill)
# ---------------------------------------------------------------------------

def _mha_core(q, k, v, x_res_f32, cat_ref, wo_ref, bo_ref, g_ref, b_ref,
              q_len, k_len, *, h, d_k, d_v, causal, scale, eps):
    nq = q.shape[0]
    nk = k.shape[0]

    # additive attention-mask bias rebuilt in-kernel (no HBM mask tensors)
    col = jax.lax.broadcasted_iota(jnp.int32, (nq, nk), 1)
    bias = jnp.where(col >= k_len, _NEG, 0.0)                   # key padding
    if causal:
        row = jax.lax.broadcasted_iota(jnp.int32, (nq, nk), 0)
        bias = jnp.where(col > row, _NEG, bias)                 # causal

    for i in range(h):                                          # static unroll
        qh = q[:, i * d_k:(i + 1) * d_k].astype(jnp.bfloat16)
        kh = k[:, i * d_k:(i + 1) * d_k].astype(jnp.bfloat16)
        vh = v[:, i * d_v:(i + 1) * d_v].astype(jnp.bfloat16)
        s = jax.lax.dot_general(
            qh, kh, (((1,), (1,)), ((), ())),
            preferred_element_type=jnp.float32) * scale + bias  # (nq, nk)
        m = jnp.max(s, axis=-1, keepdims=True)
        p = jnp.exp(s - m)
        denom = jnp.sum(p, axis=-1, keepdims=True)
        oh = jnp.dot(p.astype(jnp.bfloat16), vh,
                     preferred_element_type=jnp.float32)
        oh = oh * pl.reciprocal(denom, approx=True)             # EUP
        cat_ref[:, i * d_v:(i + 1) * d_v] = oh.astype(cat_ref.dtype)

    # single output-projection matmul over the concatenated heads
    proj = jnp.dot(cat_ref[...], wo_ref[...],
                   preferred_element_type=jnp.float32) + bo_ref[...]

    # residual + LayerNorm (f32) + query-padding zero-fill
    z = x_res_f32 + proj
    mu = jnp.mean(z, axis=-1, keepdims=True)
    var = jnp.mean(jnp.square(z - mu), axis=-1, keepdims=True)
    y = (z - mu) * jax.lax.rsqrt(var + eps) * g_ref[...] + b_ref[...]
    row_q = jax.lax.broadcasted_iota(jnp.int32, (nq, 1), 0)
    return jnp.where(row_q >= q_len, 0.0, y)


# ---------------------------------------------------------------------------
# One fused decoder-layer kernel:
#   (+pos-emb) -> self-attn block -> meshed cross-attn + alpha gating -> FFN
# ---------------------------------------------------------------------------

def _decoder_layer_kernel(dec_len_ref, enc_len_ref,
                          x_ref, pos_ref, enc_ref,
                          sa_wqkv, sa_bqkv, sa_wo, sa_bo, sa_g, sa_b,
                          ca_wqkv, ca_bqkv, ca_wo, ca_bo, ca_g, ca_b,
                          wa_ref, ba_ref,
                          w1_ref, b1_ref, w2_ref, b2_ref, ff_g, ff_b,
                          o_ref, cat_ref,
                          *, n_enc, h, d_k, d_v, scale, eps):
    b = pl.program_id(0)
    q_len = dec_len_ref[b]                      # decoder valid length (SMEM scalar)
    k_len_enc = enc_len_ref[b]                  # encoder valid length (SMEM scalar)
    hdk = h * d_k
    d_model = o_ref.shape[-1]

    # ---------------- self-attention (+ per-layer positional add) ----------
    x_bf = x_ref[0] + pos_ref[0]                                # bf16
    x_f32 = x_bf.astype(jnp.float32)                            # residual copy
    qkv = jnp.dot(x_bf, sa_wqkv[...],
                  preferred_element_type=jnp.float32) + sa_bqkv[...]
    sa = _mha_core(qkv[:, :hdk], qkv[:, hdk:2 * hdk], qkv[:, 2 * hdk:],
                   x_f32, cat_ref, sa_wo, sa_bo, sa_g, sa_b, q_len, q_len,
                   h=h, d_k=d_k, d_v=d_v, causal=True, scale=scale, eps=eps)
    sa_bf = sa.astype(jnp.bfloat16)

    # ---------------- meshed cross-attention + alpha gating ----------------
    # queries projected once, shared across the N_enc encoder levels
    q = (jnp.dot(sa_bf, ca_wqkv[:, :hdk], preferred_element_type=jnp.float32)
         + ca_bqkv[:, :hdk])
    acc = jnp.zeros((sa.shape[0], d_model), jnp.float32)
    for i in range(n_enc):                                      # static unroll
        enc_i = enc_ref[0, i]                                   # (S_enc, Dm) bf16
        kv = (jnp.dot(enc_i, ca_wqkv[:, hdk:],
                      preferred_element_type=jnp.float32) + ca_bqkv[:, hdk:])
        e = _mha_core(q, kv[:, :hdk], kv[:, hdk:], sa, cat_ref,
                      ca_wo, ca_bo, ca_g, ca_b, q_len, k_len_enc,
                      h=h, d_k=d_k, d_v=d_v, causal=False, scale=scale, eps=eps)
        # alpha_i = sigmoid(fc_alpha_i([self_att, enc_att_i]))
        pre = (jnp.dot(sa_bf, wa_ref[i, :d_model, :],
                       preferred_element_type=jnp.float32)
               + jnp.dot(e.astype(jnp.bfloat16), wa_ref[i, d_model:, :],
                         preferred_element_type=jnp.float32)
               + ba_ref[i])
        alpha = pl.reciprocal(1.0 + jnp.exp(-pre), approx=True)  # sigmoid via EUP
        acc = acc + alpha * e

    attn_f32 = acc * (1.0 / math.sqrt(n_enc))
    attn_bf = attn_f32.astype(jnp.bfloat16)

    # ---------------- position-wise FFN -------------------------------------
    h1 = jnp.dot(attn_bf, w1_ref[...],
                 preferred_element_type=jnp.float32) + b1_ref[...]
    h1 = jnp.maximum(h1, 0.0)
    h2 = jnp.dot(h1.astype(jnp.bfloat16), w2_ref[...],
                 preferred_element_type=jnp.float32) + b2_ref[...]
    z = attn_f32 + h2
    mu = jnp.mean(z, axis=-1, keepdims=True)
    var = jnp.mean(jnp.square(z - mu), axis=-1, keepdims=True)
    y = (z - mu) * jax.lax.rsqrt(var + eps) * ff_g[...] + ff_b[...]
    row_q = jax.lax.broadcasted_iota(jnp.int32, (y.shape[0], 1), 0)
    y = jnp.where(row_q >= q_len, 0.0, y)
    o_ref[0] = y.astype(o_ref.dtype)


def decoder_layer(x, pos, enc, lp, dec_len, enc_len, *, n_enc, h, d_k, d_v):
    B, S, Dm = x.shape
    sa_p, ca_p, ff_p = lp["self_attn"], lp["enc_attn"], lp["pwff"]
    kern = functools.partial(_decoder_layer_kernel, n_enc=n_enc, h=h, d_k=d_k,
                             d_v=d_v, scale=1.0 / math.sqrt(d_k), eps=_EPS)
    args = (x, pos, enc,
            sa_p["wqkv"], sa_p["bqkv"], sa_p["wo"], sa_p["bo"],
            sa_p["ln_g"], sa_p["ln_b"],
            ca_p["wqkv"], ca_p["bqkv"], ca_p["wo"], ca_p["bo"],
            ca_p["ln_g"], ca_p["ln_b"],
            lp["wa"], lp["ba"],
            ff_p["w1"], ff_p["b1"], ff_p["w2"], ff_p["b2"],
            ff_p["ln_g"], ff_p["ln_b"])
    in_specs = ([_batch_spec(x.shape), _batch_spec(pos.shape),
                 _batch_spec(enc.shape)]
                + [_const_spec(a.shape) for a in args[3:]])
    return pl.pallas_call(
        kern,
        out_shape=jax.ShapeDtypeStruct((B, S, Dm), jnp.bfloat16),
        grid_spec=pltpu.PrefetchScalarGridSpec(
            num_scalar_prefetch=2,
            grid=(B,),
            in_specs=in_specs,
            out_specs=_batch_spec((B, S, Dm)),
            scratch_shapes=[pltpu.VMEM((S, h * d_v), jnp.bfloat16)]),
        compiler_params=_mosaic_params(1),
    )(dec_len, enc_len, *args)


# ---------------------------------------------------------------------------
# Final head: vocab projection + log_softmax, lane-dense per-tile outputs
# ---------------------------------------------------------------------------

def _vocab_kernel(x_ref, w_ref, o_ref, lse_ref, m_sc, l_sc, *, nv, tv, v_real):
    v = pl.program_id(1)
    logits = jnp.dot(x_ref[0], w_ref[...],
                     preferred_element_type=jnp.float32)           # (S, tv)
    # mask the vocab padding columns (fc_w padded to a 128-lane multiple)
    col = jax.lax.broadcasted_iota(jnp.int32, logits.shape, 1) + v * tv
    logits = jnp.where(col >= v_real, _NEG, logits)

    if nv == 1:
        m = jnp.max(logits, axis=-1, keepdims=True)
        lse = m + jnp.log(jnp.sum(jnp.exp(logits - m), axis=-1, keepdims=True))
        o_ref[0] = logits - lse
        lse_ref[0] = lse
    else:
        o_ref[0] = logits                       # unnormalized, lane-dense tile

        @pl.when(v == 0)
        def _():
            m_sc[...] = jnp.full(m_sc.shape, _NEG, jnp.float32)
            l_sc[...] = jnp.zeros(l_sc.shape, jnp.float32)

        m_prev = m_sc[...]
        m_cur = jnp.maximum(m_prev, jnp.max(logits, axis=-1, keepdims=True))
        l_sc[...] = (l_sc[...] * jnp.exp(m_prev - m_cur)
                     + jnp.sum(jnp.exp(logits - m_cur), axis=-1, keepdims=True))
        m_sc[...] = m_cur

        @pl.when(v == nv - 1)
        def _():
            lse_ref[0] = m_sc[...] + jnp.log(l_sc[...])


def _sub_lse_kernel(lg_ref, lse_ref, o_ref):
    o_ref[0] = lg_ref[0] - lse_ref[0]


def vocab_log_softmax(x, w, v_real):
    B, S, Dm = x.shape
    Vp = w.shape[1]                       # padded vocab (multiple of 128)
    if Vp <= 1024:
        tv = Vp
    else:
        tv = 128
        for cand in (1024, 896, 768, 640, 512, 384, 256, 128):
            if Vp % cand == 0:
                tv = cand
                break
    nv = Vp // tv
    kern = functools.partial(_vocab_kernel, nv=nv, tv=tv, v_real=v_real)
    logits, lse = pl.pallas_call(
        kern,
        out_shape=(jax.ShapeDtypeStruct((B, S, Vp), jnp.float32),
                   jax.ShapeDtypeStruct((B, S, 1), jnp.float32)),
        grid=(B, nv),
        in_specs=[pl.BlockSpec((1, S, Dm), lambda b, v: (b, 0, 0)),
                  pl.BlockSpec((Dm, tv), lambda b, v: (0, v))],
        out_specs=(pl.BlockSpec((1, S, tv), lambda b, v: (b, 0, v)),
                   pl.BlockSpec((1, S, 1), lambda b, v: (b, 0, 0))),
        scratch_shapes=[pltpu.VMEM((S, 1), jnp.float32),
                        pltpu.VMEM((S, 1), jnp.float32)],
        compiler_params=_mosaic_params(2),
    )(x, w)
    if nv == 1:
        out = logits                      # already normalized in-kernel
    else:
        # tiny epilogue: subtract the LSE tile-by-tile, in place (aliased)
        out = pl.pallas_call(
            _sub_lse_kernel,
            out_shape=jax.ShapeDtypeStruct((B, S, Vp), jnp.float32),
            grid=(B, nv),
            in_specs=[pl.BlockSpec((1, S, tv), lambda b, v: (b, 0, v)),
                      pl.BlockSpec((1, S, 1), lambda b, v: (b, 0, 0))],
            out_specs=pl.BlockSpec((1, S, tv), lambda b, v: (b, 0, v)),
            input_output_aliases={0: 0},
            compiler_params=_mosaic_params(2),
        )(logits, lse)
    return out[:, :, :v_real]


# ---------------------------------------------------------------------------
# Parameters (deterministic synthetic init)
# ---------------------------------------------------------------------------

def sinusoid_encoding_table(n_position, d_hid, padding_idx=None):
    pos = np.arange(n_position)[:, None].astype(np.float64)
    i = np.arange(d_hid)[None, :]
    angle = pos / np.power(10000.0, 2 * (i // 2) / d_hid)
    table = np.zeros((n_position, d_hid), dtype=np.float32)
    table[:, 0::2] = np.sin(angle[:, 0::2])
    table[:, 1::2] = np.cos(angle[:, 1::2])
    if padding_idx is not None:
        table[padding_idx] = 0.0
    return jnp.asarray(table)


def init_decoder_params(key, vocab_size, max_len, N_dec, N_enc, d_model,
                        d_k, d_v, h, d_ff, padding_idx):
    keys = iter(jax.random.split(key, 8 + 16 * N_dec))

    def nrm(shape, scale=0.02, dtype=jnp.float32):
        return (scale * jax.random.normal(next(keys), shape, jnp.float32)).astype(dtype)

    def mha_params():
        tot = h * (2 * d_k + d_v)
        return {
            "wqkv": nrm((d_model, tot), dtype=jnp.bfloat16),    # W_q | W_k | W_v
            "bqkv": nrm((1, tot)),
            "wo": nrm((h * d_v, d_model), dtype=jnp.bfloat16),
            "bo": nrm((1, d_model)),
            "ln_g": jnp.ones((1, d_model), jnp.float32),
            "ln_b": jnp.zeros((1, d_model), jnp.float32),
        }

    word_emb = nrm((vocab_size, d_model)).at[padding_idx].set(0.0)
    pos_emb = sinusoid_encoding_table(max_len + 1, d_model, padding_idx=0)

    layers = []
    for _ in range(N_dec):
        layers.append({
            "self_attn": mha_params(),
            "enc_attn": mha_params(),
            "wa": nrm((N_enc, 2 * d_model, d_model), dtype=jnp.bfloat16),
            "ba": jnp.zeros((N_enc, 1, d_model), jnp.float32),
            "pwff": {
                "w1": nrm((d_model, d_ff), dtype=jnp.bfloat16),
                "b1": nrm((1, d_ff)),
                "w2": nrm((d_ff, d_model), dtype=jnp.bfloat16),
                "b2": nrm((1, d_model)),
                "ln_g": jnp.ones((1, d_model), jnp.float32),
                "ln_b": jnp.zeros((1, d_model), jnp.float32),
            },
        })

    # vocab projection, padded to a multiple of 128 lanes (lane-dense stores)
    v_pad = ((vocab_size + 127) // 128) * 128
    fc_w = nrm((d_model, vocab_size))
    fc_w = jnp.pad(fc_w, ((0, 0), (0, v_pad - vocab_size))).astype(jnp.bfloat16)

    return {"word_emb": word_emb, "pos_emb": pos_emb, "layers": layers,
            "fc_w": fc_w}


# ---------------------------------------------------------------------------
# Full decoder forward
# ---------------------------------------------------------------------------

def decoder_forward(params, tokens, enc_outputs, enc_pos_embedding,
                    enc_attention_mask, *, padding_idx, d_k, d_v, h, n_enc,
                    vocab_size):
    B, S = tokens.shape
    S_enc = enc_attention_mask.shape[-1]

    mask_queries = tokens == padding_idx                 # (B, S) bool, True = pad
    # Caption sequences are right-padded, so per-batch valid lengths fully
    # encode the pad masks; they are scalar-prefetched into SMEM and the masks
    # are rebuilt in-kernel with broadcasted_iota (no HBM mask tensors).
    dec_len = jnp.sum(jnp.logical_not(mask_queries).astype(jnp.int32), axis=-1)
    enc_len = (S_enc - jnp.sum(enc_attention_mask.astype(jnp.int32),
                               axis=(1, 2, 3))).astype(jnp.int32)

    seq = jnp.broadcast_to(jnp.arange(1, S + 1, dtype=jnp.int32)[None, :], (B, S))
    seq = jnp.where(mask_queries, 0, seq)

    # embedding gathers left to XLA (data-dependent gather)
    out = jnp.take(params["word_emb"], tokens, axis=0).astype(jnp.bfloat16)
    pos = jnp.take(params["pos_emb"], seq, axis=0).astype(jnp.bfloat16)

    # enc_outputs += enc_pos_embedding  (B, N_enc, S_enc, Dm)
    enc = (enc_outputs + enc_pos_embedding).astype(jnp.bfloat16)

    for lp in params["layers"]:
        # the per-layer `out += word_pos_embedding` add is fused into the
        # decoder-layer kernel (pos passed as a separate block input)
        out = decoder_layer(out, pos, enc, lp, dec_len, enc_len,
                            n_enc=n_enc, h=h, d_k=d_k, d_v=d_v)

    # TODO(synk): the final MeshedAdaptiveDecoderLayer (adaptive attention
    # conditioned on a frozen pretrained language model) is not implemented
    # here; it requires the external language-model features.

    return vocab_log_softmax(out, params["fc_w"], vocab_size)   # (B, S, V) f32


# ---------------------------------------------------------------------------

if __name__ == "__main__":
    vocab_size = 50
    max_len = 20
    N_dec = 2
    N_enc = 3
    padding_idx = 0
    d_model = 32
    d_k = d_v = 8
    h = 4
    d_ff = 64
    B, S, S_enc = 2, 8, 10

    key = jax.random.PRNGKey(0)
    kp, kt, ke, kpe = jax.random.split(key, 4)

    params = init_decoder_params(kp, vocab_size, max_len, N_dec, N_enc,
                                 d_model, d_k, d_v, h, d_ff, padding_idx)

    tokens = jax.random.randint(kt, (B, S), 1, vocab_size, dtype=jnp.int32)
    tokens = tokens.at[1, -2:].set(padding_idx)          # exercise padding mask
    enc_outputs = jax.random.normal(ke, (B, N_enc, S_enc, d_model), jnp.float32)
    enc_pos_embedding = 0.02 * jax.random.normal(kpe, (B, 1, S_enc, d_model),
                                                 jnp.float32)
    enc_attention_mask = jnp.zeros((B, 1, 1, S_enc), dtype=bool)
    enc_attention_mask = enc_attention_mask.at[1, :, :, -2:].set(True)

    fwd = jax.jit(functools.partial(decoder_forward, padding_idx=padding_idx,
                                    d_k=d_k, d_v=d_v, h=h, n_enc=N_enc,
                                    vocab_size=vocab_size))
    out = fwd(params, tokens, enc_outputs, enc_pos_embedding, enc_attention_mask)
    out = jax.block_until_ready(out)

    assert out.shape == (B, S, vocab_size), out.shape
    assert bool(jnp.isfinite(out).all()), "non-finite output"
    print("KERNEL_OK")
</pallas_src>

<mosaic_0001>
module attributes {stable_mosaic.version = 11 : i64} {
  func.func @_vocab_kernel(%arg0: i32, %arg1: i32, %arg2: memref<1x8x32xbf16, #tpu.memory_space<vmem>>, %arg3: memref<32x128xbf16, #tpu.memory_space<vmem>>, %arg4: memref<1x8x128xf32, #tpu.memory_space<vmem>>, %arg5: memref<1x8x1xf32, #tpu.memory_space<vmem>>, %arg6: memref<8x1xf32, #tpu.memory_space<vmem>>, %arg7: memref<8x1xf32, #tpu.memory_space<vmem>>) attributes {dimension_semantics = [#tpu.dimension_semantics<parallel>, #tpu.dimension_semantics<arbitrary>], iteration_bounds = array<i64: 2, 1>, scalar_prefetch = 0 : i64, scratch_operands = 2 : i64, tpu.core_type = #tpu.core_type<tc>, window_params = [{transform_indices = @transform_0, window_bounds = array<i64: 1, 8, 32>}, {transform_indices = @transform_1, window_bounds = array<i64: 32, 128>}, {transform_indices = @transform_2, window_bounds = array<i64: 1, 8, 128>}, {transform_indices = @transform_3, window_bounds = array<i64: 1, 8, 1>}]} {
    %c0 = arith.constant 0 : index
    %c0_0 = arith.constant 0 : index
    %c0_1 = arith.constant 0 : index
    %0 = vector.load %arg2[%c0, %c0_0, %c0_1] : memref<1x8x32xbf16, #tpu.memory_space<vmem>>, vector<1x8x32xbf16>
    %1 = vector.shape_cast %0 : vector<1x8x32xbf16> to vector<8x32xbf16>
    %c0_2 = arith.constant 0 : index
    %c0_3 = arith.constant 0 : index
    %2 = vector.load %arg3[%c0_2, %c0_3] : memref<32x128xbf16, #tpu.memory_space<vmem>>, vector<32x128xbf16>
    %cst = arith.constant dense<0.000000e+00> : vector<8x128xf32>
    %3 = tpu.matmul %1, %2, %cst {dimension_numbers = #tpu.dot_dimension_numbers<[1], [0], [0], [1], [0, 0, 1, 1], [], []>} : vector<8x32xbf16>, vector<32x128xbf16>, vector<8x128xf32> -> vector<8x128xf32>
    %4 = tpu.iota {dimensions = array<i32: 1>} : vector<8x128xi32>
    %c128_i32 = arith.constant 128 : i32
    %5 = arith.muli %arg1, %c128_i32 : i32
    %6 = vector.broadcast %5 : i32 to vector<8x128xi32>
    %7 = arith.addi %4, %6 : vector<8x128xi32>
    %c50_i32 = arith.constant 50 : i32
    %8 = vector.broadcast %c50_i32 : i32 to vector<8x128xi32>
    %9 = arith.cmpi sge, %7, %8 : vector<8x128xi32>
    %cst_4 = arith.constant -1.000000e+30 : f32
    %10 = vector.broadcast %cst_4 : f32 to vector<8x128xf32>
    %11 = arith.select %9, %10, %3 : vector<8x128xi1>, vector<8x128xf32>
    %cst_5 = arith.constant dense<0xFF800000> : vector<8xf32>
    %12 = vector.multi_reduction <maximumf>, %11, %cst_5 [1] : vector<8x128xf32> to vector<8xf32>
    %13 = vector.shape_cast %12 : vector<8xf32> to vector<8x1xf32>
    %14 = vector.broadcast %13 : vector<8x1xf32> to vector<8x128xf32>
    %15 = arith.subf %11, %14 : vector<8x128xf32>
    %16 = math.exp %15 : vector<8x128xf32>
    %cst_6 = arith.constant dense<0.000000e+00> : vector<8xf32>
    %17 = vector.multi_reduction <add>, %16, %cst_6 [1] : vector<8x128xf32> to vector<8xf32>
    %18 = vector.shape_cast %17 : vector<8xf32> to vector<8x1xf32>
    %19 = math.log %18 : vector<8x1xf32>
    %20 = arith.addf %13, %19 : vector<8x1xf32>
    %21 = vector.broadcast %20 : vector<8x1xf32> to vector<8x128xf32>
    %22 = arith.subf %11, %21 : vector<8x128xf32>
    %c0_7 = arith.constant 0 : index
    %c0_8 = arith.constant 0 : index
    %c0_9 = arith.constant 0 : index
    %23 = vector.load %arg4[%c0_7, %c0_8, %c0_9] : memref<1x8x128xf32, #tpu.memory_space<vmem>>, vector<1x8x128xf32>
    %24 = vector.shape_cast %23 : vector<1x8x128xf32> to vector<8x128xf32>
    %25 = vector.shape_cast %22 : vector<8x128xf32> to vector<1x8x128xf32>
    tpu.vector_store %arg4[%c0_7, %c0_8, %c0_9], %25 {strides = array<i32>} : memref<1x8x128xf32, #tpu.memory_space<vmem>>, vector<1x8x128xf32>,
    %c0_10 = arith.constant 0 : index
    %c0_11 = arith.constant 0 : index
    %c0_12 = arith.constant 0 : index
    %26 = vector.load %arg5[%c0_10, %c0_11, %c0_12] : memref<1x8x1xf32, #tpu.memory_space<vmem>>, vector<1x8x1xf32>
    %27 = vector.shape_cast %26 : vector<1x8x1xf32> to vector<8x1xf32>
    %28 = vector.shape_cast %20 : vector<8x1xf32> to vector<1x8x1xf32>
    tpu.vector_store %arg5[%c0_10, %c0_11, %c0_12], %28 {strides = array<i32>} : memref<1x8x1xf32, #tpu.memory_space<vmem>>, vector<1x8x1xf32>,
    return
  }
  func.func @transform_0(%arg0: i32, %arg1: i32) -> (i32, i32, i32) {
    %c0_i32 = arith.constant 0 : i32
    %c0_i32_0 = arith.constant 0 : i32
    %c0_i32_1 = arith.constant 0 : i32
    return %arg0, %c0_i32, %c0_i32_0 : i32, i32, i32
  }
  func.func @transform_1(%arg0: i32, %arg1: i32) -> (i32, i32) {
    %c0_i32 = arith.constant 0 : i32
    %c0_i32_0 = arith.constant 0 : i32
    return %c0_i32, %arg1 : i32, i32
  }
  func.func @transform_2(%arg0: i32, %arg1: i32) -> (i32, i32, i32) {
    %c0_i32 = arith.constant 0 : i32
    %c0_i32_0 = arith.constant 0 : i32
    return %arg0, %c0_i32, %arg1 : i32, i32, i32
  }
  func.func @transform_3(%arg0: i32, %arg1: i32) -> (i32, i32, i32) {
    %c0_i32 = arith.constant 0 : i32
    %c0_i32_0 = arith.constant 0 : i32
    %c0_i32_1 = arith.constant 0 : i32
    return %arg0, %c0_i32, %c0_i32_0 : i32, i32, i32
  }
}

module attributes {stable_mosaic.version = 11 : i64} {
  func.func @_decoder_layer_kernel(%arg0: i32, %arg1: memref<2xi32, #tpu.memory_space<smem>>, %arg2: memref<2xi32, #tpu.memory_space<smem>>, %arg3: memref<1x8x32xbf16, #tpu.memory_space<vmem>>, %arg4: memref<1x8x32xbf16, #tpu.memory_space<vmem>>, %arg5: memref<1x3x10x32xbf16, #tpu.memory_space<vmem>>, %arg6: memref<32x96xbf16, #tpu.memory_space<vmem>>, %arg7: memref<1x96xf32, #tpu.memory_space<vmem>>, %arg8: memref<32x32xbf16, #tpu.memory_space<vmem>>, %arg9: memref<1x32xf32, #tpu.memory_space<vmem>>, %arg10: memref<1x32xf32, #tpu.memory_space<vmem>>, %arg11: memref<1x32xf32, #tpu.memory_space<vmem>>, %arg12: memref<32x96xbf16, #tpu.memory_space<vmem>>, %arg13: memref<1x96xf32, #tpu.memory_space<vmem>>, %arg14: memref<32x32xbf16, #tpu.memory_space<vmem>>, %arg15: memref<1x32xf32, #tpu.memory_space<vmem>>, %arg16: memref<1x32xf32, #tpu.memory_space<vmem>>, %arg17: memref<1x32xf32, #tpu.memory_space<vmem>>, %arg18: memref<3x64x32xbf16, #tpu.memory_space<vmem>>, %arg19: memref<3x1x32xf32, #tpu.memory_space<vmem>>, %arg20: memref<32x64xbf16, #tpu.memory_space<vmem>>, %arg21: memref<1x64xf32, #tpu.memory_space<vmem>>, %arg22: memref<64x32xbf16, #tpu.memory_space<vmem>>, %arg23: memref<1x32xf32, #tpu.memory_space<vmem>>, %arg24: memref<1x32xf32, #tpu.memory_space<vmem>>, %arg25: memref<1x32xf32, #tpu.memory_space<vmem>>, %arg26: memref<1x8x32xbf16, #tpu.memory_space<vmem>>, %arg27: memref<8x32xbf16, #tpu.memory_space<vmem>>) attributes {dimension_semantics = [#tpu.dimension_semantics<parallel>], iteration_bounds = array<i64: 2>, scalar_prefetch = 2 : i64, scratch_operands = 1 : i64, tpu.core_type = #tpu.core_type<tc>, window_params = [{transform_indices = @transform_0, window_bounds = array<i64: 1, 8, 32>}, {transform_indices = @transform_1, window_bounds = array<i64: 1, 8, 32>}, {transform_indices = @transform_2, window_bounds = array<i64: 1, 3, 10, 32>}, {pipeline_mode = #tpu.pipeline_mode<synchronous>, transform_indices = @transform_3, window_bounds = array<i64: 32, 96>}, {pipeline_mode = #tpu.pipeline_mode<synchronous>, transform_indices = @transform_4, window_bounds = array<i64: 1, 96>}, {pipeline_mode = #tpu.pipeline_mode<synchronous>, transform_indices = @transform_5, window_bounds = array<i64: 32, 32>}, {pipeline_mode = #tpu.pipeline_mode<synchronous>, transform_indices = @transform_6, window_bounds = array<i64: 1, 32>}, {pipeline_mode = #tpu.pipeline_mode<synchronous>, transform_indices = @transform_7, window_bounds = array<i64: 1, 32>}, {pipeline_mode = #tpu.pipeline_mode<synchronous>, transform_indices = @transform_8, window_bounds = array<i64: 1, 32>}, {pipeline_mode = #tpu.pipeline_mode<synchronous>, transform_indices = @transform_9, window_bounds = array<i64: 32, 96>}, {pipeline_mode = #tpu.pipeline_mode<synchronous>, transform_indices = @transform_10, window_bounds = array<i64: 1, 96>}, {pipeline_mode = #tpu.pipeline_mode<synchronous>, transform_indices = @transform_11, window_bounds = array<i64: 32, 32>}, {pipeline_mode = #tpu.pipeline_mode<synchronous>, transform_indices = @transform_12, window_bounds = array<i64: 1, 32>}, {pipeline_mode = #tpu.pipeline_mode<synchronous>, transform_indices = @transform_13, window_bounds = array<i64: 1, 32>}, {pipeline_mode = #tpu.pipeline_mode<synchronous>, transform_indices = @transform_14, window_bounds = array<i64: 1, 32>}, {pipeline_mode = #tpu.pipeline_mode<synchronous>, transform_indices = @transform_15, window_bounds = array<i64: 3, 64, 32>}, {pipeline_mode = #tpu.pipeline_mode<synchronous>, transform_indices = @transform_16, window_bounds = array<i64: 3, 1, 32>}, {pipeline_mode = #tpu.pipeline_mode<synchronous>, transform_indices = @transform_17, window_bounds = array<i64: 32, 64>}, {pipeline_mode = #tpu.pipeline_mode<synchronous>, transform_indices = @transform_18, window_bounds = array<i64: 1, 64>}, {pipeline_mode = #tpu.pipeline_mode<synchronous>, transform_indices = @transform_19, window_bounds = array<i64: 64, 32>}, {pipeline_mode = #tpu.pipeline_mode<synchronous>, transform_indices = @transform_20, window_bounds = array<i64: 1, 32>}, {pipeline_mode = #tpu.pipeline_mode<synchronous>, transform_indices = @transform_21, window_bounds = array<i64: 1, 32>}, {pipeline_mode = #tpu.pipeline_mode<synchronous>, transform_indices = @transform_22, window_bounds = array<i64: 1, 32>}, {transform_indices = @transform_23, window_bounds = array<i64: 1, 8, 32>}]} {
    %0 = arith.index_cast %arg0 : i32 to index
    %1 = memref.load %arg1[%0] : memref<2xi32, #tpu.memory_space<smem>>
    %2 = arith.index_cast %arg0 : i32 to index
    %3 = memref.load %arg2[%2] : memref<2xi32, #tpu.memory_space<smem>>
    %c0 = arith.constant 0 : index
    %c0_0 = arith.constant 0 : index
    %c0_1 = arith.constant 0 : index
    %4 = vector.load %arg3[%c0, %c0_0, %c0_1] : memref<1x8x32xbf16, #tpu.memory_space<vmem>>, vector<1x8x32xbf16>
    %5 = vector.shape_cast %4 : vector<1x8x32xbf16> to vector<8x32xbf16>
    %c0_2 = arith.constant 0 : index
    %c0_3 = arith.constant 0 : index
    %c0_4 = arith.constant 0 : index
    %6 = vector.load %arg4[%c0_2, %c0_3, %c0_4] : memref<1x8x32xbf16, #tpu.memory_space<vmem>>, vector<1x8x32xbf16>
    %7 = vector.shape_cast %6 : vector<1x8x32xbf16> to vector<8x32xbf16>
    %8 = arith.addf %5, %7 : vector<8x32xbf16>
    %9 = arith.extf %8 : vector<8x32xbf16> to vector<8x32xf32>
    %c0_5 = arith.constant 0 : index
    %c0_6 = arith.constant 0 : index
    %10 = vector.load %arg6[%c0_5, %c0_6] : memref<32x96xbf16, #tpu.memory_space<vmem>>, vector<32x96xbf16>
    %cst = arith.constant dense<0.000000e+00> : vector<8x96xf32>
    %11 = tpu.matmul %8, %10, %cst {dimension_numbers = #tpu.dot_dimension_numbers<[1], [0], [0], [1], [0, 0, 1, 1], [], []>} : vector<8x32xbf16>, vector<32x96xbf16>, vector<8x96xf32> -> vector<8x96xf32>
    %c0_7 = arith.constant 0 : index
    %c0_8 = arith.constant 0 : index
    %12 = vector.load %arg7[%c0_7, %c0_8] : memref<1x96xf32, #tpu.memory_space<vmem>>, vector<1x96xf32>
    %13 = vector.broadcast %12 : vector<1x96xf32> to vector<8x96xf32>
    %14 = arith.addf %11, %13 : vector<8x96xf32>
    %15 = vector.extract_strided_slice %14 {offsets = [0, 0], sizes = [8, 32], strides = [1, 1]} : vector<8x96xf32> to vector<8x32xf32>
    %16 = vector.extract_strided_slice %14 {offsets = [0, 32], sizes = [8, 32], strides = [1, 1]} : vector<8x96xf32> to vector<8x32xf32>
    %17 = vector.extract_strided_slice %14 {offsets = [0, 64], sizes = [8, 32], strides = [1, 1]} : vector<8x96xf32> to vector<8x32xf32>
    %18 = tpu.iota {dimensions = array<i32: 1>} : vector<8x8xi32>
    %19 = vector.broadcast %1 : i32 to vector<8x8xi32>
    %20 = arith.cmpi sge, %18, %19 : vector<8x8xi32>
    %cst_9 = arith.constant -1.000000e+30 : f32
    %cst_10 = arith.constant 0.000000e+00 : f32
    %21 = vector.broadcast %cst_9 : f32 to vector<8x8xf32>
    %22 = vector.broadcast %cst_10 : f32 to vector<8x8xf32>
    %23 = arith.select %20, %21, %22 : vector<8x8xi1>, vector<8x8xf32>
    %24 = tpu.iota {dimensions = array<i32: 0>} : vector<8x8xi32>
    %25 = arith.cmpi sgt, %18, %24 : vector<8x8xi32>
    %cst_11 = arith.constant -1.000000e+30 : f32
    %26 = vector.broadcast %cst_11 : f32 to vector<8x8xf32>
    %27 = arith.select %25, %26, %23 : vector<8x8xi1>, vector<8x8xf32>
    %28 = vector.extract_strided_slice %15 {offsets = [0, 0], sizes = [8, 8], strides = [1, 1]} : vector<8x32xf32> to vector<8x8xf32>
    %29 = arith.truncf %28 : vector<8x8xf32> to vector<8x8xbf16>
    %30 = vector.extract_strided_slice %16 {offsets = [0, 0], sizes = [8, 8], strides = [1, 1]} : vector<8x32xf32> to vector<8x8xf32>
    %31 = arith.truncf %30 : vector<8x8xf32> to vector<8x8xbf16>
    %32 = vector.extract_strided_slice %17 {offsets = [0, 0], sizes = [8, 8], strides = [1, 1]} : vector<8x32xf32> to vector<8x8xf32>
    %33 = arith.truncf %32 : vector<8x8xf32> to vector<8x8xbf16>
    %cst_12 = arith.constant dense<0.000000e+00> : vector<8x8xf32>
    %34 = tpu.matmul %29, %31, %cst_12 {dimension_numbers = #tpu.dot_dimension_numbers<[1], [1], [0], [0], [0, 0, 1, 0], [], []>} : vector<8x8xbf16>, vector<8x8xbf16>, vector<8x8xf32> -> vector<8x8xf32>
    %cst_13 = arith.constant 0.353553385 : f32
    %35 = vector.broadcast %cst_13 : f32 to vector<8x8xf32>
    %36 = arith.mulf %34, %35 : vector<8x8xf32>
    %37 = arith.addf %36, %27 : vector<8x8xf32>
    %cst_14 = arith.constant dense<0xFF800000> : vector<8xf32>
    %38 = vector.multi_reduction <maximumf>, %37, %cst_14 [1] : vector<8x8xf32> to vector<8xf32>
    %39 = vector.shape_cast %38 : vector<8xf32> to vector<8x1xf32>
    %40 = vector.broadcast %39 : vector<8x1xf32> to vector<8x8xf32>
    %41 = arith.subf %37, %40 : vector<8x8xf32>
    %42 = math.exp %41 : vector<8x8xf32>
    %cst_15 = arith.constant dense<0.000000e+00> : vector<8xf32>
    %43 = vector.multi_reduction <add>, %42, %cst_15 [1] : vector<8x8xf32> to vector<8xf32>
    %44 = vector.shape_cast %43 : vector<8xf32> to vector<8x1xf32>
    %45 = arith.truncf %42 : vector<8x8xf32> to vector<8x8xbf16>
    %cst_16 = arith.constant dense<0.000000e+00> : vector<8x8xf32>
    %46 = tpu.matmul %45, %33, %cst_16 {dimension_numbers = #tpu.dot_dimension_numbers<[1], [0], [0], [1], [0, 0, 1, 1], [], []>} : vector<8x8xbf16>, vector<8x8xbf16>, vector<8x8xf32> -> vector<8x8xf32>
    %47 = tpu.reciprocal %44 {approx = true} : vector<8x1xf32> -> vector<8x1xf32>
    %48 = vector.broadcast %47 : vector<8x1xf32> to vector<8x8xf32>
    %49 = arith.mulf %46, %48 : vector<8x8xf32>
    %50 = arith.truncf %49 : vector<8x8xf32> to vector<8x8xbf16>
    %c0_17 = arith.constant 0 : index
    %c0_18 = arith.constant 0 : index
    %51 = vector.load %arg27[%c0_17, %c0_18] : memref<8x32xbf16, #tpu.memory_space<vmem>>, vector<8x8xbf16>
    tpu.vector_store %arg27[%c0_17, %c0_18], %50 {strides = array<i32>} : memref<8x32xbf16, #tpu.memory_space<vmem>>, vector<8x8xbf16>,
    %52 = vector.extract_strided_slice %15 {offsets = [0, 8], sizes = [8, 8], strides = [1, 1]} : vector<8x32xf32> to vector<8x8xf32>
    %53 = arith.truncf %52 : vector<8x8xf32> to vector<8x8xbf16>
    %54 = vector.extract_strided_slice %16 {offsets = [0, 8], sizes = [8, 8], strides = [1, 1]} : vector<8x32xf32> to vector<8x8xf32>
    %55 = arith.truncf %54 : vector<8x8xf32> to vector<8x8xbf16>
    %56 = vector.extract_strided_slice %17 {offsets = [0, 8], sizes = [8, 8], strides = [1, 1]} : vector<8x32xf32> to vector<8x8xf32>
    %57 = arith.truncf %56 : vector<8x8xf32> to vector<8x8xbf16>
    %cst_19 = arith.constant dense<0.000000e+00> : vector<8x8xf32>
    %58 = tpu.matmul %53, %55, %cst_19 {dimension_numbers = #tpu.dot_dimension_numbers<[1], [1], [0], [0], [0, 0, 1, 0], [], []>} : vector<8x8xbf16>, vector<8x8xbf16>, vector<8x8xf32> -> vector<8x8xf32>
    %cst_20 = arith.constant 0.353553385 : f32
    %59 = vector.broadcast %cst_20 : f32 to vector<8x8xf32>
    %60 = arith.mulf %58, %59 : vector<8x8xf32>
    %61 = arith.addf %60, %27 : vector<8x8xf32>
    %cst_21 = arith.constant dense<0xFF800000> : vector<8xf32>
    %62 = vector.multi_reduction <maximumf>, %61, %cst_21 [1] : vector<8x8xf32> to vector<8xf32>
    %63 = vector.shape_cast %62 : vector<8xf32> to vector<8x1xf32>
    %64 = vector.broadcast %63 : vector<8x1xf32> to vector<8x8xf32>
    %65 = arith.subf %61, %64 : vector<8x8xf32>
    %66 = math.exp %65 : vector<8x8xf32>
    %cst_22 = arith.constant dense<0.000000e+00> : vector<8xf32>
    %67 = vector.multi_reduction <add>, %66, %cst_22 [1] : vector<8x8xf32> to vector<8xf32>
    %68 = vector.shape_cast %67 : vector<8xf32> to vector<8x1xf32>
    %69 = arith.truncf %66 : vector<8x8xf32> to vector<8x8xbf16>
    %cst_23 = arith.constant dense<0.000000e+00> : vector<8x8xf32>
    %70 = tpu.matmul %69, %57, %cst_23 {dimension_numbers = #tpu.dot_dimension_numbers<[1], [0], [0], [1], [0, 0, 1, 1], [], []>} : vector<8x8xbf16>, vector<8x8xbf16>, vector<8x8xf32> -> vector<8x8xf32>
    %71 = tpu.reciprocal %68 {approx = true} : vector<8x1xf32> -> vector<8x1xf32>
    %72 = vector.broadcast %71 : vector<8x1xf32> to vector<8x8xf32>
    %73 = arith.mulf %70, %72 : vector<8x8xf32>
    %74 = arith.truncf %73 : vector<8x8xf32> to vector<8x8xbf16>
    %c0_24 = arith.constant 0 : index
    %c8 = arith.constant 8 : index
    %75 = vector.load %arg27[%c0_24, %c8] : memref<8x32xbf16, #tpu.memory_space<vmem>>, vector<8x8xbf16>
    tpu.vector_store %arg27[%c0_24, %c8], %74 {strides = array<i32>} : memref<8x32xbf16, #tpu.memory_space<vmem>>, vector<8x8xbf16>,
    %76 = vector.extract_strided_slice %15 {offsets = [0, 16], sizes = [8, 8], strides = [1, 1]} : vector<8x32xf32> to vector<8x8xf32>
    %77 = arith.truncf %76 : vector<8x8xf32> to vector<8x8xbf16>
    %78 = vector.extract_strided_slice %16 {offsets = [0, 16], sizes = [8, 8], strides = [1, 1]} : vector<8x32xf32> to vector<8x8xf32>
    %79 = arith.truncf %78 : vector<8x8xf32> to vector<8x8xbf16>
    %80 = vector.extract_strided_slice %17 {offsets = [0, 16], sizes = [8, 8], strides = [1, 1]} : vector<8x32xf32> to vector<8x8xf32>
    %81 = arith.truncf %80 : vector<8x8xf32> to vector<8x8xbf16>
    %cst_25 = arith.constant dense<0.000000e+00> : vector<8x8xf32>
    %82 = tpu.matmul %77, %79, %cst_25 {dimension_numbers = #tpu.dot_dimension_numbers<[1], [1], [0], [0], [0, 0, 1, 0], [], []>} : vector<8x8xbf16>, vector<8x8xbf16>, vector<8x8xf32> -> vector<8x8xf32>
    %cst_26 = arith.constant 0.353553385 : f32
    %83 = vector.broadcast %cst_26 : f32 to vector<8x8xf32>
    %84 = arith.mulf %82, %83 : vector<8x8xf32>
    %85 = arith.addf %84, %27 : vector<8x8xf32>
    %cst_27 = arith.constant dense<0xFF800000> : vector<8xf32>
    %86 = vector.multi_reduction <maximumf>, %85, %cst_27 [1] : vector<8x8xf32> to vector<8xf32>
    %87 = vector.shape_cast %86 : vector<8xf32> to vector<8x1xf32>
    %88 = vector.broadcast %87 : vector<8x1xf32> to vector<8x8xf32>
    %89 = arith.subf %85, %88 : vector<8x8xf32>
    %90 = math.exp %89 : vector<8x8xf32>
    %cst_28 = arith.constant dense<0.000000e+00> : vector<8xf32>
    %91 = vector.multi_reduction <add>, %90, %cst_28 [1] : vector<8x8xf32> to vector<8xf32>
    %92 = vector.shape_cast %91 : vector<8xf32> to vector<8x1xf32>
    %93 = arith.truncf %90 : vector<8x8xf32> to vector<8x8xbf16>
    %cst_29 = arith.constant dense<0.000000e+00> : vector<8x8xf32>
    %94 = tpu.matmul %93, %81, %cst_29 {dimension_numbers = #tpu.dot_dimension_numbers<[1], [0], [0], [1], [0, 0, 1, 1], [], []>} : vector<8x8xbf16>, vector<8x8xbf16>, vector<8x8xf32> -> vector<8x8xf32>
    %95 = tpu.reciprocal %92 {approx = true} : vector<8x1xf32> -> vector<8x1xf32>
    %96 = vector.broadcast %95 : vector<8x1xf32> to vector<8x8xf32>
    %97 = arith.mulf %94, %96 : vector<8x8xf32>
    %98 = arith.truncf %97 : vector<8x8xf32> to vector<8x8xbf16>
    %c0_30 = arith.constant 0 : index
    %c16 = arith.constant 16 : index
    %99 = vector.load %arg27[%c0_30, %c16] : memref<8x32xbf16, #tpu.memory_space<vmem>>, vector<8x8xbf16>
    tpu.vector_store %arg27[%c0_30, %c16], %98 {strides = array<i32>} : memref<8x32xbf16, #tpu.memory_space<vmem>>, vector<8x8xbf16>,
    %100 = vector.extract_strided_slice %15 {offsets = [0, 24], sizes = [8, 8], strides = [1, 1]} : vector<8x32xf32> to vector<8x8xf32>
    %101 = arith.truncf %100 : vector<8x8xf32> to vector<8x8xbf16>
    %102 = vector.extract_strided_slice %16 {offsets = [0, 24], sizes = [8, 8], strides = [1, 1]} : vector<8x32xf32> to vector<8x8xf32>
    %103 = arith.truncf %102 : vector<8x8xf32> to vector<8x8xbf16>
    %104 = vector.extract_strided_slice %17 {offsets = [0, 24], sizes = [8, 8], strides = [1, 1]} : vector<8x32xf32> to vector<8x8xf32>
    %105 = arith.truncf %104 : vector<8x8xf32> to vector<8x8xbf16>
    %cst_31 = arith.constant dense<0.000000e+00> : vector<8x8xf32>
    %106 = tpu.matmul %101, %103, %cst_31 {dimension_numbers = #tpu.dot_dimension_numbers<[1], [1], [0], [0], [0, 0, 1, 0], [], []>} : vector<8x8xbf16>, vector<8x8xbf16>, vector<8x8xf32> -> vector<8x8xf32>
    %cst_32 = arith.constant 0.353553385 : f32
    %107 = vector.broadcast %cst_32 : f32 to vector<8x8xf32>
    %108 = arith.mulf %106, %107 : vector<8x8xf32>
    %109 = arith.addf %108, %27 : vector<8x8xf32>
    %cst_33 = arith.constant dense<0xFF800000> : vector<8xf32>
    %110 = vector.multi_reduction <maximumf>, %109, %cst_33 [1] : vector<8x8xf32> to vector<8xf32>
    %111 = vector.shape_cast %110 : vector<8xf32> to vector<8x1xf32>
    %112 = vector.broadcast %111 : vector<8x1xf32> to vector<8x8xf32>
    %113 = arith.subf %109, %112 : vector<8x8xf32>
    %114 = math.exp %113 : vector<8x8xf32>
    %cst_34 = arith.constant dense<0.000000e+00> : vector<8xf32>
    %115 = vector.multi_reduction <add>, %114, %cst_34 [1] : vector<8x8xf32> to vector<8xf32>
    %116 = vector.shape_cast %115 : vector<8xf32> to vector<8x1xf32>
    %117 = arith.truncf %114 : vector<8x8xf32> to vector<8x8xbf16>
    %cst_35 = arith.constant dense<0.000000e+00> : vector<8x8xf32>
    %118 = tpu.matmul %117, %105, %cst_35 {dimension_numbers = #tpu.dot_dimension_numbers<[1], [0], [0], [1], [0, 0, 1, 1], [], []>} : vector<8x8xbf16>, vector<8x8xbf16>, vector<8x8xf32> -> vector<8x8xf32>
    %119 = tpu.reciprocal %116 {approx = true} : vector<8x1xf32> -> vector<8x1xf32>
    %120 = vector.broadcast %119 : vector<8x1xf32> to vector<8x8xf32>
    %121 = arith.mulf %118, %120 : vector<8x8xf32>
    %122 = arith.truncf %121 : vector<8x8xf32> to vector<8x8xbf16>
    %c0_36 = arith.constant 0 : index
    %c24 = arith.constant 24 : index
    %123 = vector.load %arg27[%c0_36, %c24] : memref<8x32xbf16, #tpu.memory_space<vmem>>, vector<8x8xbf16>
    tpu.vector_store %arg27[%c0_36, %c24], %122 {strides = array<i32>} : memref<8x32xbf16, #tpu.memory_space<vmem>>, vector<8x8xbf16>,
    %c0_37 = arith.constant 0 : index
    %c0_38 = arith.constant 0 : index
    %124 = vector.load %arg27[%c0_37, %c0_38] : memref<8x32xbf16, #tpu.memory_space<vmem>>, vector<8x32xbf16>
    %c0_39 = arith.constant 0 : index
    %c0_40 = arith.constant 0 : index
    %125 = vector.load %arg8[%c0_39, %c0_40] : memref<32x32xbf16, #tpu.memory_space<vmem>>, vector<32x32xbf16>
    %cst_41 = arith.constant dense<0.000000e+00> : vector<8x32xf32>
    %126 = tpu.matmul %124, %125, %cst_41 {dimension_numbers = #tpu.dot_dimension_numbers<[1], [0], [0], [1], [0, 0, 1, 1], [], []>} : vector<8x32xbf16>, vector<32x32xbf16>, vector<8x32xf32> -> vector<8x32xf32>
    %c0_42 = arith.constant 0 : index
    %c0_43 = arith.constant 0 : index
    %127 = vector.load %arg9[%c0_42, %c0_43] : memref<1x32xf32, #tpu.memory_space<vmem>>, vector<1x32xf32>
    %128 = vector.broadcast %127 : vector<1x32xf32> to vector<8x32xf32>
    %129 = arith.addf %126, %128 : vector<8x32xf32>
    %130 = arith.addf %9, %129 : vector<8x32xf32>
    %cst_44 = arith.constant dense<0.000000e+00> : vector<8xf32>
    %131 = vector.multi_reduction <add>, %130, %cst_44 [1] : vector<8x32xf32> to vector<8xf32>
    %132 = vector.shape_cast %131 : vector<8xf32> to vector<8x1xf32>
    %cst_45 = arith.constant 3.200000e+01 : f32
    %133 = vector.broadcast %cst_45 : f32 to vector<8x1xf32>
    %134 = arith.divf %132, %133 : vector<8x1xf32>
    %135 = vector.broadcast %134 : vector<8x1xf32> to vector<8x32xf32>
    %136 = arith.subf %130, %135 : vector<8x32xf32>
    %137 = arith.mulf %136, %136 : vector<8x32xf32>
    %cst_46 = arith.constant dense<0.000000e+00> : vector<8xf32>
    %138 = vector.multi_reduction <add>, %137, %cst_46 [1] : vector<8x32xf32> to vector<8xf32>
    %139 = vector.shape_cast %138 : vector<8xf32> to vector<8x1xf32>
    %cst_47 = arith.constant 3.200000e+01 : f32
    %140 = vector.broadcast %cst_47 : f32 to vector<8x1xf32>
    %141 = arith.divf %139, %140 : vector<8x1xf32>
    %142 = vector.broadcast %134 : vector<8x1xf32> to vector<8x32xf32>
    %143 = arith.subf %130, %142 : vector<8x32xf32>
    %cst_48 = arith.constant 9.99999974E-6 : f32
    %144 = vector.broadcast %cst_48 : f32 to vector<8x1xf32>
    %145 = arith.addf %141, %144 : vector<8x1xf32>
    %146 = math.rsqrt %145 : vector<8x1xf32>
    %147 = vector.broadcast %146 : vector<8x1xf32> to vector<8x32xf32>
    %148 = arith.mulf %143, %147 : vector<8x32xf32>
    %c0_49 = arith.constant 0 : index
    %c0_50 = arith.constant 0 : index
    %149 = vector.load %arg10[%c0_49, %c0_50] : memref<1x32xf32, #tpu.memory_space<vmem>>, vector<1x32xf32>
    %150 = vector.broadcast %149 : vector<1x32xf32> to vector<8x32xf32>
    %151 = arith.mulf %148, %150 : vector<8x32xf32>
    %c0_51 = arith.constant 0 : index
    %c0_52 = arith.constant 0 : index
    %152 = vector.load %arg11[%c0_51, %c0_52] : memref<1x32xf32, #tpu.memory_space<vmem>>, vector<1x32xf32>
    %153 = vector.broadcast %152 : vector<1x32xf32> to vector<8x32xf32>
    %154 = arith.addf %151, %153 : vector<8x32xf32>
    %155 = tpu.iota {dimensions = array<i32: 0>} : vector<8x1xi32>
    %156 = vector.broadcast %1 : i32 to vector<8x1xi32>
    %157 = arith.cmpi sge, %155, %156 : vector<8x1xi32>
    %cst_53 = arith.constant 0.000000e+00 : f32
    %158 = vector.shape_cast %157 : vector<8x1xi1> to vector<8x1xi1>
    %159 = vector.broadcast %158 : vector<8x1xi1> to vector<8x32xi1>
    %160 = vector.broadcast %cst_53 : f32 to vector<8x32xf32>
    %161 = arith.select %159, %160, %154 : vector<8x32xi1>, vector<8x32xf32>
    %162 = arith.truncf %161 : vector<8x32xf32> to vector<8x32xbf16>
    %c0_54 = arith.constant 0 : index
    %c0_55 = arith.constant 0 : index
    %163 = vector.load %arg12[%c0_54, %c0_55] : memref<32x96xbf16, #tpu.memory_space<vmem>>, vector<32x32xbf16>
    %cst_56 = arith.constant dense<0.000000e+00> : vector<8x32xf32>
    %164 = tpu.matmul %162, %163, %cst_56 {dimension_numbers = #tpu.dot_dimension_numbers<[1], [0], [0], [1], [0, 0, 1, 1], [], []>} : vector<8x32xbf16>, vector<32x32xbf16>, vector<8x32xf32> -> vector<8x32xf32>
    %c0_57 = arith.constant 0 : index
    %c0_58 = arith.constant 0 : index
    %165 = vector.load %arg13[%c0_57, %c0_58] : memref<1x96xf32, #tpu.memory_space<vmem>>, vector<1x32xf32>
    %166 = vector.broadcast %165 : vector<1x32xf32> to vector<8x32xf32>
    %167 = arith.addf %164, %166 : vector<8x32xf32>
    %cst_59 = arith.constant 0.000000e+00 : f32
    %168 = vector.broadcast %cst_59 : f32 to vector<8x32xf32>
    %c0_60 = arith.constant 0 : index
    %c0_61 = arith.constant 0 : index
    %c0_62 = arith.constant 0 : index
    %c0_63 = arith.constant 0 : index
    %169 = vector.load %arg5[%c0_60, %c0_61, %c0_62, %c0_63] : memref<1x3x10x32xbf16, #tpu.memory_space<vmem>>, vector<1x1x10x32xbf16>
    %170 = vector.shape_cast %169 : vector<1x1x10x32xbf16> to vector<10x32xbf16>
    %c0_64 = arith.constant 0 : index
    %c32 = arith.constant 32 : index
    %171 = vector.load %arg12[%c0_64, %c32] : memref<32x96xbf16, #tpu.memory_space<vmem>>, vector<32x64xbf16>
    %cst_65 = arith.constant dense<0.000000e+00> : vector<10x64xf32>
    %172 = tpu.matmul %170, %171, %cst_65 {dimension_numbers = #tpu.dot_dimension_numbers<[1], [0], [0], [1], [0, 0, 1, 1], [], []>} : vector<10x32xbf16>, vector<32x64xbf16>, vector<10x64xf32> -> vector<10x64xf32>
    %c0_66 = arith.constant 0 : index
    %c32_67 = arith.constant 32 : index
    %173 = vector.load %arg13[%c0_66, %c32_67] : memref<1x96xf32, #tpu.memory_space<vmem>>, vector<1x64xf32>
    %174 = vector.broadcast %173 : vector<1x64xf32> to vector<10x64xf32>
    %175 = arith.addf %172, %174 : vector<10x64xf32>
    %176 = vector.extract_strided_slice %175 {offsets = [0, 0], sizes = [10, 32], strides = [1, 1]} : vector<10x64xf32> to vector<10x32xf32>
    %177 = vector.extract_strided_slice %175 {offsets = [0, 32], sizes = [10, 32], strides = [1, 1]} : vector<10x64xf32> to vector<10x32xf32>
    %178 = tpu.iota {dimensions = array<i32: 1>} : vector<8x10xi32>
    %179 = vector.broadcast %3 : i32 to vector<8x10xi32>
    %180 = arith.cmpi sge, %178, %179 : vector<8x10xi32>
    %cst_68 = arith.constant -1.000000e+30 : f32
    %cst_69 = arith.constant 0.000000e+00 : f32
    %181 = vector.broadcast %cst_68 : f32 to vector<8x10xf32>
    %182 = vector.broadcast %cst_69 : f32 to vector<8x10xf32>
    %183 = arith.select %180, %181, %182 : vector<8x10xi1>, vector<8x10xf32>
    %184 = vector.extract_strided_slice %167 {offsets = [0, 0], sizes = [8, 8], strides = [1, 1]} : vector<8x32xf32> to vector<8x8xf32>
    %185 = arith.truncf %184 : vector<8x8xf32> to vector<8x8xbf16>
    %186 = vector.extract_strided_slice %176 {offsets = [0, 0], sizes = [10, 8], strides = [1, 1]} : vector<10x32xf32> to vector<10x8xf32>
    %187 = arith.truncf %186 : vector<10x8xf32> to vector<10x8xbf16>
    %188 = vector.extract_strided_slice %177 {offsets = [0, 0], sizes = [10, 8], strides = [1, 1]} : vector<10x32xf32> to vector<10x8xf32>
    %189 = arith.truncf %188 : vector<10x8xf32> to vector<10x8xbf16>
    %cst_70 = arith.constant dense<0.000000e+00> : vector<8x10xf32>
    %190 = tpu.matmul %185, %187, %cst_70 {dimension_numbers = #tpu.dot_dimension_numbers<[1], [1], [0], [0], [0, 0, 1, 0], [], []>} : vector<8x8xbf16>, vector<10x8xbf16>, vector<8x10xf32> -> vector<8x10xf32>
    %cst_71 = arith.constant 0.353553385 : f32
    %191 = vector.broadcast %cst_71 : f32 to vector<8x10xf32>
    %192 = arith.mulf %190, %191 : vector<8x10xf32>
    %193 = arith.addf %192, %183 : vector<8x10xf32>
    %cst_72 = arith.constant dense<0xFF800000> : vector<8xf32>
    %194 = vector.multi_reduction <maximumf>, %193, %cst_72 [1] : vector<8x10xf32> to vector<8xf32>
    %195 = vector.shape_cast %194 : vector<8xf32> to vector<8x1xf32>
    %196 = vector.broadcast %195 : vector<8x1xf32> to vector<8x10xf32>
    %197 = arith.subf %193, %196 : vector<8x10xf32>
    %198 = math.exp %197 : vector<8x10xf32>
    %cst_73 = arith.constant dense<0.000000e+00> : vector<8xf32>
    %199 = vector.multi_reduction <add>, %198, %cst_73 [1] : vector<8x10xf32> to vector<8xf32>
    %200 = vector.shape_cast %199 : vector<8xf32> to vector<8x1xf32>
    %201 = arith.truncf %198 : vector<8x10xf32> to vector<8x10xbf16>
    %cst_74 = arith.constant dense<0.000000e+00> : vector<8x8xf32>
    %202 = tpu.matmul %201, %189, %cst_74 {dimension_numbers = #tpu.dot_dimension_numbers<[1], [0], [0], [1], [0, 0, 1, 1], [], []>} : vector<8x10xbf16>, vector<10x8xbf16>, vector<8x8xf32> -> vector<8x8xf32>
    %203 = tpu.reciprocal %200 {approx = true} : vector<8x1xf32> -> vector<8x1xf32>
    %204 = vector.broadcast %203 : vector<8x1xf32> to vector<8x8xf32>
    %205 = arith.mulf %202, %204 : vector<8x8xf32>
    %206 = arith.truncf %205 : vector<8x8xf32> to vector<8x8xbf16>
    %c0_75 = arith.constant 0 : index
    %c0_76 = arith.constant 0 : index
    %207 = vector.load %arg27[%c0_75, %c0_76] : memref<8x32xbf16, #tpu.memory_space<vmem>>, vector<8x8xbf16>
    tpu.vector_store %arg27[%c0_75, %c0_76], %206 {strides = array<i32>} : memref<8x32xbf16, #tpu.memory_space<vmem>>, vector<8x8xbf16>,
    %208 = vector.extract_strided_slice %167 {offsets = [0, 8], sizes = [8, 8], strides = [1, 1]} : vector<8x32xf32> to vector<8x8xf32>
    %209 = arith.truncf %208 : vector<8x8xf32> to vector<8x8xbf16>
    %210 = vector.extract_strided_slice %176 {offsets = [0, 8], sizes = [10, 8], strides = [1, 1]} : vector<10x32xf32> to vector<10x8xf32>
    %211 = arith.truncf %210 : vector<10x8xf32> to vector<10x8xbf16>
    %212 = vector.extract_strided_slice %177 {offsets = [0, 8], sizes = [10, 8], strides = [1, 1]} : vector<10x32xf32> to vector<10x8xf32>
    %213 = arith.truncf %212 : vector<10x8xf32> to vector<10x8xbf16>
    %cst_77 = arith.constant dense<0.000000e+00> : vector<8x10xf32>
    %214 = tpu.matmul %209, %211, %cst_77 {dimension_numbers = #tpu.dot_dimension_numbers<[1], [1], [0], [0], [0, 0, 1, 0], [], []>} : vector<8x8xbf16>, vector<10x8xbf16>, vector<8x10xf32> -> vector<8x10xf32>
    %cst_78 = arith.constant 0.353553385 : f32
    %215 = vector.broadcast %cst_78 : f32 to vector<8x10xf32>
    %216 = arith.mulf %214, %215 : vector<8x10xf32>
    %217 = arith.addf %216, %183 : vector<8x10xf32>
    %cst_79 = arith.constant dense<0xFF800000> : vector<8xf32>
    %218 = vector.multi_reduction <maximumf>, %217, %cst_79 [1] : vector<8x10xf32> to vector<8xf32>
    %219 = vector.shape_cast %218 : vector<8xf32> to vector<8x1xf32>
    %220 = vector.broadcast %219 : vector<8x1xf32> to vector<8x10xf32>
    %221 = arith.subf %217, %220 : vector<8x10xf32>
    %222 = math.exp %221 : vector<8x10xf32>
    %cst_80 = arith.constant dense<0.000000e+00> : vector<8xf32>
    %223 = vector.multi_reduction <add>, %222, %cst_80 [1] : vector<8x10xf32> to vector<8xf32>
    %224 = vector.shape_cast %223 : vector<8xf32> to vector<8x1xf32>
    %225 = arith.truncf %222 : vector<8x10xf32> to vector<8x10xbf16>
    %cst_81 = arith.constant dense<0.000000e+00> : vector<8x8xf32>
    %226 = tpu.matmul %225, %213, %cst_81 {dimension_numbers = #tpu.dot_dimension_numbers<[1], [0], [0], [1], [0, 0, 1, 1], [], []>} : vector<8x10xbf16>, vector<10x8xbf16>, vector<8x8xf32> -> vector<8x8xf32>
    %227 = tpu.reciprocal %224 {approx = true} : vector<8x1xf32> -> vector<8x1xf32>
    %228 = vector.broadcast %227 : vector<8x1xf32> to vector<8x8xf32>
    %229 = arith.mulf %226, %228 : vector<8x8xf32>
    %230 = arith.truncf %229 : vector<8x8xf32> to vector<8x8xbf16>
    %c0_82 = arith.constant 0 : index
    %c8_83 = arith.constant 8 : index
    %231 = vector.load %arg27[%c0_82, %c8_83] : memref<8x32xbf16, #tpu.memory_space<vmem>>, vector<8x8xbf16>
    tpu.vector_store %arg27[%c0_82, %c8_83], %230 {strides = array<i32>} : memref<8x32xbf16, #tpu.memory_space<vmem>>, vector<8x8xbf16>,
    %232 = vector.extract_strided_slice %167 {offsets = [0, 16], sizes = [8, 8], strides = [1, 1]} : vector<8x32xf32> to vector<8x8xf32>
    %233 = arith.truncf %232 : vector<8x8xf32> to vector<8x8xbf16>
    %234 = vector.extract_strided_slice %176 {offsets = [0, 16], sizes = [10, 8], strides = [1, 1]} : vector<10x32xf32> to vector<10x8xf32>
    %235 = arith.truncf %234 : vector<10x8xf32> to vector<10x8xbf16>
    %236 = vector.extract_strided_slice %177 {offsets = [0, 16], sizes = [10, 8], strides = [1, 1]} : vector<10x32xf32> to vector<10x8xf32>
    %237 = arith.truncf %236 : vector<10x8xf32> to vector<10x8xbf16>
    %cst_84 = arith.constant dense<0.000000e+00> : vector<8x10xf32>
    %238 = tpu.matmul %233, %235, %cst_84 {dimension_numbers = #tpu.dot_dimension_numbers<[1], [1], [0], [0], [0, 0, 1, 0], [], []>} : vector<8x8xbf16>, vector<10x8xbf16>, vector<8x10xf32> -> vector<8x10xf32>
    %cst_85 = arith.constant 0.353553385 : f32
    %239 = vector.broadcast %cst_85 : f32 to vector<8x10xf32>
    %240 = arith.mulf %238, %239 : vector<8x10xf32>
    %241 = arith.addf %240, %183 : vector<8x10xf32>
    %cst_86 = arith.constant dense<0xFF800000> : vector<8xf32>
    %242 = vector.multi_reduction <maximumf>, %241, %cst_86 [1] : vector<8x10xf32> to vector<8xf32>
    %243 = vector.shape_cast %242 : vector<8xf32> to vector<8x1xf32>
    %244 = vector.broadcast %243 : vector<8x1xf32> to vector<8x10xf32>
    %245 = arith.subf %241, %244 : vector<8x10xf32>
    %246 = math.exp %245 : vector<8x10xf32>
    %cst_87 = arith.constant dense<0.000000e+00> : vector<8xf32>
    %247 = vector.multi_reduction <add>, %246, %cst_87 [1] : vector<8x10xf32> to vector<8xf32>
    %248 = vector.shape_cast %247 : vector<8xf32> to vector<8x1xf32>
    %249 = arith.truncf %246 : vector<8x10xf32> to vector<8x10xbf16>
    %cst_88 = arith.constant dense<0.000000e+00> : vector<8x8xf32>
    %250 = tpu.matmul %249, %237, %cst_88 {dimension_numbers = #tpu.dot_dimension_numbers<[1], [0], [0], [1], [0, 0, 1, 1], [], []>} : vector<8x10xbf16>, vector<10x8xbf16>, vector<8x8xf32> -> vector<8x8xf32>
    %251 = tpu.reciprocal %248 {approx = true} : vector<8x1xf32> -> vector<8x1xf32>
    %252 = vector.broadcast %251 : vector<8x1xf32> to vector<8x8xf32>
    %253 = arith.mulf %250, %252 : vector<8x8xf32>
    %254 = arith.truncf %253 : vector<8x8xf32> to vector<8x8xbf16>
    %c0_89 = arith.constant 0 : index
    %c16_90 = arith.constant 16 : index
    %255 = vector.load %arg27[%c0_89, %c16_90] : memref<8x32xbf16, #tpu.memory_space<vmem>>, vector<8x8xbf16>
    tpu.vector_store %arg27[%c0_89, %c16_90], %254 {strides = array<i32>} : memref<8x32xbf16, #tpu.memory_space<vmem>>, vector<8x8xbf16>,
    %256 = vector.extract_strided_slice %167 {offsets = [0, 24], sizes = [8, 8], strides = [1, 1]} : vector<8x32xf32> to vector<8x8xf32>
    %257 = arith.truncf %256 : vector<8x8xf32> to vector<8x8xbf16>
    %258 = vector.extract_strided_slice %176 {offsets = [0, 24], sizes = [10, 8], strides = [1, 1]} : vector<10x32xf32> to vector<10x8xf32>
    %259 = arith.truncf %258 : vector<10x8xf32> to vector<10x8xbf16>
    %260 = vector.extract_strided_slice %177 {offsets = [0, 24], sizes = [10, 8], strides = [1, 1]} : vector<10x32xf32> to vector<10x8xf32>
    %261 = arith.truncf %260 : vector<10x8xf32> to vector<10x8xbf16>
    %cst_91 = arith.constant dense<0.000000e+00> : vector<8x10xf32>
    %262 = tpu.matmul %257, %259, %cst_91 {dimension_numbers = #tpu.dot_dimension_numbers<[1], [1], [0], [0], [0, 0, 1, 0], [], []>} : vector<8x8xbf16>, vector<10x8xbf16>, vector<8x10xf32> -> vector<8x10xf32>
    %cst_92 = arith.constant 0.353553385 : f32
    %263 = vector.broadcast %cst_92 : f32 to vector<8x10xf32>
    %264 = arith.mulf %262, %263 : vector<8x10xf32>
    %265 = arith.addf %264, %183 : vector<8x10xf32>
    %cst_93 = arith.constant dense<0xFF800000> : vector<8xf32>
    %266 = vector.multi_reduction <maximumf>, %265, %cst_93 [1] : vector<8x10xf32> to vector<8xf32>
    %267 = vector.shape_cast %266 : vector<8xf32> to vector<8x1xf32>
    %268 = vector.broadcast %267 : vector<8x1xf32> to vector<8x10xf32>
    %269 = arith.subf %265, %268 : vector<8x10xf32>
    %270 = math.exp %269 : vector<8x10xf32>
    %cst_94 = arith.constant dense<0.000000e+00> : vector<8xf32>
    %271 = vector.multi_reduction <add>, %270, %cst_94 [1] : vector<8x10xf32> to vector<8xf32>
    %272 = vector.shape_cast %271 : vector<8xf32> to vector<8x1xf32>
    %273 = arith.truncf %270 : vector<8x10xf32> to vector<8x10xbf16>
    %cst_95 = arith.constant dense<0.000000e+00> : vector<8x8xf32>
    %274 = tpu.matmul %273, %261, %cst_95 {dimension_numbers = #tpu.dot_dimension_numbers<[1], [0], [0], [1], [0, 0, 1, 1], [], []>} : vector<8x10xbf16>, vector<10x8xbf16>, vector<8x8xf32> -> vector<8x8xf32>
    %275 = tpu.reciprocal %272 {approx = true} : vector<8x1xf32> -> vector<8x1xf32>
    %276 = vector.broadcast %275 : vector<8x1xf32> to vector<8x8xf32>
    %277 = arith.mulf %274, %276 : vector<8x8xf32>
    %278 = arith.truncf %277 : vector<8x8xf32> to vector<8x8xbf16>
    %c0_96 = arith.constant 0 : index
    %c24_97 = arith.constant 24 : index
    %279 = vector.load %arg27[%c0_96, %c24_97] : memref<8x32xbf16, #tpu.memory_space<vmem>>, vector<8x8xbf16>
    tpu.vector_store %arg27[%c0_96, %c24_97], %278 {strides = array<i32>} : memref<8x32xbf16, #tpu.memory_space<vmem>>, vector<8x8xbf16>,
    %c0_98 = arith.constant 0 : index
    %c0_99 = arith.constant 0 : index
    %280 = vector.load %arg27[%c0_98, %c0_99] : memref<8x32xbf16, #tpu.memory_space<vmem>>, vector<8x32xbf16>
    %c0_100 = arith.constant 0 : index
    %c0_101 = arith.constant 0 : index
    %281 = vector.load %arg14[%c0_100, %c0_101] : memref<32x32xbf16, #tpu.memory_space<vmem>>, vector<32x32xbf16>
    %cst_102 = arith.constant dense<0.000000e+00> : vector<8x32xf32>
    %282 = tpu.matmul %280, %281, %cst_102 {dimension_numbers = #tpu.dot_dimension_numbers<[1], [0], [0], [1], [0, 0, 1, 1], [], []>} : vector<8x32xbf16>, vector<32x32xbf16>, vector<8x32xf32> -> vector<8x32xf32>
    %c0_103 = arith.constant 0 : index
    %c0_104 = arith.constant 0 : index
    %283 = vector.load %arg15[%c0_103, %c0_104] : memref<1x32xf32, #tpu.memory_space<vmem>>, vector<1x32xf32>
    %284 = vector.broadcast %283 : vector<1x32xf32> to vector<8x32xf32>
    %285 = arith.addf %282, %284 : vector<8x32xf32>
    %286 = arith.addf %161, %285 : vector<8x32xf32>
    %cst_105 = arith.constant dense<0.000000e+00> : vector<8xf32>
    %287 = vector.multi_reduction <add>, %286, %cst_105 [1] : vector<8x32xf32> to vector<8xf32>
    %288 = vector.shape_cast %287 : vector<8xf32> to vector<8x1xf32>
    %cst_106 = arith.constant 3.200000e+01 : f32
    %289 = vector.broadcast %cst_106 : f32 to vector<8x1xf32>
    %290 = arith.divf %288, %289 : vector<8x1xf32>
    %291 = vector.broadcast %290 : vector<8x1xf32> to vector<8x32xf32>
    %292 = arith.subf %286, %291 : vector<8x32xf32>
    %293 = arith.mulf %292, %292 : vector<8x32xf32>
    %cst_107 = arith.constant dense<0.000000e+00> : vector<8xf32>
    %294 = vector.multi_reduction <add>, %293, %cst_107 [1] : vector<8x32xf32> to vector<8xf32>
    %295 = vector.shape_cast %294 : vector<8xf32> to vector<8x1xf32>
    %cst_108 = arith.constant 3.200000e+01 : f32
    %296 = vector.broadcast %cst_108 : f32 to vector<8x1xf32>
    %297 = arith.divf %295, %296 : vector<8x1xf32>
    %298 = vector.broadcast %290 : vector<8x1xf32> to vector<8x32xf32>
    %299 = arith.subf %286, %298 : vector<8x32xf32>
    %cst_109 = arith.constant 9.99999974E-6 : f32
    %300 = vector.broadcast %cst_109 : f32 to vector<8x1xf32>
    %301 = arith.addf %297, %300 : vector<8x1xf32>
    %302 = math.rsqrt %301 : vector<8x1xf32>
    %303 = vector.broadcast %302 : vector<8x1xf32> to vector<8x32xf32>
    %304 = arith.mulf %299, %303 : vector<8x32xf32>
    %c0_110 = arith.constant 0 : index
    %c0_111 = arith.constant 0 : index
    %305 = vector.load %arg16[%c0_110, %c0_111] : memref<1x32xf32, #tpu.memory_space<vmem>>, vector<1x32xf32>
    %306 = vector.broadcast %305 : vector<1x32xf32> to vector<8x32xf32>
    %307 = arith.mulf %304, %306 : vector<8x32xf32>
    %c0_112 = arith.constant 0 : index
    %c0_113 = arith.constant 0 : index
    %308 = vector.load %arg17[%c0_112, %c0_113] : memref<1x32xf32, #tpu.memory_space<vmem>>, vector<1x32xf32>
    %309 = vector.broadcast %308 : vector<1x32xf32> to vector<8x32xf32>
    %310 = arith.addf %307, %309 : vector<8x32xf32>
    %311 = tpu.iota {dimensions = array<i32: 0>} : vector<8x1xi32>
    %312 = vector.broadcast %1 : i32 to vector<8x1xi32>
    %313 = arith.cmpi sge, %311, %312 : vector<8x1xi32>
    %cst_114 = arith.constant 0.000000e+00 : f32
    %314 = vector.shape_cast %313 : vector<8x1xi1> to vector<8x1xi1>
    %315 = vector.broadcast %314 : vector<8x1xi1> to vector<8x32xi1>
    %316 = vector.broadcast %cst_114 : f32 to vector<8x32xf32>
    %317 = arith.select %315, %316, %310 : vector<8x32xi1>, vector<8x32xf32>
    %c0_115 = arith.constant 0 : index
    %c0_116 = arith.constant 0 : index
    %c0_117 = arith.constant 0 : index
    %318 = vector.load %arg18[%c0_115, %c0_116, %c0_117] : memref<3x64x32xbf16, #tpu.memory_space<vmem>>, vector<1x32x32xbf16>
    %319 = vector.shape_cast %318 : vector<1x32x32xbf16> to vector<32x32xbf16>
    %cst_118 = arith.constant dense<0.000000e+00> : vector<8x32xf32>
    %320 = tpu.matmul %162, %319, %cst_118 {dimension_numbers = #tpu.dot_dimension_numbers<[1], [0], [0], [1], [0, 0, 1, 1], [], []>} : vector<8x32xbf16>, vector<32x32xbf16>, vector<8x32xf32> -> vector<8x32xf32>
    %321 = arith.truncf %317 : vector<8x32xf32> to vector<8x32xbf16>
    %c0_119 = arith.constant 0 : index
    %c32_120 = arith.constant 32 : index
    %c0_121 = arith.constant 0 : index
    %322 = vector.load %arg18[%c0_119, %c32_120, %c0_121] : memref<3x64x32xbf16, #tpu.memory_space<vmem>>, vector<1x32x32xbf16>
    %323 = vector.shape_cast %322 : vector<1x32x32xbf16> to vector<32x32xbf16>
    %cst_122 = arith.constant dense<0.000000e+00> : vector<8x32xf32>
    %324 = tpu.matmul %321, %323, %cst_122 {dimension_numbers = #tpu.dot_dimension_numbers<[1], [0], [0], [1], [0, 0, 1, 1], [], []>} : vector<8x32xbf16>, vector<32x32xbf16>, vector<8x32xf32> -> vector<8x32xf32>
    %325 = arith.addf %320, %324 : vector<8x32xf32>
    %c0_123 = arith.constant 0 : index
    %c0_124 = arith.constant 0 : index
    %c0_125 = arith.constant 0 : index
    %326 = vector.load %arg19[%c0_123, %c0_124, %c0_125] : memref<3x1x32xf32, #tpu.memory_space<vmem>>, vector<1x1x32xf32>
    %327 = vector.shape_cast %326 : vector<1x1x32xf32> to vector<1x32xf32>
    %328 = vector.broadcast %327 : vector<1x32xf32> to vector<8x32xf32>
    %329 = arith.addf %325, %328 : vector<8x32xf32>
    %cst_126 = arith.constant 0.000000e+00 : f32
    %330 = vector.broadcast %cst_126 : f32 to vector<8x32xf32>
    %331 = arith.subf %330, %329 : vector<8x32xf32>
    %332 = math.exp %331 : vector<8x32xf32>
    %cst_127 = arith.constant 1.000000e+00 : f32
    %333 = vector.broadcast %cst_127 : f32 to vector<8x32xf32>
    %334 = arith.addf %333, %332 : vector<8x32xf32>
    %335 = tpu.reciprocal %334 {approx = true} : vector<8x32xf32> -> vector<8x32xf32>
    %336 = arith.mulf %335, %317 : vector<8x32xf32>
    %337 = arith.addf %168, %336 : vector<8x32xf32>
    %c0_128 = arith.constant 0 : index
    %c1 = arith.constant 1 : index
    %c0_129 = arith.constant 0 : index
    %c0_130 = arith.constant 0 : index
    %338 = vector.load %arg5[%c0_128, %c1, %c0_129, %c0_130] : memref<1x3x10x32xbf16, #tpu.memory_space<vmem>>, vector<1x1x10x32xbf16>
    %339 = vector.shape_cast %338 : vector<1x1x10x32xbf16> to vector<10x32xbf16>
    %c0_131 = arith.constant 0 : index
    %c32_132 = arith.constant 32 : index
    %340 = vector.load %arg12[%c0_131, %c32_132] : memref<32x96xbf16, #tpu.memory_space<vmem>>, vector<32x64xbf16>
    %cst_133 = arith.constant dense<0.000000e+00> : vector<10x64xf32>
    %341 = tpu.matmul %339, %340, %cst_133 {dimension_numbers = #tpu.dot_dimension_numbers<[1], [0], [0], [1], [0, 0, 1, 1], [], []>} : vector<10x32xbf16>, vector<32x64xbf16>, vector<10x64xf32> -> vector<10x64xf32>
    %c0_134 = arith.constant 0 : index
    %c32_135 = arith.constant 32 : index
    %342 = vector.load %arg13[%c0_134, %c32_135] : memref<1x96xf32, #tpu.memory_space<vmem>>, vector<1x64xf32>
    %343 = vector.broadcast %342 : vector<1x64xf32> to vector<10x64xf32>
    %344 = arith.addf %341, %343 : vector<10x64xf32>
    %345 = vector.extract_strided_slice %344 {offsets = [0, 0], sizes = [10, 32], strides = [1, 1]} : vector<10x64xf32> to vector<10x32xf32>
    %346 = vector.extract_strided_slice %344 {offsets = [0, 32], sizes = [10, 32], strides = [1, 1]} : vector<10x64xf32> to vector<10x32xf32>
    %347 = tpu.iota {dimensions = array<i32: 1>} : vector<8x10xi32>
    %348 = vector.broadcast %3 : i32 to vector<8x10xi32>
    %349 = arith.cmpi sge, %347, %348 : vector<8x10xi32>
    %cst_136 = arith.constant -1.000000e+30 : f32
    %cst_137 = arith.constant 0.000000e+00 : f32
    %350 = vector.broadcast %cst_136 : f32 to vector<8x10xf32>
    %351 = vector.broadcast %cst_137 : f32 to vector<8x10xf32>
    %352 = arith.select %349, %350, %351 : vector<8x10xi1>, vector<8x10xf32>
    %353 = vector.extract_strided_slice %167 {offsets = [0, 0], sizes = [8, 8], strides = [1, 1]} : vector<8x32xf32> to vector<8x8xf32>
    %354 = arith.truncf %353 : vector<8x8xf32> to vector<8x8xbf16>
    %355 = vector.extract_strided_slice %345 {offsets = [0, 0], sizes = [10, 8], strides = [1, 1]} : vector<10x32xf32> to vector<10x8xf32>
    %356 = arith.truncf %355 : vector<10x8xf32> to vector<10x8xbf16>
    %357 = vector.extract_strided_slice %346 {offsets = [0, 0], sizes = [10, 8], strides = [1, 1]} : vector<10x32xf32> to vector<10x8xf32>
    %358 = arith.truncf %357 : vector<10x8xf32> to vector<10x8xbf16>
    %cst_138 = arith.constant dense<0.000000e+00> : vector<8x10xf32>
    %359 = tpu.matmul %354, %356, %cst_138 {dimension_numbers = #tpu.dot_dimension_numbers<[1], [1], [0], [0], [0, 0, 1, 0], [], []>} : vector<8x8xbf16>, vector<10x8xbf16>, vector<8x10xf32> -> vector<8x10xf32>
    %cst_139 = arith.constant 0.353553385 : f32
    %360 = vector.broadcast %cst_139 : f32 to vector<8x10xf32>
    %361 = arith.mulf %359, %360 : vector<8x10xf32>
    %362 = arith.addf %361, %352 : vector<8x10xf32>
    %cst_140 = arith.constant dense<0xFF800000> : vector<8xf32>
    %363 = vector.multi_reduction <maximumf>, %362, %cst_140 [1] : vector<8x10xf32> to vector<8xf32>
    %364 = vector.shape_cast %363 : vector<8xf32> to vector<8x1xf32>
    %365 = vector.broadcast %364 : vector<8x1xf32> to vector<8x10xf32>
    %366 = arith.subf %362, %365 : vector<8x10xf32>
    %367 = math.exp %366 : vector<8x10xf32>
    %cst_141 = arith.constant dense<0.000000e+00> : vector<8xf32>
    %368 = vector.multi_reduction <add>, %367, %cst_141 [1] : vector<8x10xf32> to vector<8xf32>
    %369 = vector.shape_cast %368 : vector<8xf32> to vector<8x1xf32>
    %370 = arith.truncf %367 : vector<8x10xf32> to vector<8x10xbf16>
    %cst_142 = arith.constant dense<0.000000e+00> : vector<8x8xf32>
    %371 = tpu.matmul %370, %358, %cst_142 {dimension_numbers = #tpu.dot_dimension_numbers<[1], [0], [0], [1], [0, 0, 1, 1], [], []>} : vector<8x10xbf16>, vector<10x8xbf16>, vector<8x8xf32> -> vector<8x8xf32>
    %372 = tpu.reciprocal %369 {approx = true} : vector<8x1xf32> -> vector<8x1xf32>
    %373 = vector.broadcast %372 : vector<8x1xf32> to vector<8x8xf32>
    %374 = arith.mulf %371, %373 : vector<8x8xf32>
    %375 = arith.truncf %374 : vector<8x8xf32> to vector<8x8xbf16>
    %c0_143 = arith.constant 0 : index
    %c0_144 = arith.constant 0 : index
    %376 = vector.load %arg27[%c0_143, %c0_144] : memref<8x32xbf16, #tpu.memory_space<vmem>>, vector<8x8xbf16>
    tpu.vector_store %arg27[%c0_143, %c0_144], %375 {strides = array<i32>} : memref<8x32xbf16, #tpu.memory_space<vmem>>, vector<8x8xbf16>,
    %377 = vector.extract_strided_slice %167 {offsets = [0, 8], sizes = [8, 8], strides = [1, 1]} : vector<8x32xf32> to vector<8x8xf32>
    %378 = arith.truncf %377 : vector<8x8xf32> to vector<8x8xbf16>
    %379 = vector.extract_strided_slice %345 {offsets = [0, 8], sizes = [10, 8], strides = [1, 1]} : vector<10x32xf32> to vector<10x8xf32>
    %380 = arith.truncf %379 : vector<10x8xf32> to vector<10x8xbf16>
    %381 = vector.extract_strided_slice %346 {offsets = [0, 8], sizes = [10, 8], strides = [1, 1]} : vector<10x32xf32> to vector<10x8xf32>
    %382 = arith.truncf %381 : vector<10x8xf32> to vector<10x8xbf16>
    %cst_145 = arith.constant dense<0.000000e+00> : vector<8x10xf32>
    %383 = tpu.matmul %378, %380, %cst_145 {dimension_numbers = #tpu.dot_dimension_numbers<[1], [1], [0], [0], [0, 0, 1, 0], [], []>} : vector<8x8xbf16>, vector<10x8xbf16>, vector<8x10xf32> -> vector<8x10xf32>
    %cst_146 = arith.constant 0.353553385 : f32
    %384 = vector.broadcast %cst_146 : f32 to vector<8x10xf32>
    %385 = arith.mulf %383, %384 : vector<8x10xf32>
    %386 = arith.addf %385, %352 : vector<8x10xf32>
    %cst_147 = arith.constant dense<0xFF800000> : vector<8xf32>
    %387 = vector.multi_reduction <maximumf>, %386, %cst_147 [1] : vector<8x10xf32> to vector<8xf32>
    %388 = vector.shape_cast %387 : vector<8xf32> to vector<8x1xf32>
    %389 = vector.broadcast %388 : vector<8x1xf32> to vector<8x10xf32>
    %390 = arith.subf %386, %389 : vector<8x10xf32>
    %391 = math.exp %390 : vector<8x10xf32>
    %cst_148 = arith.constant dense<0.000000e+00> : vector<8xf32>
    %392 = vector.multi_reduction <add>, %391, %cst_148 [1] : vector<8x10xf32> to vector<8xf32>
    %393 = vector.shape_cast %392 : vector<8xf32> to vector<8x1xf32>
    %394 = arith.truncf %391 : vector<8x10xf32> to vector<8x10xbf16>
    %cst_149 = arith.constant dense<0.000000e+00> : vector<8x8xf32>
    %395 = tpu.matmul %394, %382, %cst_149 {dimension_numbers = #tpu.dot_dimension_numbers<[1], [0], [0], [1], [0, 0, 1, 1], [], []>} : vector<8x10xbf16>, vector<10x8xbf16>, vector<8x8xf32> -> vector<8x8xf32>
    %396 = tpu.reciprocal %393 {approx = true} : vector<8x1xf32> -> vector<8x1xf32>
    %397 = vector.broadcast %396 : vector<8x1xf32> to vector<8x8xf32>
    %398 = arith.mulf %395, %397 : vector<8x8xf32>
    %399 = arith.truncf %398 : vector<8x8xf32> to vector<8x8xbf16>
    %c0_150 = arith.constant 0 : index
    %c8_151 = arith.constant 8 : index
    %400 = vector.load %arg27[%c0_150, %c8_151] : memref<8x32xbf16, #tpu.memory_space<vmem>>, vector<8x8xbf16>
    tpu.vector_store %arg27[%c0_150, %c8_151], %399 {strides = array<i32>} : memref<8x32xbf16, #tpu.memory_space<vmem>>, vector<8x8xbf16>,
    %401 = vector.extract_strided_slice %167 {offsets = [0, 16], sizes = [8, 8], strides = [1, 1]} : vector<8x32xf32> to vector<8x8xf32>
    %402 = arith.truncf %401 : vector<8x8xf32> to vector<8x8xbf16>
    %403 = vector.extract_strided_slice %345 {offsets = [0, 16], sizes = [10, 8], strides = [1, 1]} : vector<10x32xf32> to vector<10x8xf32>
    %404 = arith.truncf %403 : vector<10x8xf32> to vector<10x8xbf16>
    %405 = vector.extract_strided_slice %346 {offsets = [0, 16], sizes = [10, 8], strides = [1, 1]} : vector<10x32xf32> to vector<10x8xf32>
    %406 = arith.truncf %405 : vector<10x8xf32> to vector<10x8xbf16>
    %cst_152 = arith.constant dense<0.000000e+00> : vector<8x10xf32>
    %407 = tpu.matmul %402, %404, %cst_152 {dimension_numbers = #tpu.dot_dimension_numbers<[1], [1], [0], [0], [0, 0, 1, 0], [], []>} : vector<8x8xbf16>, vector<10x8xbf16>, vector<8x10xf32> -> vector<8x10xf32>
    %cst_153 = arith.constant 0.353553385 : f32
    %408 = vector.broadcast %cst_153 : f32 to vector<8x10xf32>
    %409 = arith.mulf %407, %408 : vector<8x10xf32>
    %410 = arith.addf %409, %352 : vector<8x10xf32>
    %cst_154 = arith.constant dense<0xFF800000> : vector<8xf32>
    %411 = vector.multi_reduction <maximumf>, %410, %cst_154 [1] : vector<8x10xf32> to vector<8xf32>
    %412 = vector.shape_cast %411 : vector<8xf32> to vector<8x1xf32>
    %413 = vector.broadcast %412 : vector<8x1xf32> to vector<8x10xf32>
    %414 = arith.subf %410, %413 : vector<8x10xf32>
    %415 = math.exp %414 : vector<8x10xf32>
    %cst_155 = arith.constant dense<0.000000e+00> : vector<8xf32>
    %416 = vector.multi_reduction <add>, %415, %cst_155 [1] : vector<8x10xf32> to vector<8xf32>
    %417 = vector.shape_cast %416 : vector<8xf32> to vector<8x1xf32>
    %418 = arith.truncf %415 : vector<8x10xf32> to vector<8x10xbf16>
    %cst_156 = arith.constant dense<0.000000e+00> : vector<8x8xf32>
    %419 = tpu.matmul %418, %406, %cst_156 {dimension_numbers = #tpu.dot_dimension_numbers<[1], [0], [0], [1], [0, 0, 1, 1], [], []>} : vector<8x10xbf16>, vector<10x8xbf16>, vector<8x8xf32> -> vector<8x8xf32>
    %420 = tpu.reciprocal %417 {approx = true} : vector<8x1xf32> -> vector<8x1xf32>
    %421 = vector.broadcast %420 : vector<8x1xf32> to vector<8x8xf32>
    %422 = arith.mulf %419, %421 : vector<8x8xf32>
    %423 = arith.truncf %422 : vector<8x8xf32> to vector<8x8xbf16>
    %c0_157 = arith.constant 0 : index
    %c16_158 = arith.constant 16 : index
    %424 = vector.load %arg27[%c0_157, %c16_158] : memref<8x32xbf16, #tpu.memory_space<vmem>>, vector<8x8xbf16>
    tpu.vector_store %arg27[%c0_157, %c16_158], %423 {strides = array<i32>} : memref<8x32xbf16, #tpu.memory_space<vmem>>, vector<8x8xbf16>,
    %425 = vector.extract_strided_slice %167 {offsets = [0, 24], sizes = [8, 8], strides = [1, 1]} : vector<8x32xf32> to vector<8x8xf32>
    %426 = arith.truncf %425 : vector<8x8xf32> to vector<8x8xbf16>
    %427 = vector.extract_strided_slice %345 {offsets = [0, 24], sizes = [10, 8], strides = [1, 1]} : vector<10x32xf32> to vector<10x8xf32>
    %428 = arith.truncf %427 : vector<10x8xf32> to vector<10x8xbf16>
    %429 = vector.extract_strided_slice %346 {offsets = [0, 24], sizes = [10, 8], strides = [1, 1]} : vector<10x32xf32> to vector<10x8xf32>
    %430 = arith.truncf %429 : vector<10x8xf32> to vector<10x8xbf16>
    %cst_159 = arith.constant dense<0.000000e+00> : vector<8x10xf32>
    %431 = tpu.matmul %426, %428, %cst_159 {dimension_numbers = #tpu.dot_dimension_numbers<[1], [1], [0], [0], [0, 0, 1, 0], [], []>} : vector<8x8xbf16>, vector<10x8xbf16>, vector<8x10xf32> -> vector<8x10xf32>
    %cst_160 = arith.constant 0.353553385 : f32
    %432 = vector.broadcast %cst_160 : f32 to vector<8x10xf32>
    %433 = arith.mulf %431, %432 : vector<8x10xf32>
    %434 = arith.addf %433, %352 : vector<8x10xf32>
    %cst_161 = arith.constant dense<0xFF800000> : vector<8xf32>
    %435 = vector.multi_reduction <maximumf>, %434, %cst_161 [1] : vector<8x10xf32> to vector<8xf32>
    %436 = vector.shape_cast %435 : vector<8xf32> to vector<8x1xf32>
    %437 = vector.broadcast %436 : vector<8x1xf32> to vector<8x10xf32>
    %438 = arith.subf %434, %437 : vector<8x10xf32>
    %439 = math.exp %438 : vector<8x10xf32>
    %cst_162 = arith.constant dense<0.000000e+00> : vector<8xf32>
    %440 = vector.multi_reduction <add>, %439, %cst_162 [1] : vector<8x10xf32> to vector<8xf32>
    %441 = vector.shape_cast %440 : vector<8xf32> to vector<8x1xf32>
    %442 = arith.truncf %439 : vector<8x10xf32> to vector<8x10xbf16>
    %cst_163 = arith.constant dense<0.000000e+00> : vector<8x8xf32>
    %443 = tpu.matmul %442, %430, %cst_163 {dimension_numbers = #tpu.dot_dimension_numbers<[1], [0], [0], [1], [0, 0, 1, 1], [], []>} : vector<8x10xbf16>, vector<10x8xbf16>, vector<8x8xf32> -> vector<8x8xf32>
    %444 = tpu.reciprocal %441 {approx = true} : vector<8x1xf32> -> vector<8x1xf32>
    %445 = vector.broadcast %444 : vector<8x1xf32> to vector<8x8xf32>
    %446 = arith.mulf %443, %445 : vector<8x8xf32>
    %447 = arith.truncf %446 : vector<8x8xf32> to vector<8x8xbf16>
    %c0_164 = arith.constant 0 : index
    %c24_165 = arith.constant 24 : index
    %448 = vector.load %arg27[%c0_164, %c24_165] : memref<8x32xbf16, #tpu.memory_space<vmem>>, vector<8x8xbf16>
    tpu.vector_store %arg27[%c0_164, %c24_165], %447 {strides = array<i32>} : memref<8x32xbf16, #tpu.memory_space<vmem>>, vector<8x8xbf16>,
    %c0_166 = arith.constant 0 : index
    %c0_167 = arith.constant 0 : index
    %449 = vector.load %arg27[%c0_166, %c0_167] : memref<8x32xbf16, #tpu.memory_space<vmem>>, vector<8x32xbf16>
    %c0_168 = arith.constant 0 : index
    %c0_169 = arith.constant 0 : index
    %450 = vector.load %arg14[%c0_168, %c0_169] : memref<32x32xbf16, #tpu.memory_space<vmem>>, vector<32x32xbf16>
    %cst_170 = arith.constant dense<0.000000e+00> : vector<8x32xf32>
    %451 = tpu.matmul %449, %450, %cst_170 {dimension_numbers = #tpu.dot_dimension_numbers<[1], [0], [0], [1], [0, 0, 1, 1], [], []>} : vector<8x32xbf16>, vector<32x32xbf16>, vector<8x32xf32> -> vector<8x32xf32>
    %c0_171 = arith.constant 0 : index
    %c0_172 = arith.constant 0 : index
    %452 = vector.load %arg15[%c0_171, %c0_172] : memref<1x32xf32, #tpu.memory_space<vmem>>, vector<1x32xf32>
    %453 = vector.broadcast %452 : vector<1x32xf32> to vector<8x32xf32>
    %454 = arith.addf %451, %453 : vector<8x32xf32>
    %455 = arith.addf %161, %454 : vector<8x32xf32>
    %cst_173 = arith.constant dense<0.000000e+00> : vector<8xf32>
    %456 = vector.multi_reduction <add>, %455, %cst_173 [1] : vector<8x32xf32> to vector<8xf32>
    %457 = vector.shape_cast %456 : vector<8xf32> to vector<8x1xf32>
    %cst_174 = arith.constant 3.200000e+01 : f32
    %458 = vector.broadcast %cst_174 : f32 to vector<8x1xf32>
    %459 = arith.divf %457, %458 : vector<8x1xf32>
    %460 = vector.broadcast %459 : vector<8x1xf32> to vector<8x32xf32>
    %461 = arith.subf %455, %460 : vector<8x32xf32>
    %462 = arith.mulf %461, %461 : vector<8x32xf32>
    %cst_175 = arith.constant dense<0.000000e+00> : vector<8xf32>
    %463 = vector.multi_reduction <add>, %462, %cst_175 [1] : vector<8x32xf32> to vector<8xf32>
    %464 = vector.shape_cast %463 : vector<8xf32> to vector<8x1xf32>
    %cst_176 = arith.constant 3.200000e+01 : f32
    %465 = vector.broadcast %cst_176 : f32 to vector<8x1xf32>
    %466 = arith.divf %464, %465 : vector<8x1xf32>
    %467 = vector.broadcast %459 : vector<8x1xf32> to vector<8x32xf32>
    %468 = arith.subf %455, %467 : vector<8x32xf32>
    %cst_177 = arith.constant 9.99999974E-6 : f32
    %469 = vector.broadcast %cst_177 : f32 to vector<8x1xf32>
    %470 = arith.addf %466, %469 : vector<8x1xf32>
    %471 = math.rsqrt %470 : vector<8x1xf32>
    %472 = vector.broadcast %471 : vector<8x1xf32> to vector<8x32xf32>
    %473 = arith.mulf %468, %472 : vector<8x32xf32>
    %c0_178 = arith.constant 0 : index
    %c0_179 = arith.constant 0 : index
    %474 = vector.load %arg16[%c0_178, %c0_179] : memref<1x32xf32, #tpu.memory_space<vmem>>, vector<1x32xf32>
    %475 = vector.broadcast %474 : vector<1x32xf32> to vector<8x32xf32>
    %476 = arith.mulf %473, %475 : vector<8x32xf32>
    %c0_180 = arith.constant 0 : index
    %c0_181 = arith.constant 0 : index
    %477 = vector.load %arg17[%c0_180, %c0_181] : memref<1x32xf32, #tpu.memory_space<vmem>>, vector<1x32xf32>
    %478 = vector.broadcast %477 : vector<1x32xf32> to vector<8x32xf32>
    %479 = arith.addf %476, %478 : vector<8x32xf32>
    %480 = tpu.iota {dimensions = array<i32: 0>} : vector<8x1xi32>
    %481 = vector.broadcast %1 : i32 to vector<8x1xi32>
    %482 = arith.cmpi sge, %480, %481 : vector<8x1xi32>
    %cst_182 = arith.constant 0.000000e+00 : f32
    %483 = vector.shape_cast %482 : vector<8x1xi1> to vector<8x1xi1>
    %484 = vector.broadcast %483 : vector<8x1xi1> to vector<8x32xi1>
    %485 = vector.broadcast %cst_182 : f32 to vector<8x32xf32>
    %486 = arith.select %484, %485, %479 : vector<8x32xi1>, vector<8x32xf32>
    %c1_183 = arith.constant 1 : index
    %c0_184 = arith.constant 0 : index
    %c0_185 = arith.constant 0 : index
    %487 = vector.load %arg18[%c1_183, %c0_184, %c0_185] : memref<3x64x32xbf16, #tpu.memory_space<vmem>>, vector<1x32x32xbf16>
    %488 = vector.shape_cast %487 : vector<1x32x32xbf16> to vector<32x32xbf16>
    %cst_186 = arith.constant dense<0.000000e+00> : vector<8x32xf32>
    %489 = tpu.matmul %162, %488, %cst_186 {dimension_numbers = #tpu.dot_dimension_numbers<[1], [0], [0], [1], [0, 0, 1, 1], [], []>} : vector<8x32xbf16>, vector<32x32xbf16>, vector<8x32xf32> -> vector<8x32xf32>
    %490 = arith.truncf %486 : vector<8x32xf32> to vector<8x32xbf16>
    %c1_187 = arith.constant 1 : index
    %c32_188 = arith.constant 32 : index
    %c0_189 = arith.constant 0 : index
    %491 = vector.load %arg18[%c1_187, %c32_188, %c0_189] : memref<3x64x32xbf16, #tpu.memory_space<vmem>>, vector<1x32x32xbf16>
    %492 = vector.shape_cast %491 : vector<1x32x32xbf16> to vector<32x32xbf16>
    %cst_190 = arith.constant dense<0.000000e+00> : vector<8x32xf32>
    %493 = tpu.matmul %490, %492, %cst_190 {dimension_numbers = #tpu.dot_dimension_numbers<[1], [0], [0], [1], [0, 0, 1, 1], [], []>} : vector<8x32xbf16>, vector<32x32xbf16>, vector<8x32xf32> -> vector<8x32xf32>
    %494 = arith.addf %489, %493 : vector<8x32xf32>
    %c1_191 = arith.constant 1 : index
    %c0_192 = arith.constant 0 : index
    %c0_193 = arith.constant 0 : index
    %495 = vector.load %arg19[%c1_191, %c0_192, %c0_193] : memref<3x1x32xf32, #tpu.memory_space<vmem>>, vector<1x1x32xf32>
    %496 = vector.shape_cast %495 : vector<1x1x32xf32> to vector<1x32xf32>
    %497 = vector.broadcast %496 : vector<1x32xf32> to vector<8x32xf32>
    %498 = arith.addf %494, %497 : vector<8x32xf32>
    %cst_194 = arith.constant 0.000000e+00 : f32
    %499 = vector.broadcast %cst_194 : f32 to vector<8x32xf32>
    %500 = arith.subf %499, %498 : vector<8x32xf32>
    %501 = math.exp %500 : vector<8x32xf32>
    %cst_195 = arith.constant 1.000000e+00 : f32
    %502 = vector.broadcast %cst_195 : f32 to vector<8x32xf32>
    %503 = arith.addf %502, %501 : vector<8x32xf32>
    %504 = tpu.reciprocal %503 {approx = true} : vector<8x32xf32> -> vector<8x32xf32>
    %505 = arith.mulf %504, %486 : vector<8x32xf32>
    %506 = arith.addf %337, %505 : vector<8x32xf32>
    %c0_196 = arith.constant 0 : index
    %c2 = arith.constant 2 : index
    %c0_197 = arith.constant 0 : index
    %c0_198 = arith.constant 0 : index
    %507 = vector.load %arg5[%c0_196, %c2, %c0_197, %c0_198] : memref<1x3x10x32xbf16, #tpu.memory_space<vmem>>, vector<1x1x10x32xbf16>
    %508 = vector.shape_cast %507 : vector<1x1x10x32xbf16> to vector<10x32xbf16>
    %c0_199 = arith.constant 0 : index
    %c32_200 = arith.constant 32 : index
    %509 = vector.load %arg12[%c0_199, %c32_200] : memref<32x96xbf16, #tpu.memory_space<vmem>>, vector<32x64xbf16>
    %cst_201 = arith.constant dense<0.000000e+00> : vector<10x64xf32>
    %510 = tpu.matmul %508, %509, %cst_201 {dimension_numbers = #tpu.dot_dimension_numbers<[1], [0], [0], [1], [0, 0, 1, 1], [], []>} : vector<10x32xbf16>, vector<32x64xbf16>, vector<10x64xf32> -> vector<10x64xf32>
    %c0_202 = arith.constant 0 : index
    %c32_203 = arith.constant 32 : index
    %511 = vector.load %arg13[%c0_202, %c32_203] : memref<1x96xf32, #tpu.memory_space<vmem>>, vector<1x64xf32>
    %512 = vector.broadcast %511 : vector<1x64xf32> to vector<10x64xf32>
    %513 = arith.addf %510, %512 : vector<10x64xf32>
    %514 = vector.extract_strided_slice %513 {offsets = [0, 0], sizes = [10, 32], strides = [1, 1]} : vector<10x64xf32> to vector<10x32xf32>
    %515 = vector.extract_strided_slice %513 {offsets = [0, 32], sizes = [10, 32], strides = [1, 1]} : vector<10x64xf32> to vector<10x32xf32>
    %516 = tpu.iota {dimensions = array<i32: 1>} : vector<8x10xi32>
    %517 = vector.broadcast %3 : i32 to vector<8x10xi32>
    %518 = arith.cmpi sge, %516, %517 : vector<8x10xi32>
    %cst_204 = arith.constant -1.000000e+30 : f32
    %cst_205 = arith.constant 0.000000e+00 : f32
    %519 = vector.broadcast %cst_204 : f32 to vector<8x10xf32>
    %520 = vector.broadcast %cst_205 : f32 to vector<8x10xf32>
    %521 = arith.select %518, %519, %520 : vector<8x10xi1>, vector<8x10xf32>
    %522 = vector.extract_strided_slice %167 {offsets = [0, 0], sizes = [8, 8], strides = [1, 1]} : vector<8x32xf32> to vector<8x8xf32>
    %523 = arith.truncf %522 : vector<8x8xf32> to vector<8x8xbf16>
    %524 = vector.extract_strided_slice %514 {offsets = [0, 0], sizes = [10, 8], strides = [1, 1]} : vector<10x32xf32> to vector<10x8xf32>
    %525 = arith.truncf %524 : vector<10x8xf32> to vector<10x8xbf16>
    %526 = vector.extract_strided_slice %515 {offsets = [0, 0], sizes = [10, 8], strides = [1, 1]} : vector<10x32xf32> to vector<10x8xf32>
    %527 = arith.truncf %526 : vector<10x8xf32> to vector<10x8xbf16>
    %cst_206 = arith.constant dense<0.000000e+00> : vector<8x10xf32>
    %528 = tpu.matmul %523, %525, %cst_206 {dimension_numbers = #tpu.dot_dimension_numbers<[1], [1], [0], [0], [0, 0, 1, 0], [], []>} : vector<8x8xbf16>, vector<10x8xbf16>, vector<8x10xf32> -> vector<8x10xf32>
    %cst_207 = arith.constant 0.353553385 : f32
    %529 = vector.broadcast %cst_207 : f32 to vector<8x10xf32>
    %530 = arith.mulf %528, %529 : vector<8x10xf32>
    %531 = arith.addf %530, %521 : vector<8x10xf32>
    %cst_208 = arith.constant dense<0xFF800000> : vector<8xf32>
    %532 = vector.multi_reduction <maximumf>, %531, %cst_208 [1] : vector<8x10xf32> to vector<8xf32>
    %533 = vector.shape_cast %532 : vector<8xf32> to vector<8x1xf32>
    %534 = vector.broadcast %533 : vector<8x1xf32> to vector<8x10xf32>
    %535 = arith.subf %531, %534 : vector<8x10xf32>
    %536 = math.exp %535 : vector<8x10xf32>
    %cst_209 = arith.constant dense<0.000000e+00> : vector<8xf32>
    %537 = vector.multi_reduction <add>, %536, %cst_209 [1] : vector<8x10xf32> to vector<8xf32>
    %538 = vector.shape_cast %537 : vector<8xf32> to vector<8x1xf32>
    %539 = arith.truncf %536 : vector<8x10xf32> to vector<8x10xbf16>
    %cst_210 = arith.constant dense<0.000000e+00> : vector<8x8xf32>
    %540 = tpu.matmul %539, %527, %cst_210 {dimension_numbers = #tpu.dot_dimension_numbers<[1], [0], [0], [1], [0, 0, 1, 1], [], []>} : vector<8x10xbf16>, vector<10x8xbf16>, vector<8x8xf32> -> vector<8x8xf32>
    %541 = tpu.reciprocal %538 {approx = true} : vector<8x1xf32> -> vector<8x1xf32>
    %542 = vector.broadcast %541 : vector<8x1xf32> to vector<8x8xf32>
    %543 = arith.mulf %540, %542 : vector<8x8xf32>
    %544 = arith.truncf %543 : vector<8x8xf32> to vector<8x8xbf16>
    %c0_211 = arith.constant 0 : index
    %c0_212 = arith.constant 0 : index
    %545 = vector.load %arg27[%c0_211, %c0_212] : memref<8x32xbf16, #tpu.memory_space<vmem>>, vector<8x8xbf16>
    tpu.vector_store %arg27[%c0_211, %c0_212], %544 {strides = array<i32>} : memref<8x32xbf16, #tpu.memory_space<vmem>>, vector<8x8xbf16>,
    %546 = vector.extract_strided_slice %167 {offsets = [0, 8], sizes = [8, 8], strides = [1, 1]} : vector<8x32xf32> to vector<8x8xf32>
    %547 = arith.truncf %546 : vector<8x8xf32> to vector<8x8xbf16>
    %548 = vector.extract_strided_slice %514 {offsets = [0, 8], sizes = [10, 8], strides = [1, 1]} : vector<10x32xf32> to vector<10x8xf32>
    %549 = arith.truncf %548 : vector<10x8xf32> to vector<10x8xbf16>
    %550 = vector.extract_strided_slice %515 {offsets = [0, 8], sizes = [10, 8], strides = [1, 1]} : vector<10x32xf32> to vector<10x8xf32>
    %551 = arith.truncf %550 : vector<10x8xf32> to vector<10x8xbf16>
    %cst_213 = arith.constant dense<0.000000e+00> : vector<8x10xf32>
    %552 = tpu.matmul %547, %549, %cst_213 {dimension_numbers = #tpu.dot_dimension_numbers<[1], [1], [0], [0], [0, 0, 1, 0], [], []>} : vector<8x8xbf16>, vector<10x8xbf16>, vector<8x10xf32> -> vector<8x10xf32>
    %cst_214 = arith.constant 0.353553385 : f32
    %553 = vector.broadcast %cst_214 : f32 to vector<8x10xf32>
    %554 = arith.mulf %552, %553 : vector<8x10xf32>
    %555 = arith.addf %554, %521 : vector<8x10xf32>
    %cst_215 = arith.constant dense<0xFF800000> : vector<8xf32>
    %556 = vector.multi_reduction <maximumf>, %555, %cst_215 [1] : vector<8x10xf32> to vector<8xf32>
    %557 = vector.shape_cast %556 : vector<8xf32> to vector<8x1xf32>
    %558 = vector.broadcast %557 : vector<8x1xf32> to vector<8x10xf32>
    %559 = arith.subf %555, %558 : vector<8x10xf32>
    %560 = math.exp %559 : vector<8x10xf32>
    %cst_216 = arith.constant dense<0.000000e+00> : vector<8xf32>
    %561 = vector.multi_reduction <add>, %560, %cst_216 [1] : vector<8x10xf32> to vector<8xf32>
    %562 = vector.shape_cast %561 : vector<8xf32> to vector<8x1xf32>
    %563 = arith.truncf %560 : vector<8x10xf32> to vector<8x10xbf16>
    %cst_217 = arith.constant dense<0.000000e+00> : vector<8x8xf32>
    %564 = tpu.matmul %563, %551, %cst_217 {dimension_numbers = #tpu.dot_dimension_numbers<[1], [0], [0], [1], [0, 0, 1, 1], [], []>} : vector<8x10xbf16>, vector<10x8xbf16>, vector<8x8xf32> -> vector<8x8xf32>
    %565 = tpu.reciprocal %562 {approx = true} : vector<8x1xf32> -> vector<8x1xf32>
    %566 = vector.broadcast %565 : vector<8x1xf32> to vector<8x8xf32>
    %567 = arith.mulf %564, %566 : vector<8x8xf32>
    %568 = arith.truncf %567 : vector<8x8xf32> to vector<8x8xbf16>
    %c0_218 = arith.constant 0 : index
    %c8_219 = arith.constant 8 : index
    %569 = vector.load %arg27[%c0_218, %c8_219] : memref<8x32xbf16, #tpu.memory_space<vmem>>, vector<8x8xbf16>
    tpu.vector_store %arg27[%c0_218, %c8_219], %568 {strides = array<i32>} : memref<8x32xbf16, #tpu.memory_space<vmem>>, vector<8x8xbf16>,
    %570 = vector.extract_strided_slice %167 {offsets = [0, 16], sizes = [8, 8], strides = [1, 1]} : vector<8x32xf32> to vector<8x8xf32>
    %571 = arith.truncf %570 : vector<8x8xf32> to vector<8x8xbf16>
    %572 = vector.extract_strided_slice %514 {offsets = [0, 16], sizes = [10, 8], strides = [1, 1]} : vector<10x32xf32> to vector<10x8xf32>
    %573 = arith.truncf %572 : vector<10x8xf32> to vector<10x8xbf16>
    %574 = vector.extract_strided_slice %515 {offsets = [0, 16], sizes = [10, 8], strides = [1, 1]} : vector<10x32xf32> to vector<10x8xf32>
    %575 = arith.truncf %574 : vector<10x8xf32> to vector<10x8xbf16>
    %cst_220 = arith.constant dense<0.000000e+00> : vector<8x10xf32>
    %576 = tpu.matmul %571, %573, %cst_220 {dimension_numbers = #tpu.dot_dimension_numbers<[1], [1], [0], [0], [0, 0, 1, 0], [], []>} : vector<8x8xbf16>, vector<10x8xbf16>, vector<8x10xf32> -> vector<8x10xf32>
    %cst_221 = arith.constant 0.353553385 : f32
    %577 = vector.broadcast %cst_221 : f32 to vector<8x10xf32>
    %578 = arith.mulf %576, %577 : vector<8x10xf32>
    %579 = arith.addf %578, %521 : vector<8x10xf32>
    %cst_222 = arith.constant dense<0xFF800000> : vector<8xf32>
    %580 = vector.multi_reduction <maximumf>, %579, %cst_222 [1] : vector<8x10xf32> to vector<8xf32>
    %581 = vector.shape_cast %580 : vector<8xf32> to vector<8x1xf32>
    %582 = vector.broadcast %581 : vector<8x1xf32> to vector<8x10xf32>
    %583 = arith.subf %579, %582 : vector<8x10xf32>
    %584 = math.exp %583 : vector<8x10xf32>
    %cst_223 = arith.constant dense<0.000000e+00> : vector<8xf32>
    %585 = vector.multi_reduction <add>, %584, %cst_223 [1] : vector<8x10xf32> to vector<8xf32>
    %586 = vector.shape_cast %585 : vector<8xf32> to vector<8x1xf32>
    %587 = arith.truncf %584 : vector<8x10xf32> to vector<8x10xbf16>
    %cst_224 = arith.constant dense<0.000000e+00> : vector<8x8xf32>
    %588 = tpu.matmul %587, %575, %cst_224 {dimension_numbers = #tpu.dot_dimension_numbers<[1], [0], [0], [1], [0, 0, 1, 1], [], []>} : vector<8x10xbf16>, vector<10x8xbf16>, vector<8x8xf32> -> vector<8x8xf32>
    %589 = tpu.reciprocal %586 {approx = true} : vector<8x1xf32> -> vector<8x1xf32>
    %590 = vector.broadcast %589 : vector<8x1xf32> to vector<8x8xf32>
    %591 = arith.mulf %588, %590 : vector<8x8xf32>
    %592 = arith.truncf %591 : vector<8x8xf32> to vector<8x8xbf16>
    %c0_225 = arith.constant 0 : index
    %c16_226 = arith.constant 16 : index
    %593 = vector.load %arg27[%c0_225, %c16_226] : memref<8x32xbf16, #tpu.memory_space<vmem>>, vector<8x8xbf16>
    tpu.vector_store %arg27[%c0_225, %c16_226], %592 {strides = array<i32>} : memref<8x32xbf16, #tpu.memory_space<vmem>>, vector<8x8xbf16>,
    %594 = vector.extract_strided_slice %167 {offsets = [0, 24], sizes = [8, 8], strides = [1, 1]} : vector<8x32xf32> to vector<8x8xf32>
    %595 = arith.truncf %594 : vector<8x8xf32> to vector<8x8xbf16>
    %596 = vector.extract_strided_slice %514 {offsets = [0, 24], sizes = [10, 8], strides = [1, 1]} : vector<10x32xf32> to vector<10x8xf32>
    %597 = arith.truncf %596 : vector<10x8xf32> to vector<10x8xbf16>
    %598 = vector.extract_strided_slice %515 {offsets = [0, 24], sizes = [10, 8], strides = [1, 1]} : vector<10x32xf32> to vector<10x8xf32>
    %599 = arith.truncf %598 : vector<10x8xf32> to vector<10x8xbf16>
    %cst_227 = arith.constant dense<0.000000e+00> : vector<8x10xf32>
    %600 = tpu.matmul %595, %597, %cst_227 {dimension_numbers = #tpu.dot_dimension_numbers<[1], [1], [0], [0], [0, 0, 1, 0], [], []>} : vector<8x8xbf16>, vector<10x8xbf16>, vector<8x10xf32> -> vector<8x10xf32>
    %cst_228 = arith.constant 0.353553385 : f32
    %601 = vector.broadcast %cst_228 : f32 to vector<8x10xf32>
    %602 = arith.mulf %600, %601 : vector<8x10xf32>
    %603 = arith.addf %602, %521 : vector<8x10xf32>
    %cst_229 = arith.constant dense<0xFF800000> : vector<8xf32>
    %604 = vector.multi_reduction <maximumf>, %603, %cst_229 [1] : vector<8x10xf32> to vector<8xf32>
    %605 = vector.shape_cast %604 : vector<8xf32> to vector<8x1xf32>
    %606 = vector.broadcast %605 : vector<8x1xf32> to vector<8x10xf32>
    %607 = arith.subf %603, %606 : vector<8x10xf32>
    %608 = math.exp %607 : vector<8x10xf32>
    %cst_230 = arith.constant dense<0.000000e+00> : vector<8xf32>
    %609 = vector.multi_reduction <add>, %608, %cst_230 [1] : vector<8x10xf32> to vector<8xf32>
    %610 = vector.shape_cast %609 : vector<8xf32> to vector<8x1xf32>
    %611 = arith.truncf %608 : vector<8x10xf32> to vector<8x10xbf16>
    %cst_231 = arith.constant dense<0.000000e+00> : vector<8x8xf32>
    %612 = tpu.matmul %611, %599, %cst_231 {dimension_numbers = #tpu.dot_dimension_numbers<[1], [0], [0], [1], [0, 0, 1, 1], [], []>} : vector<8x10xbf16>, vector<10x8xbf16>, vector<8x8xf32> -> vector<8x8xf32>
    %613 = tpu.reciprocal %610 {approx = true} : vector<8x1xf32> -> vector<8x1xf32>
    %614 = vector.broadcast %613 : vector<8x1xf32> to vector<8x8xf32>
    %615 = arith.mulf %612, %614 : vector<8x8xf32>
    %616 = arith.truncf %615 : vector<8x8xf32> to vector<8x8xbf16>
    %c0_232 = arith.constant 0 : index
    %c24_233 = arith.constant 24 : index
    %617 = vector.load %arg27[%c0_232, %c24_233] : memref<8x32xbf16, #tpu.memory_space<vmem>>, vector<8x8xbf16>
    tpu.vector_store %arg27[%c0_232, %c24_233], %616 {strides = array<i32>} : memref<8x32xbf16, #tpu.memory_space<vmem>>, vector<8x8xbf16>,
    %c0_234 = arith.constant 0 : index
    %c0_235 = arith.constant 0 : index
    %618 = vector.load %arg27[%c0_234, %c0_235] : memref<8x32xbf16, #tpu.memory_space<vmem>>, vector<8x32xbf16>
    %c0_236 = arith.constant 0 : index
    %c0_237 = arith.constant 0 : index
    %619 = vector.load %arg14[%c0_236, %c0_237] : memref<32x32xbf16, #tpu.memory_space<vmem>>, vector<32x32xbf16>
    %cst_238 = arith.constant dense<0.000000e+00> : vector<8x32xf32>
    %620 = tpu.matmul %618, %619, %cst_238 {dimension_numbers = #tpu.dot_dimension_numbers<[1], [0], [0], [1], [0, 0, 1, 1], [], []>} : vector<8x32xbf16>, vector<32x32xbf16>, vector<8x32xf32> -> vector<8x32xf32>
    %c0_239 = arith.constant 0 : index
    %c0_240 = arith.constant 0 : index
    %621 = vector.load %arg15[%c0_239, %c0_240] : memref<1x32xf32, #tpu.memory_space<vmem>>, vector<1x32xf32>
    %622 = vector.broadcast %621 : vector<1x32xf32> to vector<8x32xf32>
    %623 = arith.addf %620, %622 : vector<8x32xf32>
    %624 = arith.addf %161, %623 : vector<8x32xf32>
    %cst_241 = arith.constant dense<0.000000e+00> : vector<8xf32>
    %625 = vector.multi_reduction <add>, %624, %cst_241 [1] : vector<8x32xf32> to vector<8xf32>
    %626 = vector.shape_cast %625 : vector<8xf32> to vector<8x1xf32>
    %cst_242 = arith.constant 3.200000e+01 : f32
    %627 = vector.broadcast %cst_242 : f32 to vector<8x1xf32>
    %628 = arith.divf %626, %627 : vector<8x1xf32>
    %629 = vector.broadcast %628 : vector<8x1xf32> to vector<8x32xf32>
    %630 = arith.subf %624, %629 : vector<8x32xf32>
    %631 = arith.mulf %630, %630 : vector<8x32xf32>
    %cst_243 = arith.constant dense<0.000000e+00> : vector<8xf32>
    %632 = vector.multi_reduction <add>, %631, %cst_243 [1] : vector<8x32xf32> to vector<8xf32>
    %633 = vector.shape_cast %632 : vector<8xf32> to vector<8x1xf32>
    %cst_244 = arith.constant 3.200000e+01 : f32
    %634 = vector.broadcast %cst_244 : f32 to vector<8x1xf32>
    %635 = arith.divf %633, %634 : vector<8x1xf32>
    %636 = vector.broadcast %628 : vector<8x1xf32> to vector<8x32xf32>
    %637 = arith.subf %624, %636 : vector<8x32xf32>
    %cst_245 = arith.constant 9.99999974E-6 : f32
    %638 = vector.broadcast %cst_245 : f32 to vector<8x1xf32>
    %639 = arith.addf %635, %638 : vector<8x1xf32>
    %640 = math.rsqrt %639 : vector<8x1xf32>
    %641 = vector.broadcast %640 : vector<8x1xf32> to vector<8x32xf32>
    %642 = arith.mulf %637, %641 : vector<8x32xf32>
    %c0_246 = arith.constant 0 : index
    %c0_247 = arith.constant 0 : index
    %643 = vector.load %arg16[%c0_246, %c0_247] : memref<1x32xf32, #tpu.memory_space<vmem>>, vector<1x32xf32>
    %644 = vector.broadcast %643 : vector<1x32xf32> to vector<8x32xf32>
    %645 = arith.mulf %642, %644 : vector<8x32xf32>
    %c0_248 = arith.constant 0 : index
    %c0_249 = arith.constant 0 : index
    %646 = vector.load %arg17[%c0_248, %c0_249] : memref<1x32xf32, #tpu.memory_space<vmem>>, vector<1x32xf32>
    %647 = vector.broadcast %646 : vector<1x32xf32> to vector<8x32xf32>
    %648 = arith.addf %645, %647 : vector<8x32xf32>
    %649 = tpu.iota {dimensions = array<i32: 0>} : vector<8x1xi32>
    %650 = vector.broadcast %1 : i32 to vector<8x1xi32>
    %651 = arith.cmpi sge, %649, %650 : vector<8x1xi32>
    %cst_250 = arith.constant 0.000000e+00 : f32
    %652 = vector.shape_cast %651 : vector<8x1xi1> to vector<8x1xi1>
    %653 = vector.broadcast %652 : vector<8x1xi1> to vector<8x32xi1>
    %654 = vector.broadcast %cst_250 : f32 to vector<8x32xf32>
    %655 = arith.select %653, %654, %648 : vector<8x32xi1>, vector<8x32xf32>
    %c2_251 = arith.constant 2 : index
    %c0_252 = arith.constant 0 : index
    %c0_253 = arith.constant 0 : index
    %656 = vector.load %arg18[%c2_251, %c0_252, %c0_253] : memref<3x64x32xbf16, #tpu.memory_space<vmem>>, vector<1x32x32xbf16>
    %657 = vector.shape_cast %656 : vector<1x32x32xbf16> to vector<32x32xbf16>
    %cst_254 = arith.constant dense<0.000000e+00> : vector<8x32xf32>
    %658 = tpu.matmul %162, %657, %cst_254 {dimension_numbers = #tpu.dot_dimension_numbers<[1], [0], [0], [1], [0, 0, 1, 1], [], []>} : vector<8x32xbf16>, vector<32x32xbf16>, vector<8x32xf32> -> vector<8x32xf32>
    %659 = arith.truncf %655 : vector<8x32xf32> to vector<8x32xbf16>
    %c2_255 = arith.constant 2 : index
    %c32_256 = arith.constant 32 : index
    %c0_257 = arith.constant 0 : index
    %660 = vector.load %arg18[%c2_255, %c32_256, %c0_257] : memref<3x64x32xbf16, #tpu.memory_space<vmem>>, vector<1x32x32xbf16>
    %661 = vector.shape_cast %660 : vector<1x32x32xbf16> to vector<32x32xbf16>
    %cst_258 = arith.constant dense<0.000000e+00> : vector<8x32xf32>
    %662 = tpu.matmul %659, %661, %cst_258 {dimension_numbers = #tpu.dot_dimension_numbers<[1], [0], [0], [1], [0, 0, 1, 1], [], []>} : vector<8x32xbf16>, vector<32x32xbf16>, vector<8x32xf32> -> vector<8x32xf32>
    %663 = arith.addf %658, %662 : vector<8x32xf32>
    %c2_259 = arith.constant 2 : index
    %c0_260 = arith.constant 0 : index
    %c0_261 = arith.constant 0 : index
    %664 = vector.load %arg19[%c2_259, %c0_260, %c0_261] : memref<3x1x32xf32, #tpu.memory_space<vmem>>, vector<1x1x32xf32>
    %665 = vector.shape_cast %664 : vector<1x1x32xf32> to vector<1x32xf32>
    %666 = vector.broadcast %665 : vector<1x32xf32> to vector<8x32xf32>
    %667 = arith.addf %663, %666 : vector<8x32xf32>
    %cst_262 = arith.constant 0.000000e+00 : f32
    %668 = vector.broadcast %cst_262 : f32 to vector<8x32xf32>
    %669 = arith.subf %668, %667 : vector<8x32xf32>
    %670 = math.exp %669 : vector<8x32xf32>
    %cst_263 = arith.constant 1.000000e+00 : f32
    %671 = vector.broadcast %cst_263 : f32 to vector<8x32xf32>
    %672 = arith.addf %671, %670 : vector<8x32xf32>
    %673 = tpu.reciprocal %672 {approx = true} : vector<8x32xf32> -> vector<8x32xf32>
    %674 = arith.mulf %673, %655 : vector<8x32xf32>
    %675 = arith.addf %506, %674 : vector<8x32xf32>
    %cst_264 = arith.constant 0.577350259 : f32
    %676 = vector.broadcast %cst_264 : f32 to vector<8x32xf32>
    %677 = arith.mulf %675, %676 : vector<8x32xf32>
    %678 = arith.truncf %677 : vector<8x32xf32> to vector<8x32xbf16>
    %c0_265 = arith.constant 0 : index
    %c0_266 = arith.constant 0 : index
    %679 = vector.load %arg20[%c0_265, %c0_266] : memref<32x64xbf16, #tpu.memory_space<vmem>>, vector<32x64xbf16>
    %cst_267 = arith.constant dense<0.000000e+00> : vector<8x64xf32>
    %680 = tpu.matmul %678, %679, %cst_267 {dimension_numbers = #tpu.dot_dimension_numbers<[1], [0], [0], [1], [0, 0, 1, 1], [], []>} : vector<8x32xbf16>, vector<32x64xbf16>, vector<8x64xf32> -> vector<8x64xf32>
    %c0_268 = arith.constant 0 : index
    %c0_269 = arith.constant 0 : index
    %681 = vector.load %arg21[%c0_268, %c0_269] : memref<1x64xf32, #tpu.memory_space<vmem>>, vector<1x64xf32>
    %682 = vector.broadcast %681 : vector<1x64xf32> to vector<8x64xf32>
    %683 = arith.addf %680, %682 : vector<8x64xf32>
    %cst_270 = arith.constant 0.000000e+00 : f32
    %684 = vector.broadcast %cst_270 : f32 to vector<8x64xf32>
    %685 = arith.maximumf %683, %684 : vector<8x64xf32>
    %686 = arith.truncf %685 : vector<8x64xf32> to vector<8x64xbf16>
    %c0_271 = arith.constant 0 : index
    %c0_272 = arith.constant 0 : index
    %687 = vector.load %arg22[%c0_271, %c0_272] : memref<64x32xbf16, #tpu.memory_space<vmem>>, vector<64x32xbf16>
    %cst_273 = arith.constant dense<0.000000e+00> : vector<8x32xf32>
    %688 = tpu.matmul %686, %687, %cst_273 {dimension_numbers = #tpu.dot_dimension_numbers<[1], [0], [0], [1], [0, 0, 1, 1], [], []>} : vector<8x64xbf16>, vector<64x32xbf16>, vector<8x32xf32> -> vector<8x32xf32>
    %c0_274 = arith.constant 0 : index
    %c0_275 = arith.constant 0 : index
    %689 = vector.load %arg23[%c0_274, %c0_275] : memref<1x32xf32, #tpu.memory_space<vmem>>, vector<1x32xf32>
    %690 = vector.broadcast %689 : vector<1x32xf32> to vector<8x32xf32>
    %691 = arith.addf %688, %690 : vector<8x32xf32>
    %692 = arith.addf %677, %691 : vector<8x32xf32>
    %cst_276 = arith.constant dense<0.000000e+00> : vector<8xf32>
    %693 = vector.multi_reduction <add>, %692, %cst_276 [1] : vector<8x32xf32> to vector<8xf32>
    %694 = vector.shape_cast %693 : vector<8xf32> to vector<8x1xf32>
    %cst_277 = arith.constant 3.200000e+01 : f32
    %695 = vector.broadcast %cst_277 : f32 to vector<8x1xf32>
    %696 = arith.divf %694, %695 : vector<8x1xf32>
    %697 = vector.broadcast %696 : vector<8x1xf32> to vector<8x32xf32>
    %698 = arith.subf %692, %697 : vector<8x32xf32>
    %699 = arith.mulf %698, %698 : vector<8x32xf32>
    %cst_278 = arith.constant dense<0.000000e+00> : vector<8xf32>
    %700 = vector.multi_reduction <add>, %699, %cst_278 [1] : vector<8x32xf32> to vector<8xf32>
    %701 = vector.shape_cast %700 : vector<8xf32> to vector<8x1xf32>
    %cst_279 = arith.constant 3.200000e+01 : f32
    %702 = vector.broadcast %cst_279 : f32 to vector<8x1xf32>
    %703 = arith.divf %701, %702 : vector<8x1xf32>
    %704 = vector.broadcast %696 : vector<8x1xf32> to vector<8x32xf32>
    %705 = arith.subf %692, %704 : vector<8x32xf32>
    %cst_280 = arith.constant 9.99999974E-6 : f32
    %706 = vector.broadcast %cst_280 : f32 to vector<8x1xf32>
    %707 = arith.addf %703, %706 : vector<8x1xf32>
    %708 = math.rsqrt %707 : vector<8x1xf32>
    %709 = vector.broadcast %708 : vector<8x1xf32> to vector<8x32xf32>
    %710 = arith.mulf %705, %709 : vector<8x32xf32>
    %c0_281 = arith.constant 0 : index
    %c0_282 = arith.constant 0 : index
    %711 = vector.load %arg24[%c0_281, %c0_282] : memref<1x32xf32, #tpu.memory_space<vmem>>, vector<1x32xf32>
    %712 = vector.broadcast %711 : vector<1x32xf32> to vector<8x32xf32>
    %713 = arith.mulf %710, %712 : vector<8x32xf32>
    %c0_283 = arith.constant 0 : index
    %c0_284 = arith.constant 0 : index
    %714 = vector.load %arg25[%c0_283, %c0_284] : memref<1x32xf32, #tpu.memory_space<vmem>>, vector<1x32xf32>
    %715 = vector.broadcast %714 : vector<1x32xf32> to vector<8x32xf32>
    %716 = arith.addf %713, %715 : vector<8x32xf32>
    %717 = tpu.iota {dimensions = array<i32: 0>} : vector<8x1xi32>
    %718 = vector.broadcast %1 : i32 to vector<8x1xi32>
    %719 = arith.cmpi sge, %717, %718 : vector<8x1xi32>
    %cst_285 = arith.constant 0.000000e+00 : f32
    %720 = vector.shape_cast %719 : vector<8x1xi1> to vector<8x1xi1>
    %721 = vector.broadcast %720 : vector<8x1xi1> to vector<8x32xi1>
    %722 = vector.broadcast %cst_285 : f32 to vector<8x32xf32>
    %723 = arith.select %721, %722, %716 : vector<8x32xi1>, vector<8x32xf32>
    %724 = arith.truncf %723 : vector<8x32xf32> to vector<8x32xbf16>
    %c0_286 = arith.constant 0 : index
    %c0_287 = arith.constant 0 : index
    %c0_288 = arith.constant 0 : index
    %725 = vector.load %arg26[%c0_286, %c0_287, %c0_288] : memref<1x8x32xbf16, #tpu.memory_space<vmem>>, vector<1x8x32xbf16>
    %726 = vector.shape_cast %725 : vector<1x8x32xbf16> to vector<8x32xbf16>
    %727 = vector.shape_cast %724 : vector<8x32xbf16> to vector<1x8x32xbf16>
    tpu.vector_store %arg26[%c0_286, %c0_287, %c0_288], %727 {strides = array<i32>} : memref<1x8x32xbf16, #tpu.memory_space<vmem>>, vector<1x8x32xbf16>,
    return
  }
  func.func @transform_0(%arg0: i32, %arg1: memref<2xi32, #tpu.memory_space<smem>>, %arg2: memref<2xi32, #tpu.memory_space<smem>>) -> (i32, i32, i32) {
    %c0_i32 = arith.constant 0 : i32
    %c0_i32_0 = arith.constant 0 : i32
    %c0_i32_1 = arith.constant 0 : i32
    return %arg0, %c0_i32, %c0_i32_0 : i32, i32, i32
  }
  func.func @transform_1(%arg0: i32, %arg1: memref<2xi32, #tpu.memory_space<smem>>, %arg2: memref<2xi32, #tpu.memory_space<smem>>) -> (i32, i32, i32) {
    %c0_i32 = arith.constant 0 : i32
    %c0_i32_0 = arith.constant 0 : i32
    %c0_i32_1 = arith.constant 0 : i32
    return %arg0, %c0_i32, %c0_i32_0 : i32, i32, i32
  }
  func.func @transform_2(%arg0: i32, %arg1: memref<2xi32, #tpu.memory_space<smem>>, %arg2: memref<2xi32, #tpu.memory_space<smem>>) -> (i32, i32, i32, i32) {
    %c0_i32 = arith.constant 0 : i32
    %c0_i32_0 = arith.constant 0 : i32
    %c0_i32_1 = arith.constant 0 : i32
    %c0_i32_2 = arith.constant 0 : i32
    return %arg0, %c0_i32, %c0_i32_0, %c0_i32_1 : i32, i32, i32, i32
  }
  func.func @transform_3(%arg0: i32, %arg1: memref<2xi32, #tpu.memory_space<smem>>, %arg2: memref<2xi32, #tpu.memory_space<smem>>) -> (i32, i32) {
    %c0_i32 = arith.constant 0 : i32
    %c0_i32_0 = arith.constant 0 : i32
    %c0_i32_1 = arith.constant 0 : i32
    return %c0_i32, %c0_i32_0 : i32, i32
  }
  func.func @transform_4(%arg0: i32, %arg1: memref<2xi32, #tpu.memory_space<smem>>, %arg2: memref<2xi32, #tpu.memory_space<smem>>) -> (i32, i32) {
    %c0_i32 = arith.constant 0 : i32
    %c0_i32_0 = arith.constant 0 : i32
    %c0_i32_1 = arith.constant 0 : i32
    return %c0_i32, %c0_i32_0 : i32, i32
  }
  func.func @transform_5(%arg0: i32, %arg1: memref<2xi32, #tpu.memory_space<smem>>, %arg2: memref<2xi32, #tpu.memory_space<smem>>) -> (i32, i32) {
    %c0_i32 = arith.constant 0 : i32
    %c0_i32_0 = arith.constant 0 : i32
    %c0_i32_1 = arith.constant 0 : i32
    return %c0_i32, %c0_i32_0 : i32, i32
  }
  func.func @transform_6(%arg0: i32, %arg1: memref<2xi32, #tpu.memory_space<smem>>, %arg2: memref<2xi32, #tpu.memory_space<smem>>) -> (i32, i32) {
    %c0_i32 = arith.constant 0 : i32
    %c0_i32_0 = arith.constant 0 : i32
    %c0_i32_1 = arith.constant 0 : i32
    return %c0_i32, %c0_i32_0 : i32, i32
  }
  func.func @transform_7(%arg0: i32, %arg1: memref<2xi32, #tpu.memory_space<smem>>, %arg2: memref<2xi32, #tpu.memory_space<smem>>) -> (i32, i32) {
    %c0_i32 = arith.constant 0 : i32
    %c0_i32_0 = arith.constant 0 : i32
    %c0_i32_1 = arith.constant 0 : i32
    return %c0_i32, %c0_i32_0 : i32, i32
  }
  func.func @transform_8(%arg0: i32, %arg1: memref<2xi32, #tpu.memory_space<smem>>, %arg2: memref<2xi32, #tpu.memory_space<smem>>) -> (i32, i32) {
    %c0_i32 = arith.constant 0 : i32
    %c0_i32_0 = arith.constant 0 : i32
    %c0_i32_1 = arith.constant 0 : i32
    return %c0_i32, %c0_i32_0 : i32, i32
  }
  func.func @transform_9(%arg0: i32, %arg1: memref<2xi32, #tpu.memory_space<smem>>, %arg2: memref<2xi32, #tpu.memory_space<smem>>) -> (i32, i32) {
    %c0_i32 = arith.constant 0 : i32
    %c0_i32_0 = arith.constant 0 : i32
    %c0_i32_1 = arith.constant 0 : i32
    return %c0_i32, %c0_i32_0 : i32, i32
  }
  func.func @transform_10(%arg0: i32, %arg1: memref<2xi32, #tpu.memory_space<smem>>, %arg2: memref<2xi32, #tpu.memory_space<smem>>) -> (i32, i32) {
    %c0_i32 = arith.constant 0 : i32
    %c0_i32_0 = arith.constant 0 : i32
    %c0_i32_1 = arith.constant 0 : i32
    return %c0_i32, %c0_i32_0 : i32, i32
  }
  func.func @transform_11(%arg0: i32, %arg1: memref<2xi32, #tpu.memory_space<smem>>, %arg2: memref<2xi32, #tpu.memory_space<smem>>) -> (i32, i32) {
    %c0_i32 = arith.constant 0 : i32
    %c0_i32_0 = arith.constant 0 : i32
    %c0_i32_1 = arith.constant 0 : i32
    return %c0_i32, %c0_i32_0 : i32, i32
  }
  func.func @transform_12(%arg0: i32, %arg1: memref<2xi32, #tpu.memory_space<smem>>, %arg2: memref<2xi32, #tpu.memory_space<smem>>) -> (i32, i32) {
    %c0_i32 = arith.constant 0 : i32
    %c0_i32_0 = arith.constant 0 : i32
    %c0_i32_1 = arith.constant 0 : i32
    return %c0_i32, %c0_i32_0 : i32, i32
  }
  func.func @transform_13(%arg0: i32, %arg1: memref<2xi32, #tpu.memory_space<smem>>, %arg2: memref<2xi32, #tpu.memory_space<smem>>) -> (i32, i32) {
    %c0_i32 = arith.constant 0 : i32
    %c0_i32_0 = arith.constant 0 : i32
    %c0_i32_1 = arith.constant 0 : i32
    return %c0_i32, %c0_i32_0 : i32, i32
  }
  func.func @transform_14(%arg0: i32, %arg1: memref<2xi32, #tpu.memory_space<smem>>, %arg2: memref<2xi32, #tpu.memory_space<smem>>) -> (i32, i32) {
    %c0_i32 = arith.constant 0 : i32
    %c0_i32_0 = arith.constant 0 : i32
    %c0_i32_1 = arith.constant 0 : i32
    return %c0_i32, %c0_i32_0 : i32, i32
  }
  func.func @transform_15(%arg0: i32, %arg1: memref<2xi32, #tpu.memory_space<smem>>, %arg2: memref<2xi32, #tpu.memory_space<smem>>) -> (i32, i32, i32) {
    %c0_i32 = arith.constant 0 : i32
    %c0_i32_0 = arith.constant 0 : i32
    %c0_i32_1 = arith.constant 0 : i32
    %c0_i32_2 = arith.constant 0 : i32
    return %c0_i32, %c0_i32_0, %c0_i32_1 : i32, i32, i32
  }
  func.func @transform_16(%arg0: i32, %arg1: memref<2xi32, #tpu.memory_space<smem>>, %arg2: memref<2xi32, #tpu.memory_space<smem>>) -> (i32, i32, i32) {
    %c0_i32 = arith.constant 0 : i32
    %c0_i32_0 = arith.constant 0 : i32
    %c0_i32_1 = arith.constant 0 : i32
    %c0_i32_2 = arith.constant 0 : i32
    return %c0_i32, %c0_i32_0, %c0_i32_1 : i32, i32, i32
  }
  func.func @transform_17(%arg0: i32, %arg1: memref<2xi32, #tpu.memory_space<smem>>, %arg2: memref<2xi32, #tpu.memory_space<smem>>) -> (i32, i32) {
    %c0_i32 = arith.constant 0 : i32
    %c0_i32_0 = arith.constant 0 : i32
    %c0_i32_1 = arith.constant 0 : i32
    return %c0_i32, %c0_i32_0 : i32, i32
  }
  func.func @transform_18(%arg0: i32, %arg1: memref<2xi32, #tpu.memory_space<smem>>, %arg2: memref<2xi32, #tpu.memory_space<smem>>) -> (i32, i32) {
    %c0_i32 = arith.constant 0 : i32
    %c0_i32_0 = arith.constant 0 : i32
    %c0_i32_1 = arith.constant 0 : i32
    return %c0_i32, %c0_i32_0 : i32, i32
  }
  func.func @transform_19(%arg0: i32, %arg1: memref<2xi32, #tpu.memory_space<smem>>, %arg2: memref<2xi32, #tpu.memory_space<smem>>) -> (i32, i32) {
    %c0_i32 = arith.constant 0 : i32
    %c0_i32_0 = arith.constant 0 : i32
    %c0_i32_1 = arith.constant 0 : i32
    return %c0_i32, %c0_i32_0 : i32, i32
  }
  func.func @transform_20(%arg0: i32, %arg1: memref<2xi32, #tpu.memory_space<smem>>, %arg2: memref<2xi32, #tpu.memory_space<smem>>) -> (i32, i32) {
    %c0_i32 = arith.constant 0 : i32
    %c0_i32_0 = arith.constant 0 : i32
    %c0_i32_1 = arith.constant 0 : i32
    return %c0_i32, %c0_i32_0 : i32, i32
  }
  func.func @transform_21(%arg0: i32, %arg1: memref<2xi32, #tpu.memory_space<smem>>, %arg2: memref<2xi32, #tpu.memory_space<smem>>) -> (i32, i32) {
    %c0_i32 = arith.constant 0 : i32
    %c0_i32_0 = arith.constant 0 : i32
    %c0_i32_1 = arith.constant 0 : i32
    return %c0_i32, %c0_i32_0 : i32, i32
  }
  func.func @transform_22(%arg0: i32, %arg1: memref<2xi32, #tpu.memory_space<smem>>, %arg2: memref<2xi32, #tpu.memory_space<smem>>) -> (i32, i32) {
    %c0_i32 = arith.constant 0 : i32
    %c0_i32_0 = arith.constant 0 : i32
    %c0_i32_1 = arith.constant 0 : i32
    return %c0_i32, %c0_i32_0 : i32, i32
  }
  func.func @transform_23(%arg0: i32, %arg1: memref<2xi32, #tpu.memory_space<smem>>, %arg2: memref<2xi32, #tpu.memory_space<smem>>) -> (i32, i32, i32) {
    %c0_i32 = arith.constant 0 : i32
    %c0_i32_0 = arith.constant 0 : i32
    %c0_i32_1 = arith.constant 0 : i32
    return %arg0, %c0_i32, %c0_i32_0 : i32, i32, i32
  }
}

</mosaic_0001>

<bundles_post_ra>
// kernel: decoder_forward.5
= control target key start
LH: loop header
LB: loop body
LE: loop exit
PB: predicated region body
PF: predicated region fallthrough
CT: control target
= control target key end

     0   :  { %9 = vsyncpa [#allocation5], 0  ;;  %s827_s0 = inlined_call_operand.vmem [shape: bf16[2,8,32], index: 0, kind: input, shape index: {}]   ;;  %s828_s1 = inlined_call_operand.vmem [shape: bf16[32,128], index: 1, kind: input, shape index: {}]   ;;  %s829_s2 = inlined_call_operand.hbm [shape: f32[2,8,128], index: 2, kind: output, shape index: {0}]   ;;  %s830_s3 = inlined_call_operand.hbm [shape: f32[2,8,1], index: 3, kind: output, shape index: {1}]  }
   0x1   :  { %11 = vsyncpa [#allocation5 + $0x1], 0 }
   0x2   :  { %12 = vsyncpa [#allocation7], 0 }
   0x3   :  { %14 = vsyncpa [#allocation7 + $0x1], 0  ;;  %s672_s12 = smov 0   ;;  %s674_s13 = smov 0  }
   0x4   :  { %s676_s14 = smov 0   ;;  %s678_s15 = smov 0  }
   0x5   :  { %s680_s16 = smov 0   ;;  %s682_s17 = smov 0  }
   0x6 LB: > { %s439_s18 = sadd.s32 4294967295, %s646_s17   ;;  %s440_s19 = sadd.s32 4294967294, %s646_s17   ;;  %s646_s17 = sphi %s682_s17, %s20_s17   ;;  %s642_s16 = sphi %s680_s16, %s837_s16   ;;  %s638_s15 = sphi %s678_s15, %s836_s15   ;;  %s634_s14 = sphi %s676_s14, %s835_s14   ;;  %s630_s13 = sphi %s674_s13, %s834_s13   ;;  %s626_s12 = sphi %s672_s12, %s833_s12  }
   0x7   : > { %s32_s20 = sadd.s32 1, %s642_s16  ;;  %s93_s21 = sadd.s32 1, %s634_s14 }
   0x8   : > { %p34_p0 = scmp.ge.s32.totalorder %s32_s20, 2  ;;  %p103_p1 = scmp.ne.s32.totalorder %s634_s14, %s630_s13 }
   0x9   : > { %p104_p2 = scmp.eq.s32.totalorder %s439_s18, 1  ;;  %p109_p3 = scmp.ne.s32.totalorder %s630_s13, %s626_s12 }
   0xa   : > { %s839_s20 = smov (%p34_p0, %s32_s20), 0  ;;  %p110_p5 = scmp.eq.s32.totalorder %s440_s19, 1 }
   0xb   : > { %p712_p4 = por %p104_p2, %p103_p1  ;;  %s88_s23 = ssub.s32 %s642_s16, %s839_s20 }
   0xc   : > { %p444_p6 = scmp.ge.s32.totalorder %s646_s17, 1  ;;  %p91_p7 = scmp.eq.s32.totalorder %s88_s23, 0 }
   0xd   : > { %p719_p8 = por %p110_p5, %p109_p3  ;;  %p168_p9 = scmp.lt.s32.totalorder %s646_s17, 3 }
   0xe   : > { %s725_s25 = scalar_select %p91_p7, %s634_s14, %s93_s21  }
   0xf   : > { %p169_p10 = pnand %p444_p6, %p168_p9 }
  0x10   : > { %v530_v0 = vld [vmem:[%s828_s1] sm:$0xff] (!%p169_p10)   ;;  %v648_v1 = vmov (!%p169_p10), 0.0   ;;  %v531_v2 = vld [vmem:[%s828_s1 + $0x8] sm:$0xff] (!%p169_p10)   ;;  %vm649_vm0 = vmmov (!%p169_p10), 0   ;;  %p200_p11 = scmp.lt.s32.totalorder (!%p169_p10), %s638_s15, 1  ;;  %vm226_vm1 = vcmask (!%p169_p10), 261120   ;;  %v270_v4 = vlaneseq (!%p169_p10) }
  0x11   : > { %172 = sbr.rel (%p169_p10) target bundleno = 593 (0x251), region = 28  ;;  %460 = vmatprep.subr.bf16.mxu0 (!%p169_p10), %v648_v1  ;;  %464 = vmatprep.mubr.msk.bf16.mxu0 (!%p169_p10), %vm649_vm0, %v648_v1  ;;  %s739_s8 = sand.u32 (!%p169_p10), 1, %s630_s13   ;;  %vm289_vm3 = vcmask (!%p169_p10), 7168  }
  0x12   : > { %461 = vmatpush3.bf16.msra.mxu0 (!%p169_p10), %v530_v0  ;;  %v271_v5 = vand.u32 (!%p169_p10), 127, %v270_v4  ;;  %s445_s9 = sshll.u32 (!%p169_p10), %s739_s8, 3  ;;  %s453_s10 = sshll.u32 (!%p169_p10), %s638_s15, 7 }
  0x13   : > { %462 = vmatprep.subr.bf16.mxu0 (!%p169_p10), %v648_v1  ;;  %s199_s11 = scalar_lea.vmem (!%p169_p10), [#allocation6], %s445_s9  ;;  %s743_s19 = scalar_lea.vmem (!%p169_p10), [#allocation4], %s445_s9 }
  0x14   : > { %vm275_vm2 = vcmp.ge.s32.totalorder (!%p169_p10), %v271_v5, 50  ;;  %s324_s18 = sshll.u32 (!%p169_p10), %s199_s11, 4  ;;  %s311_s21 = sshll.u32 (!%p169_p10), %s743_s19, 4  ;;  %s751_s18 = int_to_ptr.vmem [resolvable:$true] %s324_s18  ;;  %s758_s21 = int_to_ptr.vmem [resolvable:$true] %s311_s21 }
  0x15   : > { %s749_s27 = scalar_lea.hbm (!%p169_p10), %s830_s3, %s453_s10  ;;  %s756_s29 = scalar_lea.hbm (!%p169_p10), %s829_s2, %s453_s10 }
  0x16   : > { %463 = vmatpush3.bf16.msra.mxu0 (!%p169_p10), %v531_v2  ;;  %s650_s5 = smov (!%p169_p10), [#allocation6]  }
  0x17   : > { %s540_s6 = sshll.u32 (!%p169_p10), %s650_s5, 4  ;;  %s541_s6 = int_to_ptr.vmem [resolvable:$false] %s540_s6 }
  0x18   : > { %s201_s30 = scalar_select %p200_p11, %s638_s15, 1 }
  0x19   : > { %p543_p1 = scmp.lt.s32.totalorder %s751_s18, %s541_s6 }
  0x1a   : > { %s447_s4 = sshll.u32 %s201_s30, 2  ;;  %s297_s30 = scalar_lea.sflag [#allocation7], %s739_s8 }
  0x1b   : > { %s203_s7 = scalar_lea.vmem %s827_s0, %s447_s4  ;;  %s536_s4 = scalar_lea.vmem %s751_s18, 128 }
  0x1c   : > { %v209_v3 = vld [vmem:[%s203_s7] sm:$0xf]  ;;  %p537_p12 = scmp.ne.s32.totalorder %s751_s18, %s536_s4  ;;  %s542_s7 = scalar_lea.vmem %s541_s6, 256 }
  0x1d   : > { %465 = vmatmul.mubr.msk.bf16.vlgmr.msra.gmra.mrb[0].mxu0 %vm226_vm1, %v209_v3  ;;  %p544_p2 = scmp.lt.s32.totalorder %s542_s7, %s536_s4 }
  0x1e   : > { %p538_p13 = pnand %p537_p12, %p712_p4 }
  0x1f   : > { %p545_p3 = por %p544_p2, %p543_p1 }
  0x20   : > { %p539_p0 = pneg %p538_p13 }
  0x22   : > { %p546_p5 = pnand %p545_p3, %p539_p0 }
  0xf0   : > { %v264_v6 = vpop.f32.mrb[0].mxu0 }
  0xf1   : > { %v276_v7 = vsel %vm275_vm2, -1e+30, %v264_v6  ;;  %v466_v8 = vpop.f32.mrb[1].mxu0 }
  0xf2   : > { %277 = vmax.xlane.f32.xlu0 %v276_v7  ;;  %v267_v9 = vpop.f32.mrb[2].mxu0 }
  0xf3   : > { %v467_v10 = vpop.f32.mrb[3].mxu0 }
 0x17f   : > { %v278_v11 = vpop.xlane.xlu0 %277 }
 0x180   : > { %v279_v12 = vsub.f32 %v276_v7, %v278_v11 }
 0x182   : > { %v280_v13 = vmul.f32 1.442695, %v279_v12 }
 0x184   : > { %532 = vpow2.f32 %v280_v13 }
 0x18e   : > { %v533_v14 = vpop.eup %532 }
 0x18f   : > { %282 = vadd.xlane.f32.xlu0 %v533_v14 }
 0x21c   : > { %v283_v15 = vpop.xlane.xlu0 %282 }
 0x21d   : > { %534 = vlog2.f32 %v283_v15 }
 0x227   : > { %v535_v16 = vpop.eup %534 }
 0x228   : > { %v285_v17 = vmul.f32 0.6931472, %v535_v16 }
 0x22a   : > { %v286_v18 = vadd.f32 %v285_v17, %v278_v11 }
 0x22c   : > { %v287_v19 = vsub.f32 %v276_v7, %v286_v18  ;;  %290 = vst.msk [vmem:[%s199_s11] sm:$0xff] %vm289_vm3, %v286_v18 }
 0x22d   : > { %549 = shalt.err (!%p546_p5)
}
 0x22e   : > { %s550_s9 = scalar_lea.hbm %s749_s27, 128  ;;  %s554_s23 = scalar_lea.hbm %s830_s3, 256 }
 0x22f   : > { %p551_p6 = scmp.ne.s32.totalorder %s749_s27, %s550_s9  ;;  %p555_p10 = scmp.lt.u32.totalorder %s749_s27, %s830_s3 }
 0x230   : > { %p556_p11 = scmp.lt.u32.totalorder %s554_s23, %s550_s9  ;;  %p558_p13 = scmp.lt.u32.totalorder %s550_s9, %s749_s27 }
 0x231   : > { %p552_p7 = pnand %p551_p6, %p712_p4 }
 0x232   : > { %p557_p12 = por %p556_p11, %p555_p10 }
 0x233   : > { %p553_p9 = pneg %p552_p7 }
 0x234   : > { %p559_p0 = por %p558_p13, %p557_p12 }
 0x236   : > { %p560_p1 = pnand %p559_p0, %p553_p9 }
 0x238   : > { %563 = shalt.err (!%p560_p1)
}
 0x239   : > { %469 = dma.vmem_to_hbm [thread:$0]  (%p712_p4), %s751_s18, 128, %s749_s27, %s297_s30   ;;  %288 = vst [vmem:[%s743_s19] sm:$0xff] %v287_v19 }
 0x23a   : > { %s292_s28 = scalar_lea.sflag [#allocation5], %s739_s8  ;;  %s564_s4 = scalar_lea.vmem %s758_s21, 128 }
 0x23b   : > { %p565_p2 = scmp.ne.s32.totalorder %s758_s21, %s564_s4  ;;  %s651_s5 = smov [#allocation4]  }
 0x23c   : > { %s568_s6 = sshll.u32 %s651_s5, 4  ;;  %s569_s6 = int_to_ptr.vmem [resolvable:$false] %s568_s6 }
 0x23d   : > { %p566_p3 = pnand %p565_p2, %p712_p4  ;;  %s570_s7 = scalar_lea.vmem %s569_s6, 256 }
 0x23e   : > { %p571_p6 = scmp.lt.s32.totalorder %s758_s21, %s569_s6  ;;  %p572_p7 = scmp.lt.s32.totalorder %s570_s7, %s564_s4 }
 0x23f   : > { %p567_p5 = pneg %p566_p3 }
 0x240   : > { %p573_p9 = por %p572_p7, %p571_p6 }
 0x242   : > { %p574_p10 = pnand %p573_p9, %p567_p5 }
 0x244   : > { %577 = shalt.err (!%p574_p10)
}
 0x245   : > { %s578_s8 = scalar_lea.hbm %s756_s29, 128  ;;  %s582_s27 = scalar_lea.hbm %s829_s2, 256 }
 0x246   : > { %p579_p11 = scmp.ne.s32.totalorder %s756_s29, %s578_s8  ;;  %p583_p0 = scmp.lt.u32.totalorder %s756_s29, %s829_s2 }
 0x247   : > { %p584_p1 = scmp.lt.u32.totalorder %s582_s27, %s578_s8  ;;  %p586_p3 = scmp.lt.u32.totalorder %s578_s8, %s756_s29 }
 0x248   : > { %p580_p12 = pnand %p579_p11, %p712_p4 }
 0x249   : > { %p585_p2 = por %p584_p1, %p583_p0 }
 0x24a   : > { %p581_p13 = pneg %p580_p12 }
 0x24b   : > { %p587_p5 = por %p586_p3, %p585_p2 }
 0x24d   : > { %p588_p6 = pnand %p587_p5, %p581_p13 }
 0x24f   : > { %591 = shalt.err (!%p588_p6)
}
 0x250   : > { %468 = dma.vmem_to_hbm [thread:$0]  (%p712_p4), %s758_s21, 128, %s756_s29, %s292_s28  }
 0x251 PF: > { %p479_p7 = scmp.ge.s32.totalorder %s646_s17, 2  ;;  %s336_s10 = sand.u32 1, %s626_s12  }
 0x252   : > { %s337_s11 = scalar_lea.sflag [#allocation5], %s336_s10 }
 0x253   : > { %p473_p9 = pnand %p479_p7, %p719_p8 }
 0x255   : > { %617 = dma.done.wait (!%p473_p9), %s337_s11, 128  }
 0x256   : > { %619 = vsyncadd (!%p473_p9), %s337_s11, 4294967168  ;;  %s346_s23 = scalar_lea.sflag [#allocation7], %s336_s10 }
 0x257   : > { %621 = dma.done.wait (!%p473_p9), %s346_s23, 128  }
 0x258   : > { %623 = vsyncadd (!%p473_p9), %s346_s23, 4294967168  ;;  %s20_s17 = sadd.s32 1, %s646_s17   ;;  %s833_s12 = smov %s630_s13 }
 0x259   : > { %p17_p10 = scmp.ge.s32.totalorder %s20_s17, 4   ;;  %s834_s13 = smov %s634_s14 }
 0x25a   : > { %s835_s14 = smov %s725_s25  ;;  %s836_s15 = smov %s642_s16 }
 0x25b   : > { %s837_s16 = smov %s839_s20  ;;  %19 = sbr.rel (!%p17_p10) target bundleno = 6 (0x6), region = 83 }
 0x262   :  { %351 = vsyncpa [#allocation5], 1 }
 0x263   :  { %353 = vsyncpa [#allocation5 + $0x1], 1 }
 0x264   :  { %354 = vsyncpa [#allocation7], 1 }
 0x265   :  { %356 = vsyncpa [#allocation7 + $0x1], 1 }

// kernel: decoder_forward.3
= control target key start
LH: loop header
LB: loop body
LE: loop exit
PB: predicated region body
PF: predicated region fallthrough
CT: control target
= control target key end

     0   :  { %s5705_s0 = inlined_call_operand.vmem [shape: s32[2], index: 0, kind: input, shape index: {}]   ;;  %s5706_s2 = inlined_call_operand.vmem [shape: bf16[2,8,32], index: 2, kind: input, shape index: {}]   ;;  %s5707_s3 = inlined_call_operand.vmem [shape: bf16[2,8,32], index: 3, kind: input, shape index: {}]   ;;  %s5708_s4 = inlined_call_operand.vmem [shape: bf16[2,3,10,32], index: 4, kind: input, shape index: {}]   ;;  %s5709_s5 = inlined_call_operand.vmem [shape: bf16[32,96], index: 5, kind: input, shape index: {}]   ;;  %s5710_s6 = inlined_call_operand.vmem [shape: f32[1,96], index: 6, kind: input, shape index: {}]   ;;  %s5711_s7 = inlined_call_operand.vmem [shape: bf16[32,32], index: 7, kind: input, shape index: {}]   ;;  %s5712_s8 = inlined_call_operand.vmem [shape: f32[1,32], index: 8, kind: input, shape index: {}]   ;;  %s5713_s9 = inlined_call_operand.vmem [shape: f32[1,32], index: 9, kind: input, shape index: {}]   ;;  %s5714_s10 = inlined_call_operand.vmem [shape: f32[1,32], index: 10, kind: input, shape index: {}]   ;;  %s5715_s11 = inlined_call_operand.vmem [shape: bf16[32,96], index: 11, kind: input, shape index: {}]   ;;  %s5716_s12 = inlined_call_operand.vmem [shape: f32[1,96], index: 12, kind: input, shape index: {}]   ;;  %s5717_s13 = inlined_call_operand.vmem [shape: bf16[32,32], index: 13, kind: input, shape index: {}]   ;;  %s5718_s14 = inlined_call_operand.vmem [shape: f32[1,32], index: 14, kind: input, shape index: {}]   ;;  %s5719_s15 = inlined_call_operand.vmem [shape: f32[1,32], index: 15, kind: input, shape index: {}]   ;;  %s5720_s16 = inlined_call_operand.vmem [shape: f32[1,32], index: 16, kind: input, shape index: {}]   ;;  %s5721_s17 = inlined_call_operand.vmem [shape: bf16[3,64,32], index: 17, kind: input, shape index: {}]   ;;  %s5722_s18 = inlined_call_operand.vmem [shape: f32[3,1,32], index: 18, kind: input, shape index: {}]   ;;  %s5723_s19 = inlined_call_operand.vmem [shape: bf16[32,64], index: 19, kind: input, shape index: {}]   ;;  %s5724_s20 = inlined_call_operand.vmem [shape: f32[1,64], index: 20, kind: input, shape index: {}]   ;;  %s5725_s21 = inlined_call_operand.vmem [shape: bf16[64,32], index: 21, kind: input, shape index: {}]   ;;  %s5726_s22 = inlined_call_operand.vmem [shape: f32[1,32], index: 22, kind: input, shape index: {}]   ;;  %s5727_s23 = inlined_call_operand.vmem [shape: f32[1,32], index: 23, kind: input, shape index: {}]   ;;  %s5728_s24 = inlined_call_operand.vmem [shape: f32[1,32], index: 24, kind: input, shape index: {}]   ;;  %s5729_s25 = inlined_call_operand.vmem [shape: bf16[2,8,32], index: 25, kind: output, shape index: {}]   ;;  %s5730_s1 = inlined_call_operand.vmem [shape: s32[2], index: 1, kind: input, shape index: {}]  }
   0x1   :  { %5752 = sst [smem:[#allocation8_spill]] %s5705_s0 }
   0x2   :  { %5753 = sst [smem:[#allocation9_spill]] %s5706_s2 }
   0x3   :  { %5754 = sst [smem:[#allocation10_spill]] %s5707_s3 }
   0x4   :  { %5755 = sst [smem:[#allocation11_spill]] %s5708_s4  ;;  %s34_s4 = sshll.u32 %s5730_s1, 4  ;;  %s35_s4 = int_to_ptr.vmem [resolvable:$true] %s34_s4 }
   0x5   :  { %5756 = sst [smem:[#allocation12_spill]] %s5709_s5 }
   0x6   :  { %5757 = sst [smem:[#allocation13_spill]] %s5710_s6 }
   0x7   :  { %5758 = sst [smem:[#allocation14_spill]] %s5711_s7  ;;  %s5764_s7 = sld [smem:[#allocation8_spill]] }
   0x8   :  { %5759 = sst [smem:[#allocation15_spill]] %s5712_s8 }
   0x9   :  { %5760 = sst [smem:[#allocation16_spill]] %s5713_s9 }
   0xa   :  { %5761 = sst [smem:[#allocation17_spill]] %s5714_s10 }
   0xb   :  { %5762 = sst [smem:[#allocation18_spill]] %s5724_s20 }
   0xc   :  { %5763 = sst [smem:[#allocation19_spill]] %s5729_s25 }
   0xd   :  { %s30_s20 = sshll.u32 %s5764_s7, 4  ;;  %s31_s20 = int_to_ptr.vmem [resolvable:$true] %s30_s20 }
   0xe   :  { %s4816_s26 = scalar_lea.vmem %s31_s20, 16  ;;  %p4821_p1 = scmp.lt.s32.totalorder %s31_s20, %s31_s20 }
   0xf   :  { %p4817_p0 = scmp.ne.s32.totalorder %s31_s20, %s4816_s26  ;;  %p4822_p2 = scmp.lt.s32.totalorder %s4816_s26, %s4816_s26 }
  0x11   :  { %p4823_p3 = por %p4822_p2, %p4821_p1 }
  0x13   :  { %p4824_p4 = pnand %p4823_p3, %p4817_p0 }
  0x15   :  { %4827 = shalt.err (!%p4824_p4)  }
  0x16   :  { %s4850_s2 = smov [#allocation4]   ;;  %s4828_s9 = scalar_lea.vmem %s35_s4, 16 }
  0x17   :  { %33 = dma.vmem_to_smem %s31_s20, 16, %s4850_s2, [#allocation3] }
  0x18   :  { %p4829_p5 = scmp.ne.s32.totalorder %s35_s4, %s4828_s9  ;;  %p4833_p6 = scmp.lt.s32.totalorder %s35_s4, %s35_s4 }
  0x19   :  { %p4834_p7 = scmp.lt.s32.totalorder %s4828_s9, %s4828_s9 }
  0x1b   :  { %p4835_p8 = por %p4834_p7, %p4833_p6 }
  0x1d   :  { %p4836_p9 = pnand %p4835_p8, %p4829_p5 }
  0x1f   :  { %4839 = shalt.err (!%p4836_p9)  }
  0x20   :  { %s4851_s27 = smov [#allocation5]  }
  0x21   :  { %37 = dma.vmem_to_smem %s35_s4, 16, %s4851_s27, [#allocation3] }
  0x22   :  { %4844 = dma.done.wait [#allocation3], 32 }
  0x23   :  { %4845 = vsyncadd [#allocation3], 4294967264 }
  0x24   :  { %39 = sfence }
  0x25   :  { %s5004_s1 = smov 0  }
  0x26 LB: > { %5765 = sst [smem:[#allocation7_spill]] %s4848_s1  ;;  %s5010_s20 = sadd.s32 4294967295, %s4848_s1   ;;  %s4848_s1 = sphi %s5004_s1, %s45_s1  }
  0x27   : > { %p4055_p10 = scmp.ge.s32.totalorder %s4848_s1, 1  ;;  %p667_p11 = scmp.lt.s32.totalorder %s4848_s1, 3 }
  0x29   : > { %p668_p12 = pnand %p4055_p10, %p667_p11 }
  0x2a   : > { %s5766_s10 = sld [smem:[#allocation12_spill]] (!%p668_p12)  ;;  %v4852_v1 = vmov (!%p668_p12), 0.0   ;;  %vm4853_vm0 = vmmov (!%p668_p12), 0   ;;  %p738_p13 = scmp.lt.s32.totalorder (!%p668_p12), %s5010_s20, 1  ;;  %vm785_vm1 = vcmask (!%p668_p12), 261120   ;;  %vm842_vm2 = vcmask (!%p668_p12), 64512  }
  0x2b   : > { %671 = sbr.rel (%p668_p12) target bundleno = 7539 (0x1d73), region = 112  ;;  %4334 = vmatprep.subr.bf16.mxu1 (!%p668_p12), %v4852_v1  ;;  %4348 = vmatprep.subr.bf16.mxu0 (!%p668_p12), %v4852_v1  ;;  %s5767_s4 = sld [smem:[#allocation9_spill]] (!%p668_p12)  ;;  %v829_v24 = vlaneseq (!%p668_p12)  ;;  %vm906_vm6 = vcmask (!%p668_p12), 1043456   ;;  %vm953_vm7 = vcmask (!%p668_p12), 60416   ;;  %vm1074_vm8 = vcmask (!%p668_p12), 126016  }
  0x2c   : > { %4338 = vmatprep.mubr.msk.bf16.mxu1 (!%p668_p12), %vm4853_vm0, %v4852_v1  ;;  %4350 = vmatprep.mubr.msk.bf16.mxu0 (!%p668_p12), %vm4853_vm0, %v4852_v1  ;;  %s5768_s27 = sld [smem:[#allocation10_spill]] (!%p668_p12)  ;;  %s5769_s0 = sld [smem:[#allocation11_spill]] (!%p668_p12)  ;;  %vm1195_vm9 = vcmask (!%p668_p12), 191616   ;;  %vm1316_vm10 = vcmask (!%p668_p12), 257216   ;;  %vm1600_vm12 = vcmask (!%p668_p12), 80896   ;;  %vm1617_vm13 = vcmask (!%p668_p12), 1044480  }
  0x2d   : > { %s5770_s8 = sld [smem:[#allocation13_spill]] (!%p668_p12)  ;;  %s5742_s2 = smov (!%p668_p12), 88   ;;  %v835_v25 = vshrl.u32 (!%p668_p12), %v829_v24, 7  ;;  %v5096_v28 = vand.u32 (!%p668_p12), 127, %v829_v24  ;;  %vm3896_vm14 = vcmask (!%p668_p12), 523264   ;;  %vm3972_vm15 = vcmask (!%p668_p12), 257024  }
  0x2e   : > { %s5740_s9 = smov (!%p668_p12), 72   ;;  %s756_s28 = sld [smem:[#allocation4 + %s5010_s20]] (!%p668_p12) }
  0x2f   : > { %vm836_vm5 = vcmp.gt.s32.totalorder (!%p668_p12), %v5096_v28, %v835_v25  ;;  %s4861_s6 = smov (!%p668_p12), 56   ;;  %s4864_s30 = smov (!%p668_p12), 48  }
  0x30   : > { %v4693_v0 = vld [vmem:[%s5766_s10] sm:$0xff] (!%p668_p12)   ;;  %v4694_v2 = vld [vmem:[%s5766_s10 + $0x8] sm:$0xff] (!%p668_p12)  }
  0x31   : > { %4335 = vmatpush3.bf16.msra.mxu1 (!%p668_p12), %v4693_v0 }
  0x32   : > { %4336 = vmatprep.subr.bf16.mxu1 %v4852_v1  ;;  %s739_s29 = scalar_select %p738_p13, %s5010_s20, 1 }
  0x33   : > { %v4060_v6 = vld [vmem:[%s5770_s8] ss:$0 sm:$0xff]  ;;  %s5734_s8 = smov 8  }
  0x34   : > { %s5029_s3 = sshll.u32 %s739_s29, 2  ;;  %s4666_s7 = smul.u32 24, %s739_s29  ;;  %v831_v26 = vstv %s756_s28 }
  0x35   : > { %4337 = vmatpush3.bf16.msra.mxu1 %v4694_v2  ;;  %s741_s26 = scalar_lea.vmem %s5767_s4, %s5029_s3  ;;  %s745_s5 = scalar_lea.vmem %s5768_s27, %s5029_s3  ;;  %vm5092_vm3 = vcmp.ge.s32.totalorder %v835_v25, %v831_v26  ;;  %vm832_vm4 = vcmp.ge.s32.totalorder %v5096_v28, %v831_v26 }
  0x36   : > { %4342 = vmatprep.subr.bf16.mxu1 %v4852_v1  ;;  %s5043_s10 = scalar_lea.vmem %s5769_s0, %s4666_s7  ;;  %v758_v3 = vld [vmem:[%s741_s26] sm:$0xf]  ;;  %s5748_s7 = smov 120   ;;  %v833_v29 = vsel %vm832_vm4, -1e+30, %v4852_v1 }
  0x37   : > { %v759_v4 = vld [vmem:[%s745_s5] sm:$0xf]  ;;  %s4855_s4 = smov 96   ;;  %s5744_s26 = smov 80   ;;  %v837_v31 = vsel %vm836_vm5, -1e+30, %v833_v29 }
  0x38   : > { %v5045_v5 = vadd.bf16 %v759_v4, %v758_v3  ;;  %s5749_s27 = smov 112   ;;  %s5746_s5 = smov 104  }
  0x39   : > { %s4862_s0 = smov 64   ;;  %s4863_s29 = smov 40  }
  0x3a   : > { %4339 = vmatmul.mubr.msk.bf16.vlgmr.msra.gmra.mrb[0].mxu1 %vm785_vm1, %v5045_v5  ;;  %s5736_s28 = smov 24  }
  0x3b   : > { %4344 = vmatprep.mubr.msk.bf16.mxu1 %vm4853_vm0, %v4852_v1 }
 0x10d   : > { %v823_v7 = vpop.f32.mrb[0].mxu1 }
 0x10e   : > { %v824_v8 = vadd.f32 %v4060_v6, %v823_v7  ;;  %v4340_v9 = vpop.f32.mrb[1].mxu1 }
 0x10f   : > { %v826_v10 = vpop.f32.mrb[2].mxu1 }
 0x110   : > { %v5054_v11 = vpack.c.bf16 %v824_v8, %v824_v8  ;;  %v4341_v12 = vpop.f32.mrb[3].mxu1 }
 0x112   : > { %955 = vrot.lane.b32.xlu1 %v5054_v11, %s5748_s7  ;;  %840 = vrot.lane.b32.xlu0 %v5054_v11, %s4855_s4 }
 0x116   : > { %1078 = vrot.lane.b32.xlu1 %v5054_v11, %s5744_s26  ;;  %957 = vrot.lane.b32.xlu0 %v5054_v11, %s5742_s2 }
 0x11a   : > { %1199 = vrot.lane.b32.xlu1 %v5054_v11, %s5740_s9  ;;  %1076 = vrot.lane.b32.xlu0 %v5054_v11, %s5749_s27  ;;  %s5776_s9 = sld [smem:[#allocation17_spill]] }
 0x11e   : > { %1197 = vrot.lane.b32.xlu0 %v5054_v11, %s5746_s5 }
 0x184   : > { %v841_v13 = vpop.permute.xlu0 %840  ;;  %v956_v16 = vpop.permute.xlu1 %955 }
 0x185   : > { %v847_v14 = vsel %vm842_vm2, %v841_v13, 0 }
 0x186   : > { %4343 = vmatpush3.bf16.xpose.msra.mxu1 %v847_v14 }
 0x187   : > { %4354 = vmatprep.subr.bf16.mxu1 %v4852_v1 }
 0x188   : > { %v958_v15 = vpop.permute.xlu0 %957  ;;  %v1079_v18 = vpop.permute.xlu1 %1078 }
 0x189   : > { %v963_v17 = vsel %vm842_vm2, %v958_v15, 0  ;;  %v1084_v19 = vsel %vm842_vm2, %v1079_v18, 0 }
 0x18c   : > { %v1200_v20 = vpop.permute.xlu1 %1199  ;;  %v1077_v21 = vpop.permute.xlu0 %1076 }
 0x18d   : > { %4345 = vmatmul.mubr.msk.bf16.vlgmr.msra.gmra.mrb[4].mxu1 %vm842_vm2, %v5054_v11  ;;  %v1205_v22 = vsel %vm842_vm2, %v1200_v20, 0 }
 0x18e   : > { %4355 = vmatpush3.bf16.xpose.msra.mxu1 %v963_v17  ;;  %4356 = vmatprep.mubr.msk.bf16.mxu1 %vm4853_vm0, %v4852_v1 }
 0x18f   : > { %4366 = vmatprep.subr.bf16.mxu1 %v4852_v1 }
 0x190   : > { %v1198_v23 = vpop.permute.xlu0 %1197 }
 0x195   : > { %4357 = vmatmul.mubr.msk.bf16.vlgmr.msra.gmra.mrb[8].mxu1 %vm842_vm2, %v956_v16 }
 0x196   : > { %4367 = vmatpush3.bf16.xpose.msra.mxu1 %v1084_v19  ;;  %4368 = vmatprep.mubr.msk.bf16.mxu1 %vm4853_vm0, %v4852_v1 }
 0x197   : > { %4378 = vmatprep.subr.bf16.mxu1 %v4852_v1 }
 0x19d   : > { %4369 = vmatmul.mubr.msk.bf16.vlgmr.msra.gmra.mrb[12].mxu1 %vm842_vm2, %v1077_v21 }
 0x19e   : > { %4379 = vmatpush3.bf16.xpose.msra.mxu1 %v1205_v22  ;;  %4380 = vmatprep.mubr.msk.bf16.mxu1 %vm4853_vm0, %v4852_v1 }
 0x19f   : > { %4390 = vmatprep.subr.bf16.mxu1 %v4852_v1 }
 0x1a5   : > { %4381 = vmatmul.mubr.msk.bf16.vlgmr.msra.gmra.mrb[16].mxu1 %vm842_vm2, %v1198_v23 }
 0x1a6   : > { %4394 = vmatprep.mubr.msk.bf16.mxu1 %vm4853_vm0, %v4852_v1 }
 0x260   : > { %v883_v30 = vpop.f32.mrb[4].mxu1 }
 0x261   : > { %v889_v32 = vmul.f32 0.35355338, %v883_v30  ;;  %v4346_v33 = vpop.f32.mrb[5].mxu1 }
 0x262   : > { %v886_v34 = vpop.f32.mrb[6].mxu1 }
 0x263   : > { %v4347_v35 = vpop.f32.mrb[7].mxu1  ;;  %v890_v36 = vadd.f32 %v889_v32, %v837_v31 }
 0x265   : > { %v891_v37 = vsel %vm842_vm2, %v890_v36, -inf }
 0x266   : > { %892 = vmax.xlane.f32.xlu1 %v891_v37 }
 0x268   : > { %v999_v38 = vpop.f32.mrb[8].mxu1 }
 0x269   : > { %v1005_v39 = vmul.f32 0.35355338, %v999_v38  ;;  %v4358_v40 = vpop.f32.mrb[9].mxu1 }
 0x26a   : > { %v1002_v41 = vpop.f32.mrb[10].mxu1 }
 0x26b   : > { %v4359_v42 = vpop.f32.mrb[11].mxu1  ;;  %v1006_v43 = vadd.f32 %v1005_v39, %v837_v31 }
 0x26d   : > { %v1007_v44 = vsel %vm842_vm2, %v1006_v43, -inf }
 0x26e   : > { %1008 = vmax.xlane.f32.xlu0 %v1007_v44 }
 0x270   : > { %v1120_v45 = vpop.f32.mrb[12].mxu1 }
 0x271   : > { %v1126_v46 = vmul.f32 0.35355338, %v1120_v45  ;;  %v4370_v47 = vpop.f32.mrb[13].mxu1 }
 0x272   : > { %v1123_v48 = vpop.f32.mrb[14].mxu1 }
 0x273   : > { %v4371_v49 = vpop.f32.mrb[15].mxu1  ;;  %v1127_v50 = vadd.f32 %v1126_v46, %v837_v31 }
 0x275   : > { %v1128_v51 = vsel %vm842_vm2, %v1127_v50, -inf }
 0x276   : > { %1129 = vmax.xlane.f32.xlu0 %v1128_v51 }
 0x277   : > { %1017 = vrot.lane.b32.xlu1 %v5054_v11, %s4861_s6  ;;  %s5780_s6 = smov 24  }
 0x278   : > { %v1241_v52 = vpop.f32.mrb[16].mxu1 }
 0x279   : > { %v4382_v53 = vpop.f32.mrb[17].mxu1  ;;  %v1247_v56 = vmul.f32 0.35355338, %v1241_v52 }
 0x27a   : > { %v1244_v54 = vpop.f32.mrb[18].mxu1 }
 0x27b   : > { %v4383_v55 = vpop.f32.mrb[19].mxu1  ;;  %v1248_v57 = vadd.f32 %v1247_v56, %v837_v31 }
 0x27d   : > { %v1249_v58 = vsel %vm842_vm2, %v1248_v57, -inf }
 0x28c   : > { %901 = vrot.lane.b32.xlu0 %v5054_v11, %s4862_s0  ;;  %s5773_s0 = sld [smem:[#allocation14_spill]] }
 0x290   : > { %1259 = vrot.lane.b32.xlu0 %v5054_v11, %s4863_s29  ;;  %s5775_s29 = sld [smem:[#allocation16_spill]] }
 0x292   : > { %v4695_v51 = vld [vmem:[%s5773_s0] sm:$0xff]  }
 0x293   : > { %4391 = vmatpush3.bf16.msra.mxu1 %v4695_v51 }
 0x294   : > { %4392 = vmatprep.subr.bf16.mxu1 %v4852_v1 }
 0x29b   : > { %1250 = vmax.xlane.f32.xlu1 %v1249_v58 }
 0x2ac   : > { %1138 = vrot.lane.b32.xlu1 %v5054_v11, %s4864_s30  ;;  %s5774_s30 = sld [smem:[#allocation15_spill]] }
 0x2f3   : > { %v893_v59 = vpop.xlane.xlu1 %892 }
 0x2f4   : > { %v894_v60 = vsub.f32 %v890_v36, %v893_v59 }
 0x2f6   : > { %v895_v61 = vmul.f32 1.442695, %v894_v60 }
 0x2f7   : > { %v1018_v9 = vpop.permute.xlu1 %1017 }
 0x2f8   : > { %4730 = vpow2.f32 %v895_v61  ;;  %v1023_v13 = vsel %vm906_vm6, %v1018_v9, 0 }
 0x2fb   : > { %v1009_v62 = vpop.xlane.xlu0 %1008 }
 0x2fc   : > { %v1010_v63 = vsub.f32 %v1006_v43, %v1009_v62 }
 0x2fe   : > { %v1011_v0 = vmul.f32 1.442695, %v1010_v63 }
 0x300   : > { %4732 = vpow2.f32 %v1011_v0 }
 0x302   : > { %v4731_v6 = vpop.eup %4730 }
 0x303   : > { %v1130_v2 = vpop.xlane.xlu0 %1129  ;;  %v900_v11 = vpack.c.bf16 %v4731_v6, %v4731_v6  ;;  %v897_v14 = vsel %vm842_vm2, %v4731_v6, 0.0 }
 0x304   : > { %v1131_v3 = vsub.f32 %v1127_v50, %v1130_v2 }
 0x306   : > { %v1132_v4 = vmul.f32 1.442695, %v1131_v3 }
 0x307   : > { %v902_v7 = vpop.permute.xlu0 %901 }
 0x308   : > { %4734 = vpow2.f32 %v1132_v4  ;;  %v908_v8 = vsel %vm906_vm6, %v902_v7, 0  ;;  %v4075_v7 = vld [vmem:[%s5774_s30] ss:$0 sm:$0xff]  ;;  %s5778_s30 = smov 8  }
 0x309   : > { %4349 = vmatpush3.bf16.msra.mxu0 %v908_v8  ;;  %v761_v8 = vunpack.c.l.bf16 %v5045_v5  ;;  %v4698_v5 = vld [vmem:[%s5715_s11 + $0x8] sm:$0xff]  }
 0x30a   : > { %v4733_v10 = vpop.eup %4732  ;;  %4360 = vmatprep.subr.bf16.mxu0 %v4852_v1 }
 0x30b   : > { %v1013_v12 = vsel %vm842_vm2, %v4733_v10, 0.0  ;;  %v1016_v16 = vpack.c.bf16 %v4733_v10, %v4733_v10  ;;  %v1260_v23 = vpop.permute.xlu0 %1259 }
 0x30c   : > { %4351 = vmatmul.mubr.msk.bf16.vlgmr.msra.gmra.mrb[0].mxu0 %vm842_vm2, %v900_v11  ;;  %1014 = vadd.xlane.f32.xlu1 %v1013_v12  ;;  %v1265_v25 = vsel %vm906_vm6, %v1260_v23, 0  ;;  %v5171_v23 = vld [vmem:[%s5716_s12] ss:$0 sm:$0xff] }
 0x30d   : > { %4361 = vmatpush3.bf16.msra.mxu0 %v1023_v13  ;;  %4362 = vmatprep.mubr.msk.bf16.mxu0 %vm4853_vm0, %v4852_v1 }
 0x30e   : > { %4372 = vmatprep.subr.bf16.mxu0 %v4852_v1 }
 0x310   : > { %898 = vadd.xlane.f32.xlu1 %v897_v14 }
 0x312   : > { %v4735_v15 = vpop.eup %4734 }
 0x313   : > { %v1134_v17 = vsel %vm842_vm2, %v4735_v15, 0.0  ;;  %v1137_v24 = vpack.c.bf16 %v4735_v15, %v4735_v15 }
 0x314   : > { %1135 = vadd.xlane.f32.xlu0 %v1134_v17  ;;  %4363 = vmatmul.mubr.msk.bf16.vlgmr.msra.gmra.mrb[4].mxu0 %vm842_vm2, %v1016_v16  ;;  %v4697_v16 = vld [vmem:[%s5715_s11] sm:$0xff]  }
 0x315   : > { %4374 = vmatprep.mubr.msk.bf16.mxu0 %vm4853_vm0, %v4852_v1 }
 0x328   : > { %v1251_v18 = vpop.xlane.xlu1 %1250 }
 0x329   : > { %v1252_v19 = vsub.f32 %v1248_v57, %v1251_v18  ;;  %v4696_v57 = vld [vmem:[%s5773_s0 + $0x8] sm:$0xff]  }
 0x32a   : > { %4393 = vmatpush3.bf16.msra.mxu1 %v4696_v57 }
 0x32b   : > { %v1253_v20 = vmul.f32 1.442695, %v1252_v19  ;;  %4406 = vmatprep.subr.bf16.mxu1 %v4852_v1 }
 0x32c   : > { %v1139_v21 = vpop.permute.xlu1 %1138 }
 0x32d   : > { %4736 = vpow2.f32 %v1253_v20  ;;  %v1144_v22 = vsel %vm906_vm6, %v1139_v21, 0 }
 0x32e   : > { %4373 = vmatpush3.bf16.msra.mxu0 %v1144_v22 }
 0x32f   : > { %4384 = vmatprep.subr.bf16.mxu0 %v4852_v1 }
 0x331   : > { %4375 = vmatmul.mubr.msk.bf16.vlgmr.msra.gmra.mrb[8].mxu0 %vm842_vm2, %v1137_v24 }
 0x332   : > { %4385 = vmatpush3.bf16.msra.mxu0 %v1265_v25  ;;  %4386 = vmatprep.mubr.msk.bf16.mxu0 %vm4853_vm0, %v4852_v1 }
 0x333   : > { %4398 = vmatprep.subr.bf16.mxu0 %v4852_v1 }
 0x337   : > { %v4737_v26 = vpop.eup %4736 }
 0x338   : > { %v1255_v29 = vsel %vm842_vm2, %v4737_v26, 0.0  ;;  %v1258_v30 = vpack.c.bf16 %v4737_v26, %v4737_v26 }
 0x339   : > { %1256 = vadd.xlane.f32.xlu0 %v1255_v29 }
 0x33a   : > { %4387 = vmatmul.mubr.msk.bf16.vlgmr.msra.gmra.mrb[12].mxu0 %vm842_vm2, %v1258_v30  ;;  %v4699_v30 = vld [vmem:[%s5043_s10] sm:$0x1f]  }
 0x33b   : > { %4402 = vmatprep.mubr.msk.bf16.mxu0 %vm4853_vm0, %v4852_v1  ;;  %4399 = vmatpush3.bf16.msra.mxu0 %v4697_v16 }
 0x33c   : > { %4400 = vmatprep.subr.bf16.mxu0 %v4852_v1 }
 0x33f   : > { %4401 = vmatpush3.bf16.msra.mxu0 %v4698_v5 }
 0x340   : > { %4414 = vmatprep.subr.bf16.mxu0 %v4852_v1 }
 0x399   : > { %v1015_v31 = vpop.xlane.xlu1 %1014 }
 0x39d   : > { %v899_v32 = vpop.xlane.xlu1 %898 }
 0x39e   : > { %4738 = vrcp.f32 %v899_v32  ;;  %v4079_v32 = vld [vmem:[%s5775_s29] ss:$0 sm:$0xff]  ;;  %s5783_s29 = smov 88  }
 0x39f   : > { %4740 = vrcp.f32 %v1015_v31 }
 0x3a1   : > { %v1136_v47 = vpop.xlane.xlu0 %1135 }
 0x3a2   : > { %4742 = vrcp.f32 %v1136_v47 }
 0x3a8   : > { %v4739_v33 = vpop.eup %4738 }
 0x3a9   : > { %v4741_v40 = vpop.eup %4740 }
 0x3ac   : > { %v4743_v49 = vpop.eup %4742 }
 0x3c6   : > { %v1257_v48 = vpop.xlane.xlu0 %1256 }
 0x3c7   : > { %4744 = vrcp.f32 %v1257_v48 }
 0x3d1   : > { %v4745_v58 = vpop.eup %4744 }
 0x3df   : > { %v944_v34 = vpop.f32.mrb[0].mxu0 }
 0x3e0   : > { %v951_v35 = vmul.f32 %v4739_v33, %v944_v34  ;;  %v4352_v36 = vpop.f32.mrb[1].mxu0  ;;  %v4080_v34 = vld [vmem:[%s5776_s9] ss:$0 sm:$0xff]  ;;  %s757_s9 = sld [smem:[#allocation5 + %s5010_s20]]  ;;  %s5777_s20 = smov 72  }
 0x3e1   : > { %v947_v37 = vpop.f32.mrb[2].mxu0 }
 0x3e2   : > { %v952_v38 = vpack.c.bf16 %v951_v35, %v951_v35  ;;  %v4353_v39 = vpop.f32.mrb[3].mxu0 }
 0x3e4   : > { %954 = vst.msk [vmem:[#allocation2] sm:$0xf] %vm953_vm7, %v952_v38 }
 0x3e7   : > { %v1059_v41 = vpop.f32.mrb[4].mxu0 }
 0x3e8   : > { %v1066_v42 = vmul.f32 %v4741_v40, %v1059_v41  ;;  %v4364_v43 = vpop.f32.mrb[5].mxu0 }
 0x3e9   : > { %v1062_v44 = vpop.f32.mrb[6].mxu0 }
 0x3ea   : > { %v4205_v45 = vpack.c.bf16 %v1066_v42, %v1066_v42  ;;  %v4365_v46 = vpop.f32.mrb[7].mxu0 }
 0x3ec   : > { %1071 = vrot.lane.b32.xlu0 %v4205_v45, %s5734_s8  ;;  %s5738_s8 = smov 16  }
 0x404   : > { %v1180_v50 = vpop.f32.mrb[8].mxu0 }
 0x405   : > { %v1187_v52 = vmul.f32 %v4743_v49, %v1180_v50  ;;  %v4376_v53 = vpop.f32.mrb[9].mxu0 }
 0x406   : > { %v1183_v54 = vpop.f32.mrb[10].mxu0 }
 0x407   : > { %v4206_v55 = vpack.c.bf16 %v1187_v52, %v1187_v52  ;;  %v4377_v56 = vpop.f32.mrb[11].mxu0 }
 0x409   : > { %1192 = vrot.lane.b32.xlu1 %v4206_v55, %s5738_s8 }
 0x40d   : > { %v1301_v59 = vpop.f32.mrb[12].mxu0 }
 0x40e   : > { %v1308_v60 = vmul.f32 %v4745_v58, %v1301_v59  ;;  %v4388_v61 = vpop.f32.mrb[13].mxu0 }
 0x40f   : > { %v1304_v62 = vpop.f32.mrb[14].mxu0 }
 0x410   : > { %v4207_v63 = vpack.c.bf16 %v1308_v60, %v1308_v60  ;;  %v4389_v0 = vpop.f32.mrb[15].mxu0 }
 0x412   : > { %1313 = vrot.lane.b32.xlu1 %v4207_v63, %s5736_s28  ;;  %v1547_v63 = vstv %s757_s9  ;;  %s5779_s9 = smov 16   ;;  %s5782_s28 = smov 80  }
 0x413   : > { %vm1548_vm11 = vcmp.ge.s32.totalorder %v5096_v28, %v1547_v63 }
 0x414   : > { %v5249_v0 = vsel %vm1548_vm11, -1e+30, %v4852_v1 }
 0x45e   : > { %v1072_v2 = vpop.permute.xlu0 %1071 }
 0x45f   : > { %1075 = vst.msk [vmem:[#allocation2] sm:$0xf] %vm1074_vm8, %v1072_v2 }
 0x47b   : > { %v1193_v3 = vpop.permute.xlu1 %1192 }
 0x47c   : > { %1196 = vst.msk [vmem:[#allocation2] sm:$0xf] %vm1195_vm9, %v1193_v3 }
 0x484   : > { %v1314_v4 = vpop.permute.xlu1 %1313 }
 0x485   : > { %1317 = vst.msk [vmem:[#allocation2] sm:$0xf] %vm1316_vm10, %v1314_v4 }
 0x48c   : > { %v1318_v6 = vld [vmem:[#allocation2] sm:$0xf] }
 0x48d   : > { %4395 = vmatmul.mubr.msk.bf16.vlgmr.msra.gmra.mrb[20].mxu1 %vm785_vm1, %v1318_v6 }
 0x48e   : > { %4410 = vmatprep.mubr.msk.bf16.mxu1 %vm4853_vm0, %v4852_v1 }
 0x560   : > { %v1379_v9 = vpop.f32.mrb[20].mxu1 }
 0x561   : > { %v1380_v10 = vadd.f32 %v4075_v7, %v1379_v9  ;;  %v4396_v11 = vpop.f32.mrb[21].mxu1 }
 0x562   : > { %v1382_v12 = vpop.f32.mrb[22].mxu1 }
 0x563   : > { %v4397_v13 = vpop.f32.mrb[23].mxu1  ;;  %v1385_v14 = vadd.f32 %v1380_v10, %v761_v8 }
 0x565   : > { %v1386_v15 = vsel %vm785_vm1, %v1385_v14, 0.0 }
 0x566   : > { %1387 = vadd.xlane.f32.xlu0 %v1386_v15 }
 0x57c   : > { %1494 = vrot.lane.b32.xlu0 %v4697_v16, %s4855_s4 }
 0x580   : > { %1500 = vrot.lane.b32.xlu0 %v5171_v23, %s4855_s4 }
 0x5f3   : > { %v1388_v17 = vpop.xlane.xlu0 %1387 }
 0x5f4   : > { %v1390_v18 = vmul.f32 0.03125, %v1388_v17 }
 0x5f6   : > { %v1391_v19 = vsub.f32 %v1385_v14, %v1390_v18 }
 0x5f7   : > { %v1495_v22 = vpop.permute.xlu0 %1494 }
 0x5f8   : > { %v1392_v20 = vmul.f32 %v1391_v19, %v1391_v19  ;;  %4407 = vmatpush3.bf16.msra.mxu1 %v1495_v22 }
 0x5f9   : > { %4408 = vmatprep.subr.bf16.mxu1 %v4852_v1 }
 0x5fa   : > { %v1393_v21 = vsel %vm785_vm1, %v1392_v20, 0.0 }
 0x5fb   : > { %1394 = vadd.xlane.f32.xlu1 %v1393_v21  ;;  %v1501_v39 = vpop.permute.xlu0 %1500 }
 0x60c   : > { %1496 = vrot.lane.b32.xlu1 %v4698_v5, %s4855_s4 }
 0x688   : > { %v1395_v24 = vpop.xlane.xlu1 %1394 }
 0x689   : > { %v1396_v25 = vmul.f32 0.03125, %v1395_v24 }
 0x68b   : > { %v1397_v26 = vadd.f32 1e-05, %v1396_v25 }
 0x68c   : > { %v1497_v29 = vpop.permute.xlu1 %1496 }
 0x68d   : > { %4746 = vrsqrt.f32 %v1397_v26  ;;  %4409 = vmatpush3.bf16.msra.mxu1 %v1497_v29 }
 0x68e   : > { %4420 = vmatprep.subr.bf16.mxu1 %v4852_v1 }
 0x690   : > { %4411 = vmatmul.mubr.msk.bf16.vlgmr.msra.gmra.mrb[24].mxu1 %vm785_vm1, %v4699_v30 }
 0x691   : > { %4422 = vmatprep.mubr.msk.bf16.mxu1 %vm4853_vm0, %v4852_v1 }
 0x697   : > { %v4747_v31 = vpop.eup %4746 }
 0x698   : > { %v1399_v33 = vmul.f32 %v4747_v31, %v1391_v19 }
 0x69a   : > { %v1407_v35 = vmul.f32 %v4079_v32, %v1399_v33 }
 0x69c   : > { %v1415_v36 = vadd.f32 %v4080_v34, %v1407_v35 }
 0x69e   : > { %v5188_v37 = vsel %vm5092_vm3, 0.0, %v1415_v36 }
 0x69f   : > { %v5192_v38 = vpack.c.bf16 %v5188_v37, %v5188_v37 }
 0x6a1   : > { %4403 = vmatmul.mubr.msk.bf16.vlgmr.msra.gmra.mrb[16].mxu0 %vm785_vm1, %v5192_v38 }
 0x6a2   : > { %4416 = vmatprep.mubr.msk.bf16.mxu0 %vm4853_vm0, %v4852_v1 }
 0x763   : > { %v1540_v40 = vpop.f32.mrb[24].mxu1 }
 0x764   : > { %v4412_v41 = vpop.f32.mrb[25].mxu1  ;;  %v1541_v42 = vadd.f32 %v1540_v40, %v1501_v39 }
 0x765   : > { %v1543_v43 = vpop.f32.mrb[26].mxu1 }
 0x766   : > { %v1544_v44 = vadd.f32 %v1543_v43, %v1501_v39  ;;  %v4413_v45 = vpop.f32.mrb[27].mxu1 }
 0x768   : > { %v5198_v46 = vpack.c.bf16 %v1544_v44, %v1541_v42 }
 0x76a   : > { %1668 = vrot.lane.b32.xlu1 %v5198_v46, %s5748_s7  ;;  %v1556_v47 = vsel %vm842_vm2, %v5198_v46, 0 }
 0x76b   : > { %4415 = vmatpush3.bf16.xpose.msra.mxu0 %v1556_v47 }
 0x76c   : > { %4426 = vmatprep.subr.bf16.mxu0 %v4852_v1 }
 0x76e   : > { %1788 = vrot.lane.b32.xlu1 %v5198_v46, %s5749_s27 }
 0x772   : > { %1908 = vrot.lane.b32.xlu1 %v5198_v46, %s5746_s5 }
 0x774   : > { %v1481_v48 = vpop.f32.mrb[16].mxu0 }
 0x775   : > { %v1482_v49 = vadd.f32 %v5171_v23, %v1481_v48  ;;  %v4404_v50 = vpop.f32.mrb[17].mxu0 }
 0x776   : > { %v1484_v51 = vpop.f32.mrb[18].mxu0 }
 0x777   : > { %v5210_v52 = vpack.c.bf16 %v1482_v49, %v1482_v49  ;;  %v4405_v53 = vpop.f32.mrb[19].mxu0 }
 0x779   : > { %1666 = vrot.lane.b32.xlu0 %v5210_v52, %s5748_s7  ;;  %4417 = vmatmul.mubr.msk.bf16.vlgmr.msra.gmra.mrb[20].mxu0 %vm842_vm2, %v5210_v52 }
 0x77a   : > { %4428 = vmatprep.mubr.msk.bf16.mxu0 %vm4853_vm0, %v4852_v1 }
 0x77d   : > { %1786 = vrot.lane.b32.xlu0 %v5210_v52, %s5749_s27 }
 0x781   : > { %1906 = vrot.lane.b32.xlu0 %v5210_v52, %s5746_s5  ;;  %s5781_s5 = smov 104  }
 0x7dc   : > { %v1669_v54 = vpop.permute.xlu1 %1668 }
 0x7dd   : > { %v1674_v55 = vsel %vm842_vm2, %v1669_v54, 0 }
 0x7de   : > { %4427 = vmatpush3.bf16.xpose.msra.mxu0 %v1674_v55 }
 0x7df   : > { %4438 = vmatprep.subr.bf16.mxu0 %v4852_v1 }
 0x7e0   : > { %v1789_v56 = vpop.permute.xlu1 %1788 }
 0x7e1   : > { %v1794_v58 = vsel %vm842_vm2, %v1789_v56, 0 }
 0x7e4   : > { %v1909_v59 = vpop.permute.xlu1 %1908 }
 0x7e5   : > { %v1914_v61 = vsel %vm842_vm2, %v1909_v59, 0 }
 0x7eb   : > { %v5224_v57 = vpop.permute.xlu0 %1666 }
 0x7ec   : > { %4429 = vmatmul.mubr.msk.bf16.vlgmr.msra.gmra.mrb[24].mxu0 %vm842_vm2, %v5224_v57 }
 0x7ed   : > { %4439 = vmatpush3.bf16.xpose.msra.mxu0 %v1794_v58  ;;  %4440 = vmatprep.mubr.msk.bf16.mxu0 %vm4853_vm0, %v4852_v1 }
 0x7ee   : > { %4450 = vmatprep.subr.bf16.mxu0 %v4852_v1 }
 0x7ef   : > { %v5232_v60 = vpop.permute.xlu0 %1786 }
 0x7f3   : > { %v5240_v62 = vpop.permute.xlu0 %1906 }
 0x7f4   : > { %4441 = vmatmul.mubr.msk.bf16.vlgmr.msra.gmra.mrb[28].mxu0 %vm842_vm2, %v5232_v60 }
 0x7f5   : > { %4451 = vmatpush3.bf16.xpose.msra.mxu0 %v1914_v61  ;;  %4452 = vmatprep.mubr.msk.bf16.mxu0 %vm4853_vm0, %v4852_v1 }
 0x7f6   : > { %4462 = vmatprep.subr.bf16.mxu0 %v4852_v1 }
 0x7fc   : > { %4453 = vmatmul.mubr.msk.bf16.vlgmr.msra.gmra.mrb[32].mxu0 %vm842_vm2, %v5240_v62 }
 0x7fd   : > { %4466 = vmatprep.mubr.msk.bf16.mxu0 %vm4853_vm0, %v4852_v1 }
 0x84c   : > { %v1592_v2 = vpop.f32.mrb[20].mxu0 }
 0x84d   : > { %v1598_v3 = vmul.f32 0.35355338, %v1592_v2  ;;  %v4418_v4 = vpop.f32.mrb[21].mxu0 }
 0x84e   : > { %v1595_v6 = vpop.f32.mrb[22].mxu0 }
 0x84f   : > { %v4419_v7 = vpop.f32.mrb[23].mxu0  ;;  %v1599_v8 = vadd.f32 %v1598_v3, %v5249_v0 }
 0x851   : > { %v1601_v9 = vsel %vm1600_vm12, %v1599_v8, -inf }
 0x852   : > { %1602 = vmax.xlane.f32.xlu1 %v1601_v9 }
 0x863   : > { %1728 = vrot.lane.b32.xlu1 %v5198_v46, %s5742_s2  ;;  %s5785_s2 = smov 120  }
 0x8bf   : > { %v1710_v10 = vpop.f32.mrb[24].mxu0 }
 0x8c0   : > { %v1716_v11 = vmul.f32 0.35355338, %v1710_v10  ;;  %v4430_v28 = vpop.f32.mrb[25].mxu0 }
 0x8c1   : > { %v1713_v12 = vpop.f32.mrb[26].mxu0 }
 0x8c2   : > { %v4431_v13 = vpop.f32.mrb[27].mxu0  ;;  %v1717_v14 = vadd.f32 %v1716_v11, %v5249_v0 }
 0x8c4   : > { %v1718_v15 = vsel %vm1600_vm12, %v1717_v14, -inf }
 0x8c5   : > { %1719 = vmax.xlane.f32.xlu0 %v1718_v15 }
 0x8c7   : > { %v1830_v16 = vpop.f32.mrb[28].mxu0 }
 0x8c8   : > { %v1836_v5 = vmul.f32 0.35355338, %v1830_v16  ;;  %v4442_v17 = vpop.f32.mrb[29].mxu0 }
 0x8c9   : > { %v1833_v18 = vpop.f32.mrb[30].mxu0 }
 0x8ca   : > { %v4443_v19 = vpop.f32.mrb[31].mxu0  ;;  %v1837_v20 = vadd.f32 %v1836_v5, %v5249_v0 }
 0x8cc   : > { %v1838_v21 = vsel %vm1600_vm12, %v1837_v20, -inf }
 0x8cd   : > { %1839 = vmax.xlane.f32.xlu0 %v1838_v21 }
 0x8cf   : > { %v1950_v22 = vpop.f32.mrb[32].mxu0 }
 0x8d0   : > { %v1956_v24 = vmul.f32 0.35355338, %v1950_v22  ;;  %v4454_v25 = vpop.f32.mrb[33].mxu0 }
 0x8d1   : > { %v1953_v26 = vpop.f32.mrb[34].mxu0 }
 0x8d2   : > { %v4455_v29 = vpop.f32.mrb[35].mxu0  ;;  %v1957_v30 = vadd.f32 %v1956_v24, %v5249_v0 }
 0x8d4   : > { %v1958_v31 = vsel %vm1600_vm12, %v1957_v30, -inf }
 0x8d5   : > { %1959 = vmax.xlane.f32.xlu1 %v1958_v31 }
 0x8df   : > { %v1603_v32 = vpop.xlane.xlu1 %1602 }
 0x8e0   : > { %v1604_v33 = vsub.f32 %v1599_v8, %v1603_v32 }
 0x8e2   : > { %v1605_v34 = vmul.f32 1.442695, %v1604_v33 }
 0x8e3   : > { %1612 = vrot.lane.b32.xlu0 %v5198_v46, %s4855_s4  ;;  %v1729_v44 = vpop.permute.xlu1 %1728 }
 0x8e4   : > { %4748 = vpow2.f32 %v1605_v34  ;;  %v1734_v51 = vsel %vm1617_vm13, %v1729_v44, 0  ;;  %v4701_v34 = vld [vmem:[%s5717_s13 + $0x8] sm:$0xff]  }
 0x8e6   : > { %1848 = vrot.lane.b32.xlu1 %v5198_v46, %s5744_s26 }
 0x8e7   : > { %1968 = vrot.lane.b32.xlu0 %v5198_v46, %s5777_s20 }
 0x8ee   : > { %v4749_v43 = vpop.eup %4748 }
 0x8ef   : > { %v1610_v48 = vpack.c.bf16 %v4749_v43, %v4749_v43  ;;  %v1607_v55 = vsel %vm1600_vm12, %v4749_v43, 0.0 }
 0x952   : > { %v1720_v35 = vpop.xlane.xlu0 %1719 }
 0x953   : > { %v1721_v36 = vsub.f32 %v1717_v14, %v1720_v35 }
 0x955   : > { %v1722_v39 = vmul.f32 1.442695, %v1721_v36 }
 0x957   : > { %4750 = vpow2.f32 %v1722_v39 }
 0x95a   : > { %v1840_v40 = vpop.xlane.xlu0 %1839 }
 0x95b   : > { %v1841_v41 = vsub.f32 %v1837_v20, %v1840_v40 }
 0x95d   : > { %v1842_v42 = vmul.f32 1.442695, %v1841_v41 }
 0x95e   : > { %v1613_v45 = vpop.permute.xlu0 %1612 }
 0x95f   : > { %4752 = vpow2.f32 %v1842_v42  ;;  %v1619_v47 = vsel %vm1617_vm13, %v1613_v45, 0 }
 0x960   : > { %4421 = vmatpush3.bf16.msra.mxu1 %v1619_v47 }
 0x961   : > { %v4751_v46 = vpop.eup %4750  ;;  %4432 = vmatprep.subr.bf16.mxu1 %v4852_v1 }
 0x962   : > { %v1960_v49 = vpop.xlane.xlu1 %1959  ;;  %v1724_v50 = vsel %vm1600_vm12, %v4751_v46, 0.0  ;;  %v1727_v59 = vpack.c.bf16 %v4751_v46, %v4751_v46  ;;  %v1969_v2 = vpop.permute.xlu0 %1968 }
 0x963   : > { %v1961_v53 = vsub.f32 %v1957_v30, %v1960_v49  ;;  %1725 = vadd.xlane.f32.xlu1 %v1724_v50  ;;  %4423 = vmatmul.mubr.msk.bf16.vlgmr.msra.gmra.mrb[28].mxu1 %vm1600_vm12, %v1610_v48  ;;  %v1974_v7 = vsel %vm1617_vm13, %v1969_v2, 0  ;;  %v4700_v30 = vld [vmem:[%s5717_s13] sm:$0xff]  }
 0x964   : > { %4433 = vmatpush3.bf16.msra.mxu1 %v1734_v51  ;;  %4434 = vmatprep.mubr.msk.bf16.mxu1 %vm4853_vm0, %v4852_v1  ;;  %v4702_v49 = vld [vmem:[%s5721_s17] sm:$0xff]   ;;  %v4703_v51 = vld [vmem:[%s5721_s17 + $0x8] sm:$0xff]  }
 0x965   : > { %v1962_v54 = vmul.f32 1.442695, %v1961_v53  ;;  %4444 = vmatprep.subr.bf16.mxu1 %v4852_v1  ;;  %4463 = vmatpush3.bf16.msra.mxu0 %v4700_v30  ;;  %v5324_v53 = vld [vmem:[%s5718_s14] ss:$0 sm:$0xff] }
 0x966   : > { %v1849_v56 = vpop.permute.xlu1 %1848  ;;  %4464 = vmatprep.subr.bf16.mxu0 %v4852_v1 }
 0x967   : > { %4754 = vpow2.f32 %v1962_v54  ;;  %1608 = vadd.xlane.f32.xlu1 %v1607_v55  ;;  %v1854_v63 = vsel %vm1617_vm13, %v1849_v56, 0 }
 0x969   : > { %v4753_v58 = vpop.eup %4752  ;;  %4465 = vmatpush3.bf16.msra.mxu0 %v4701_v34 }
 0x96a   : > { %v1844_v61 = vsel %vm1600_vm12, %v4753_v58, 0.0  ;;  %v1847_v4 = vpack.c.bf16 %v4753_v58, %v4753_v58  ;;  %4478 = vmatprep.subr.bf16.mxu0 %v4852_v1 }
 0x96b   : > { %1845 = vadd.xlane.f32.xlu0 %v1844_v61  ;;  %4435 = vmatmul.mubr.msk.bf16.vlgmr.msra.gmra.mrb[32].mxu1 %vm1600_vm12, %v1727_v59 }
 0x96c   : > { %4445 = vmatpush3.bf16.msra.mxu1 %v1854_v63  ;;  %4446 = vmatprep.mubr.msk.bf16.mxu1 %vm4853_vm0, %v4852_v1 }
 0x96d   : > { %4456 = vmatprep.subr.bf16.mxu1 %v4852_v1 }
 0x971   : > { %v4755_v3 = vpop.eup %4754 }
 0x972   : > { %v1964_v6 = vsel %vm1600_vm12, %v4755_v3, 0.0  ;;  %v1967_v8 = vpack.c.bf16 %v4755_v3, %v4755_v3 }
 0x973   : > { %1965 = vadd.xlane.f32.xlu0 %v1964_v6  ;;  %4447 = vmatmul.mubr.msk.bf16.vlgmr.msra.gmra.mrb[36].mxu1 %vm1600_vm12, %v1847_v4 }
 0x974   : > { %4457 = vmatpush3.bf16.msra.mxu1 %v1974_v7  ;;  %4458 = vmatprep.mubr.msk.bf16.mxu1 %vm4853_vm0, %v4852_v1  ;;  %v4704_v7 = vld [vmem:[%s5715_s11] sm:$0xff]  }
 0x975   : > { %4470 = vmatprep.subr.bf16.mxu1 %v4852_v1 }
 0x97b   : > { %4459 = vmatmul.mubr.msk.bf16.vlgmr.msra.gmra.mrb[40].mxu1 %vm1600_vm12, %v1967_v8 }
 0x97c   : > { %4474 = vmatprep.mubr.msk.bf16.mxu1 %vm4853_vm0, %v4852_v1 }
 0x9f0   : > { %v1726_v9 = vpop.xlane.xlu1 %1725 }
 0x9f4   : > { %v1609_v10 = vpop.xlane.xlu1 %1608 }
 0x9f5   : > { %4756 = vrcp.f32 %v1609_v10 }
 0x9f6   : > { %4758 = vrcp.f32 %v1726_v9 }
 0x9f8   : > { %v1846_v15 = vpop.xlane.xlu0 %1845 }
 0x9f9   : > { %4760 = vrcp.f32 %v1846_v15 }
 0x9ff   : > { %v4757_v11 = vpop.eup %4756 }
 0xa00   : > { %v4759_v17 = vpop.eup %4758  ;;  %v1966_v22 = vpop.xlane.xlu0 %1965 }
 0xa01   : > { %4762 = vrcp.f32 %v1966_v22 }
 0xa03   : > { %v4761_v26 = vpop.eup %4760 }
 0xa0b   : > { %v4763_v39 = vpop.eup %4762 }
 0xa36   : > { %v1655_v28 = vpop.f32.mrb[28].mxu1 }
 0xa37   : > { %v1662_v12 = vmul.f32 %v4757_v11, %v1655_v28  ;;  %v4424_v13 = vpop.f32.mrb[29].mxu1 }
 0xa38   : > { %v1658_v14 = vpop.f32.mrb[30].mxu1  ;;  %v4706_v13 = vld [vmem:[%s5721_s17 + $0x10] sm:$0xff]  }
 0xa39   : > { %v1663_v16 = vpack.c.bf16 %v1662_v12, %v1662_v12  ;;  %v4425_v5 = vpop.f32.mrb[31].mxu1  ;;  %v4705_v12 = vld [vmem:[%s5715_s11 + $0x8] sm:$0xff]   ;;  %4471 = vmatpush3.bf16.msra.mxu1 %v4706_v13 }
 0xa3a   : > { %4472 = vmatprep.subr.bf16.mxu1 %v4852_v1 }
 0xa3b   : > { %1664 = vst.msk [vmem:[#allocation2] sm:$0xf] %vm953_vm7, %v1663_v16 }
 0xa3e   : > { %v1770_v18 = vpop.f32.mrb[32].mxu1 }
 0xa3f   : > { %v1777_v19 = vmul.f32 %v4759_v17, %v1770_v18  ;;  %v4436_v20 = vpop.f32.mrb[33].mxu1  ;;  %v5351_v17 = vld [vmem:[%s5719_s15] ss:$0 sm:$0xff] }
 0xa40   : > { %v1773_v21 = vpop.f32.mrb[34].mxu1 }
 0xa41   : > { %v4208_v24 = vpack.c.bf16 %v1777_v19, %v1777_v19  ;;  %v4437_v25 = vpop.f32.mrb[35].mxu1  ;;  %v5356_v19 = vld [vmem:[%s5720_s16] ss:$0 sm:$0xff] }
 0xa43   : > { %1782 = vrot.lane.b32.xlu0 %v4208_v24, %s5778_s30 }
 0xa46   : > { %v1890_v29 = vpop.f32.mrb[36].mxu1 }
 0xa47   : > { %v1897_v31 = vmul.f32 %v4761_v26, %v1890_v29  ;;  %v4448_v32 = vpop.f32.mrb[37].mxu1  ;;  %v4708_v29 = vld [vmem:[%s5043_s10 + $0x8] sm:$0x1f]  }
 0xa48   : > { %v1893_v33 = vpop.f32.mrb[38].mxu1 }
 0xa49   : > { %v4209_v35 = vpack.c.bf16 %v1897_v31, %v1897_v31  ;;  %v4449_v36 = vpop.f32.mrb[39].mxu1 }
 0xa4b   : > { %1902 = vrot.lane.b32.xlu1 %v4209_v35, %s5779_s9 }
 0xa4e   : > { %v2010_v40 = vpop.f32.mrb[40].mxu1 }
 0xa4f   : > { %v2017_v41 = vmul.f32 %v4763_v39, %v2010_v40  ;;  %v4460_v42 = vpop.f32.mrb[41].mxu1 }
 0xa50   : > { %v2013_v43 = vpop.f32.mrb[42].mxu1 }
 0xa51   : > { %v4210_v44 = vpack.c.bf16 %v2017_v41, %v2017_v41  ;;  %v4461_v45 = vpop.f32.mrb[43].mxu1 }
 0xa53   : > { %2022 = vrot.lane.b32.xlu1 %v4210_v44, %s5780_s6 }
 0xab5   : > { %v1783_v47 = vpop.permute.xlu0 %1782 }
 0xab6   : > { %1785 = vst.msk [vmem:[#allocation2] sm:$0xf] %vm1074_vm8, %v1783_v47 }
 0xabd   : > { %v1903_v46 = vpop.permute.xlu1 %1902 }
 0xabe   : > { %1905 = vst.msk [vmem:[#allocation2] sm:$0xf] %vm1195_vm9, %v1903_v46 }
 0xac5   : > { %v2023_v48 = vpop.permute.xlu1 %2022 }
 0xac6   : > { %2025 = vst.msk [vmem:[#allocation2] sm:$0xf] %vm1316_vm10, %v2023_v48 }
 0xacd   : > { %v2026_v50 = vld [vmem:[#allocation2] sm:$0xf] }
 0xace   : > { %4467 = vmatmul.mubr.msk.bf16.vlgmr.msra.gmra.mrb[36].mxu0 %vm785_vm1, %v2026_v50 }
 0xacf   : > { %4479 = vmatpush3.bf16.msra.mxu0 %v4702_v49  ;;  %4482 = vmatprep.mubr.msk.bf16.mxu0 %vm4853_vm0, %v4852_v1 }
 0xad0   : > { %4480 = vmatprep.subr.bf16.mxu0 %v4852_v1 }
 0xad3   : > { %4481 = vmatpush3.bf16.msra.mxu0 %v4703_v51 }
 0xad4   : > { %4494 = vmatprep.subr.bf16.mxu0 %v4852_v1 }
 0xad6   : > { %4483 = vmatmul.mubr.msk.bf16.vlgmr.msra.gmra.mrb[40].mxu0 %vm785_vm1, %v5192_v38 }
 0xad7   : > { %4496 = vmatprep.mubr.msk.bf16.mxu0 %vm4853_vm0, %v4852_v1 }
 0xba1   : > { %v2087_v54 = vpop.f32.mrb[36].mxu0 }
 0xba2   : > { %v2088_v55 = vadd.f32 %v5324_v53, %v2087_v54  ;;  %v4468_v56 = vpop.f32.mrb[37].mxu0 }
 0xba3   : > { %v2090_v58 = vpop.f32.mrb[38].mxu0 }
 0xba4   : > { %v4469_v59 = vpop.f32.mrb[39].mxu0  ;;  %v2093_v61 = vadd.f32 %v2088_v55, %v5188_v37 }
 0xba6   : > { %v2094_v63 = vsel %vm785_vm1, %v2093_v61, 0.0 }
 0xba7   : > { %2095 = vadd.xlane.f32.xlu0 %v2094_v63 }
 0xba9   : > { %v2234_v2 = vpop.f32.mrb[40].mxu0 }
 0xbaa   : > { %v4484_v3 = vpop.f32.mrb[41].mxu0 }
 0xbab   : > { %v2237_v4 = vpop.f32.mrb[42].mxu0 }
 0xbac   : > { %v4485_v6 = vpop.f32.mrb[43].mxu0 }
 0xbbd   : > { %2283 = vrot.lane.b32.xlu0 %v4704_v7, %s4855_s4 }
 0xbc1   : > { %2289 = vrot.lane.b32.xlu0 %v5171_v23, %s4855_s4  ;;  %v4707_v23 = vld [vmem:[%s5721_s17 + $0x18] sm:$0xff]  }
 0xbc2   : > { %4473 = vmatpush3.bf16.msra.mxu1 %v4707_v23 }
 0xbc3   : > { %4486 = vmatprep.subr.bf16.mxu1 %v4852_v1 }
 0xc34   : > { %v2096_v8 = vpop.xlane.xlu0 %2095 }
 0xc35   : > { %v2097_v9 = vmul.f32 0.03125, %v2096_v8 }
 0xc37   : > { %v2098_v10 = vsub.f32 %v2093_v61, %v2097_v9 }
 0xc38   : > { %v2284_v25 = vpop.permute.xlu0 %2283 }
 0xc39   : > { %v2099_v11 = vmul.f32 %v2098_v10, %v2098_v10 }
 0xc3b   : > { %v2100_v28 = vsel %vm785_vm1, %v2099_v11, 0.0 }
 0xc3c   : > { %2101 = vadd.xlane.f32.xlu1 %v2100_v28  ;;  %v2290_v36 = vpop.permute.xlu0 %2289 }
 0xc4d   : > { %2285 = vrot.lane.b32.xlu1 %v4705_v12, %s4855_s4 }
 0xcc9   : > { %v2102_v14 = vpop.xlane.xlu1 %2101 }
 0xcca   : > { %v2103_v15 = vmul.f32 0.03125, %v2102_v14 }
 0xccc   : > { %v2104_v16 = vadd.f32 1e-05, %v2103_v15 }
 0xccd   : > { %v2286_v26 = vpop.permute.xlu1 %2285 }
 0xcce   : > { %4764 = vrsqrt.f32 %v2104_v16 }
 0xcd8   : > { %v4765_v5 = vpop.eup %4764 }
 0xcd9   : > { %v2106_v18 = vmul.f32 %v4765_v5, %v2098_v10 }
 0xcdb   : > { %v2114_v20 = vmul.f32 %v5351_v17, %v2106_v18 }
 0xcdd   : > { %v2122_v21 = vadd.f32 %v5356_v19, %v2114_v20 }
 0xcdf   : > { %v5362_v22 = vsel %vm5092_vm3, 0.0, %v2122_v21 }
 0xce0   : > { %v2128_v24 = vpack.c.bf16 %v5362_v22, %v5362_v22 }
 0xce2   : > { %4475 = vmatmul.mubr.msk.bf16.vlgmr.msra.gmra.mrb[44].mxu1 %vm785_vm1, %v2128_v24 }
 0xce3   : > { %4487 = vmatpush3.bf16.msra.mxu1 %v2284_v25  ;;  %4490 = vmatprep.mubr.msk.bf16.mxu1 %vm4853_vm0, %v4852_v1 }
 0xce4   : > { %4488 = vmatprep.subr.bf16.mxu1 %v4852_v1 }
 0xce7   : > { %4489 = vmatpush3.bf16.msra.mxu1 %v2286_v26 }
 0xce8   : > { %4500 = vmatprep.subr.bf16.mxu1 %v4852_v1 }
 0xcea   : > { %4491 = vmatmul.mubr.msk.bf16.vlgmr.msra.gmra.mrb[48].mxu1 %vm785_vm1, %v4708_v29 }
 0xceb   : > { %4502 = vmatprep.mubr.msk.bf16.mxu1 %vm4853_vm0, %v4852_v1 }
 0xdb5   : > { %v2182_v30 = vpop.f32.mrb[44].mxu1 }
 0xdb6   : > { %v5375_v31 = vadd.f32 %v2234_v2, %v2182_v30  ;;  %v4476_v32 = vpop.f32.mrb[45].mxu1 }
 0xdb7   : > { %v2185_v33 = vpop.f32.mrb[46].mxu1 }
 0xdb8   : > { %v4477_v34 = vpop.f32.mrb[47].mxu1 }
 0xdbd   : > { %v2329_v35 = vpop.f32.mrb[48].mxu1 }
 0xdbe   : > { %v4492_v39 = vpop.f32.mrb[49].mxu1  ;;  %v2330_v41 = vadd.f32 %v2329_v35, %v2290_v36 }
 0xdbf   : > { %v2332_v40 = vpop.f32.mrb[50].mxu1 }
 0xdc0   : > { %v2333_v42 = vadd.f32 %v2332_v40, %v2290_v36  ;;  %v4493_v43 = vpop.f32.mrb[51].mxu1 }
 0xdc2   : > { %v5377_v44 = vpack.c.bf16 %v2333_v42, %v2330_v41 }
 0xdc4   : > { %2560 = vrot.lane.b32.xlu0 %v5377_v44, %s5749_s27  ;;  %2445 = vrot.lane.b32.xlu1 %v5377_v44, %s5748_s7  ;;  %v2338_v45 = vsel %vm842_vm2, %v5377_v44, 0  ;;  %s5787_s7 = sld [smem:[#allocation19_spill]] }
 0xdc5   : > { %4495 = vmatpush3.bf16.xpose.msra.mxu0 %v2338_v45 }
 0xdc6   : > { %4506 = vmatprep.subr.bf16.mxu0 %v4852_v1 }
 0xdc8   : > { %2675 = vrot.lane.b32.xlu1 %v5377_v44, %s5781_s5 }
 0xdca   : > { %s754_s8 = scalar_lea.vmem %s5787_s7, %s5029_s3 }
 0xdcc   : > { %2393 = vrot.lane.b32.xlu1 %v5377_v44, %s4855_s4  ;;  %4497 = vmatmul.mubr.msk.bf16.vlgmr.msra.gmra.mrb[44].mxu0 %vm842_vm2, %v5210_v52 }
 0xdcd   : > { %4508 = vmatprep.mubr.msk.bf16.mxu0 %vm4853_vm0, %v4852_v1 }
 0xe36   : > { %v2446_v47 = vpop.permute.xlu1 %2445  ;;  %v2561_v49 = vpop.permute.xlu0 %2560 }
 0xe37   : > { %v2448_v46 = vsel %vm842_vm2, %v2446_v47, 0  ;;  %v2563_v51 = vsel %vm842_vm2, %v2561_v49, 0 }
 0xe38   : > { %4507 = vmatpush3.bf16.xpose.msra.mxu0 %v2448_v46 }
 0xe39   : > { %4518 = vmatprep.subr.bf16.mxu0 %v4852_v1 }
 0xe3a   : > { %v2676_v48 = vpop.permute.xlu1 %2675 }
 0xe3b   : > { %v2678_v55 = vsel %vm842_vm2, %v2676_v48, 0 }
 0xe3e   : > { %v2394_v50 = vpop.permute.xlu1 %2393 }
 0xe3f   : > { %v2399_v54 = vsel %vm1617_vm13, %v2394_v50, 0  ;;  %4509 = vmatmul.mubr.msk.bf16.vlgmr.msra.gmra.mrb[48].mxu0 %vm842_vm2, %v5224_v57 }
 0xe40   : > { %4501 = vmatpush3.bf16.msra.mxu1 %v2399_v54  ;;  %4519 = vmatpush3.bf16.xpose.msra.mxu0 %v2563_v51 }
 0xe41   : > { %4520 = vmatprep.mubr.msk.bf16.mxu0 %vm4853_vm0, %v4852_v1  ;;  %4530 = vmatprep.subr.bf16.mxu0 %v4852_v1 }
 0xe42   : > { %4512 = vmatprep.subr.bf16.mxu1 %v4852_v1 }
 0xe47   : > { %4521 = vmatmul.mubr.msk.bf16.vlgmr.msra.gmra.mrb[52].mxu0 %vm842_vm2, %v5232_v60 }
 0xe48   : > { %4531 = vmatpush3.bf16.xpose.msra.mxu0 %v2678_v55  ;;  %4532 = vmatprep.mubr.msk.bf16.mxu0 %vm4853_vm0, %v4852_v1 }
 0xe49   : > { %4542 = vmatprep.subr.bf16.mxu0 %v4852_v1 }
 0xe4f   : > { %4533 = vmatmul.mubr.msk.bf16.vlgmr.msra.gmra.mrb[56].mxu0 %vm842_vm2, %v5240_v62 }
 0xe50   : > { %4546 = vmatprep.mubr.msk.bf16.mxu0 %vm4853_vm0, %v4852_v1 }
 0xe9f   : > { %v2374_v56 = vpop.f32.mrb[44].mxu0 }
 0xea0   : > { %v2380_v58 = vmul.f32 0.35355338, %v2374_v56  ;;  %v4498_v59 = vpop.f32.mrb[45].mxu0 }
 0xea1   : > { %v2377_v61 = vpop.f32.mrb[46].mxu0 }
 0xea2   : > { %v4499_v63 = vpop.f32.mrb[47].mxu0  ;;  %v2381_v2 = vadd.f32 %v2380_v58, %v5249_v0 }
 0xea4   : > { %v2382_v3 = vsel %vm1600_vm12, %v2381_v2, -inf }
 0xea5   : > { %2383 = vmax.xlane.f32.xlu0 %v2382_v3 }
 0xf12   : > { %v2484_v4 = vpop.f32.mrb[48].mxu0 }
 0xf13   : > { %v2490_v6 = vmul.f32 0.35355338, %v2484_v4  ;;  %v4510_v7 = vpop.f32.mrb[49].mxu0 }
 0xf14   : > { %v2487_v8 = vpop.f32.mrb[50].mxu0 }
 0xf15   : > { %v4511_v9 = vpop.f32.mrb[51].mxu0  ;;  %v2491_v10 = vadd.f32 %v2490_v6, %v5249_v0 }
 0xf17   : > { %v2492_v11 = vsel %vm1600_vm12, %v2491_v10, -inf }
 0xf18   : > { %2493 = vmax.xlane.f32.xlu1 %v2492_v11 }
 0xf1a   : > { %v2599_v28 = vpop.f32.mrb[52].mxu0 }
 0xf1b   : > { %v2605_v12 = vmul.f32 0.35355338, %v2599_v28  ;;  %v4522_v13 = vpop.f32.mrb[53].mxu0 }
 0xf1c   : > { %v2602_v23 = vpop.f32.mrb[54].mxu0 }
 0xf1d   : > { %v4523_v14 = vpop.f32.mrb[55].mxu0  ;;  %v2606_v15 = vadd.f32 %v2605_v12, %v5249_v0 }
 0xf1f   : > { %v2607_v16 = vsel %vm1600_vm12, %v2606_v15, -inf }
 0xf20   : > { %2608 = vmax.xlane.f32.xlu0 %v2607_v16 }
 0xf22   : > { %v2714_v5 = vpop.f32.mrb[56].mxu0 }
 0xf23   : > { %v2720_v18 = vmul.f32 0.35355338, %v2714_v5  ;;  %v4534_v20 = vpop.f32.mrb[57].mxu0 }
 0xf24   : > { %v2717_v21 = vpop.f32.mrb[58].mxu0 }
 0xf25   : > { %v4535_v24 = vpop.f32.mrb[59].mxu0  ;;  %v2721_v25 = vadd.f32 %v2720_v18, %v5249_v0 }
 0xf27   : > { %v2722_v26 = vsel %vm1600_vm12, %v2721_v25, -inf }
 0xf28   : > { %2723 = vmax.xlane.f32.xlu0 %v2722_v26 }
 0xf29   : > { %2617 = vrot.lane.b32.xlu1 %v5377_v44, %s5782_s28 }
 0xf2d   : > { %2732 = vrot.lane.b32.xlu1 %v5377_v44, %s5777_s20 }
 0xf32   : > { %v2384_v29 = vpop.xlane.xlu0 %2383 }
 0xf33   : > { %v2385_v30 = vsub.f32 %v2381_v2, %v2384_v29  ;;  %v4709_v29 = vld [vmem:[%s5717_s13] sm:$0xff]  }
 0xf34   : > { %4543 = vmatpush3.bf16.msra.mxu0 %v4709_v29 }
 0xf35   : > { %v2386_v32 = vmul.f32 1.442695, %v2385_v30  ;;  %4544 = vmatprep.subr.bf16.mxu0 %v4852_v1 }
 0xf37   : > { %4766 = vpow2.f32 %v2386_v32 }
 0xf3e   : > { %2502 = vrot.lane.b32.xlu0 %v5377_v44, %s5783_s29 }
 0xf41   : > { %v4767_v33 = vpop.eup %4766 }
 0xf42   : > { %v2391_v34 = vpack.c.bf16 %v4767_v33, %v4767_v33  ;;  %v2388_v3 = vsel %vm1600_vm12, %v4767_v33, 0.0 }
 0xf44   : > { %4503 = vmatmul.mubr.msk.bf16.vlgmr.msra.gmra.mrb[52].mxu1 %vm1600_vm12, %v2391_v34  ;;  %v4710_v34 = vld [vmem:[%s5717_s13 + $0x8] sm:$0xff]  }
 0xf45   : > { %4514 = vmatprep.mubr.msk.bf16.mxu1 %vm4853_vm0, %v4852_v1  ;;  %4545 = vmatpush3.bf16.msra.mxu0 %v4710_v34 }
 0xf46   : > { %4558 = vmatprep.subr.bf16.mxu0 %v4852_v1 }
 0xfa5   : > { %v2494_v35 = vpop.xlane.xlu1 %2493 }
 0xfa6   : > { %v2495_v36 = vsub.f32 %v2491_v10, %v2494_v35 }
 0xfa8   : > { %v2496_v39 = vmul.f32 1.442695, %v2495_v36 }
 0xfa9   : > { %v2618_v50 = vpop.permute.xlu1 %2617 }
 0xfaa   : > { %4768 = vpow2.f32 %v2496_v39  ;;  %v2623_v56 = vsel %vm1617_vm13, %v2618_v50, 0 }
 0xfad   : > { %v2609_v40 = vpop.xlane.xlu0 %2608  ;;  %v2733_v58 = vpop.permute.xlu1 %2732 }
 0xfae   : > { %v2610_v41 = vsub.f32 %v2606_v15, %v2609_v40  ;;  %v2738_v2 = vsel %vm1617_vm13, %v2733_v58, 0 }
 0xfb0   : > { %v2611_v42 = vmul.f32 1.442695, %v2610_v41 }
 0xfb2   : > { %4770 = vpow2.f32 %v2611_v42 }
 0xfb4   : > { %v4769_v43 = vpop.eup %4768 }
 0xfb5   : > { %v2724_v45 = vpop.xlane.xlu0 %2723  ;;  %v2498_v47 = vsel %vm1600_vm12, %v4769_v43, 0.0  ;;  %v2501_v54 = vpack.c.bf16 %v4769_v43, %v4769_v43 }
 0xfb6   : > { %v2725_v44 = vsub.f32 %v2721_v25, %v2724_v45  ;;  %2499 = vadd.xlane.f32.xlu0 %v2498_v47 }
 0xfb8   : > { %v2726_v46 = vmul.f32 1.442695, %v2725_v44 }
 0xfb9   : > { %v2503_v48 = vpop.permute.xlu0 %2502 }
 0xfba   : > { %4772 = vpow2.f32 %v2726_v46  ;;  %v2508_v49 = vsel %vm1617_vm13, %v2503_v48, 0 }
 0xfbb   : > { %4513 = vmatpush3.bf16.msra.mxu1 %v2508_v49  ;;  %v4711_v49 = vld [vmem:[%s5721_s17 + $0x20] sm:$0xff]  }
 0xfbc   : > { %v4771_v51 = vpop.eup %4770  ;;  %4524 = vmatprep.subr.bf16.mxu1 %v4852_v1 }
 0xfbd   : > { %v2613_v55 = vsel %vm1600_vm12, %v4771_v51, 0.0  ;;  %v2616_v61 = vpack.c.bf16 %v4771_v51, %v4771_v51  ;;  %v4712_v51 = vld [vmem:[%s5721_s17 + $0x28] sm:$0xff]  }
 0xfbe   : > { %2614 = vadd.xlane.f32.xlu1 %v2613_v55  ;;  %4515 = vmatmul.mubr.msk.bf16.vlgmr.msra.gmra.mrb[56].mxu1 %vm1600_vm12, %v2501_v54 }
 0xfbf   : > { %4525 = vmatpush3.bf16.msra.mxu1 %v2623_v56  ;;  %4526 = vmatprep.mubr.msk.bf16.mxu1 %vm4853_vm0, %v4852_v1 }
 0xfc0   : > { %4536 = vmatprep.subr.bf16.mxu1 %v4852_v1 }
 0xfc4   : > { %v4773_v59 = vpop.eup %4772 }
 0xfc5   : > { %v2728_v63 = vsel %vm1600_vm12, %v4773_v59, 0.0  ;;  %v2731_v4 = vpack.c.bf16 %v4773_v59, %v4773_v59 }
 0xfc6   : > { %2729 = vadd.xlane.f32.xlu0 %v2728_v63  ;;  %4527 = vmatmul.mubr.msk.bf16.vlgmr.msra.gmra.mrb[60].mxu1 %vm1600_vm12, %v2616_v61 }
 0xfc7   : > { %4537 = vmatpush3.bf16.msra.mxu1 %v2738_v2  ;;  %4538 = vmatprep.mubr.msk.bf16.mxu1 %vm4853_vm0, %v4852_v1 }
 0xfc8   : > { %4550 = vmatprep.subr.bf16.mxu1 %v4852_v1 }
 0xfca   : > { %2389 = vadd.xlane.f32.xlu0 %v2388_v3 }
 0xfce   : > { %4539 = vmatmul.mubr.msk.bf16.vlgmr.msra.gmra.mrb[64].mxu1 %vm1600_vm12, %v2731_v4 }
 0xfcf   : > { %4554 = vmatprep.mubr.msk.bf16.mxu1 %vm4853_vm0, %v4852_v1 }
0x1017   : > { %v2435_v6 = vpop.f32.mrb[52].mxu1 }
0x1018   : > { %v4504_v7 = vpop.f32.mrb[53].mxu1 }
0x1019   : > { %v2438_v8 = vpop.f32.mrb[54].mxu1  ;;  %v4714_v7 = vld [vmem:[%s5715_s11 + $0x8] sm:$0xff]  }
0x101a   : > { %v4505_v9 = vpop.f32.mrb[55].mxu1 }
0x1043   : > { %v2500_v10 = vpop.xlane.xlu0 %2499 }
0x104b   : > { %v2615_v14 = vpop.xlane.xlu1 %2614 }
0x1053   : > { %v2730_v11 = vpop.xlane.xlu0 %2729 }
0x1057   : > { %v2390_v28 = vpop.xlane.xlu0 %2389 }
0x1058   : > { %4774 = vrcp.f32 %v2390_v28  ;;  %v4713_v28 = vld [vmem:[%s5715_s11] sm:$0xff]  }
0x1059   : > { %4776 = vrcp.f32 %v2500_v10 }
0x105a   : > { %4778 = vrcp.f32 %v2615_v14 }
0x105b   : > { %4780 = vrcp.f32 %v2730_v11 }
0x1062   : > { %v4775_v12 = vpop.eup %4774 }
0x1063   : > { %v2442_v13 = vmul.f32 %v4775_v12, %v2435_v6  ;;  %v4777_v15 = vpop.eup %4776  ;;  %v4715_v12 = vld [vmem:[%s5721_s17 + $0x30] sm:$0xff]  }
0x1064   : > { %v4779_v25 = vpop.eup %4778  ;;  %4551 = vmatpush3.bf16.msra.mxu1 %v4715_v12 }
0x1065   : > { %v2443_v23 = vpack.c.bf16 %v2442_v13, %v2442_v13  ;;  %v4781_v39 = vpop.eup %4780  ;;  %v4716_v13 = vld [vmem:[%s5721_s17 + $0x38] sm:$0xff]   ;;  %4552 = vmatprep.subr.bf16.mxu1 %v4852_v1 }
0x1067   : > { %2444 = vst.msk [vmem:[#allocation2] sm:$0xf] %vm953_vm7, %v2443_v23  ;;  %v4153_v23 = vld [vmem:[%s5716_s12] ss:$0 sm:$0xff] }
0x1068   : > { %4553 = vmatpush3.bf16.msra.mxu1 %v4716_v13 }
0x1069   : > { %4566 = vmatprep.subr.bf16.mxu1 %v4852_v1 }
0x1091   : > { %v2544_v16 = vpop.f32.mrb[56].mxu1 }
0x1092   : > { %v2551_v5 = vmul.f32 %v4777_v15, %v2544_v16  ;;  %v4516_v18 = vpop.f32.mrb[57].mxu1 }
0x1093   : > { %v2547_v20 = vpop.f32.mrb[58].mxu1 }
0x1094   : > { %v4211_v21 = vpack.c.bf16 %v2551_v5, %v2551_v5  ;;  %v4517_v24 = vpop.f32.mrb[59].mxu1 }
0x1096   : > { %2556 = vrot.lane.b32.xlu1 %v4211_v21, %s5778_s30 }
0x1099   : > { %v2659_v26 = vpop.f32.mrb[60].mxu1 }
0x109a   : > { %v2666_v30 = vmul.f32 %v4779_v25, %v2659_v26  ;;  %v4528_v32 = vpop.f32.mrb[61].mxu1 }
0x109b   : > { %v2662_v33 = vpop.f32.mrb[62].mxu1 }
0x109c   : > { %v4212_v35 = vpack.c.bf16 %v2666_v30, %v2666_v30  ;;  %v4529_v36 = vpop.f32.mrb[63].mxu1  ;;  %v4717_v30 = vld [vmem:[%s5043_s10 + $0x10] sm:$0x1f]   ;;  %s5784_s10 = smov 112  }
0x109e   : > { %2671 = vrot.lane.b32.xlu0 %v4212_v35, %s5779_s9  ;;  %v4150_v35 = vld [vmem:[%s5722_s18 + $0x1] ss:$0 sm:$0xff] }
0x10a1   : > { %v2774_v40 = vpop.f32.mrb[64].mxu1 }
0x10a2   : > { %v2781_v41 = vmul.f32 %v4781_v39, %v2774_v40  ;;  %v4540_v42 = vpop.f32.mrb[65].mxu1 }
0x10a3   : > { %v2777_v43 = vpop.f32.mrb[66].mxu1 }
0x10a4   : > { %v4213_v45 = vpack.c.bf16 %v2781_v41, %v2781_v41  ;;  %v4541_v47 = vpop.f32.mrb[67].mxu1 }
0x10a6   : > { %2786 = vrot.lane.b32.xlu1 %v4213_v45, %s5780_s6 }
0x1108   : > { %v2557_v44 = vpop.permute.xlu1 %2556 }
0x1109   : > { %2559 = vst.msk [vmem:[#allocation2] sm:$0xf] %vm1074_vm8, %v2557_v44 }
0x1110   : > { %v2672_v46 = vpop.permute.xlu0 %2671 }
0x1111   : > { %2674 = vst.msk [vmem:[#allocation2] sm:$0xf] %vm1195_vm9, %v2672_v46 }
0x1118   : > { %v2787_v48 = vpop.permute.xlu1 %2786 }
0x1119   : > { %2789 = vst.msk [vmem:[#allocation2] sm:$0xf] %vm1316_vm10, %v2787_v48 }
0x1120   : > { %v2790_v50 = vld [vmem:[#allocation2] sm:$0xf] }
0x1121   : > { %4547 = vmatmul.mubr.msk.bf16.vlgmr.msra.gmra.mrb[60].mxu0 %vm785_vm1, %v2790_v50 }
0x1122   : > { %4559 = vmatpush3.bf16.msra.mxu0 %v4711_v49  ;;  %4562 = vmatprep.mubr.msk.bf16.mxu0 %vm4853_vm0, %v4852_v1 }
0x1123   : > { %4560 = vmatprep.subr.bf16.mxu0 %v4852_v1 }
0x1126   : > { %4561 = vmatpush3.bf16.msra.mxu0 %v4712_v51 }
0x1127   : > { %4574 = vmatprep.subr.bf16.mxu0 %v4852_v1 }
0x1129   : > { %4563 = vmatmul.mubr.msk.bf16.vlgmr.msra.gmra.mrb[64].mxu0 %vm785_vm1, %v5192_v38 }
0x112a   : > { %4576 = vmatprep.mubr.msk.bf16.mxu0 %vm4853_vm0, %v4852_v1 }
0x11f4   : > { %v2851_v54 = vpop.f32.mrb[60].mxu0 }
0x11f5   : > { %v2852_v55 = vadd.f32 %v5324_v53, %v2851_v54  ;;  %v4548_v56 = vpop.f32.mrb[61].mxu0 }
0x11f6   : > { %v2854_v58 = vpop.f32.mrb[62].mxu0 }
0x11f7   : > { %v4549_v59 = vpop.f32.mrb[63].mxu0  ;;  %v2857_v61 = vadd.f32 %v2852_v55, %v5188_v37 }
0x11f9   : > { %v2858_v63 = vsel %vm785_vm1, %v2857_v61, 0.0 }
0x11fa   : > { %2859 = vadd.xlane.f32.xlu1 %v2858_v63 }
0x11fc   : > { %v2999_v2 = vpop.f32.mrb[64].mxu0 }
0x11fd   : > { %v4564_v3 = vpop.f32.mrb[65].mxu0 }
0x11fe   : > { %v3002_v4 = vpop.f32.mrb[66].mxu0 }
0x11ff   : > { %v4565_v6 = vpop.f32.mrb[67].mxu0 }
0x120b   : > { %3051 = vrot.lane.b32.xlu1 %v4714_v7, %s4855_s4 }
0x120f   : > { %3055 = vrot.lane.b32.xlu1 %v4153_v23, %s4855_s4 }
0x1287   : > { %v2860_v8 = vpop.xlane.xlu1 %2859 }
0x1288   : > { %v2861_v53 = vmul.f32 0.03125, %v2860_v8 }
0x128a   : > { %v2862_v9 = vsub.f32 %v2857_v61, %v2861_v53 }
0x128b   : > { %v3052_v29 = vpop.permute.xlu1 %3051 }
0x128c   : > { %v2863_v10 = vmul.f32 %v2862_v9, %v2862_v9 }
0x128e   : > { %v2864_v11 = vsel %vm785_vm1, %v2863_v10, 0.0 }
0x128f   : > { %2865 = vadd.xlane.f32.xlu0 %v2864_v11  ;;  %v3056_v44 = vpop.permute.xlu1 %3055 }
0x12a5   : > { %3049 = vrot.lane.b32.xlu0 %v4713_v28, %s4855_s4 }
0x131c   : > { %v2866_v14 = vpop.xlane.xlu0 %2865 }
0x131d   : > { %v2867_v15 = vmul.f32 0.03125, %v2866_v14 }
0x131f   : > { %v2868_v16 = vadd.f32 1e-05, %v2867_v15 }
0x1320   : > { %v3050_v26 = vpop.permute.xlu0 %3049 }
0x1321   : > { %4782 = vrsqrt.f32 %v2868_v16 }
0x132b   : > { %v4783_v5 = vpop.eup %4782 }
0x132c   : > { %v2870_v18 = vmul.f32 %v4783_v5, %v2862_v9 }
0x132e   : > { %v2878_v20 = vmul.f32 %v5351_v17, %v2870_v18  ;;  %v4110_v17 = vld [vmem:[%s5722_s18] ss:$0 sm:$0xff] }
0x1330   : > { %v2886_v21 = vadd.f32 %v5356_v19, %v2878_v20  ;;  %v2247_v19 = vadd.f32 %v4110_v17, %v5375_v31 }
0x1332   : > { %v2887_v24 = vsel %vm5092_vm3, 0.0, %v2886_v21  ;;  %v2248_v32 = vsub.f32 0.0, %v2247_v19 }
0x1333   : > { %v2893_v25 = vpack.c.bf16 %v2887_v24, %v2887_v24 }
0x1334   : > { %v2249_v33 = vmul.f32 1.442695, %v2248_v32 }
0x1335   : > { %4555 = vmatmul.mubr.msk.bf16.vlgmr.msra.gmra.mrb[68].mxu1 %vm785_vm1, %v2893_v25 }
0x1336   : > { %4567 = vmatpush3.bf16.msra.mxu1 %v3050_v26  ;;  %4570 = vmatprep.mubr.msk.bf16.mxu1 %vm4853_vm0, %v4852_v1  ;;  %4784 = vpow2.f32 %v2249_v33 }
0x1337   : > { %4568 = vmatprep.subr.bf16.mxu1 %v4852_v1 }
0x133a   : > { %4569 = vmatpush3.bf16.msra.mxu1 %v3052_v29 }
0x133b   : > { %4580 = vmatprep.subr.bf16.mxu1 %v4852_v1 }
0x133d   : > { %4571 = vmatmul.mubr.msk.bf16.vlgmr.msra.gmra.mrb[72].mxu1 %vm785_vm1, %v4717_v30 }
0x133e   : > { %4582 = vmatprep.mubr.msk.bf16.mxu1 %vm4853_vm0, %v4852_v1 }
0x1340   : > { %v4785_v51 = vpop.eup %4784 }
0x1341   : > { %v2251_v56 = vadd.f32 1.0, %v4785_v51 }
0x1408   : > { %v2947_v34 = vpop.f32.mrb[68].mxu1 }
0x1409   : > { %v3000_v36 = vadd.f32 %v2999_v2, %v2947_v34  ;;  %v4556_v39 = vpop.f32.mrb[69].mxu1 }
0x140a   : > { %v2950_v40 = vpop.f32.mrb[70].mxu1 }
0x140b   : > { %v3013_v41 = vadd.f32 %v4150_v35, %v3000_v36  ;;  %v4557_v42 = vpop.f32.mrb[71].mxu1 }
0x140d   : > { %v3014_v43 = vsub.f32 0.0, %v3013_v41 }
0x140f   : > { %v3015_v45 = vmul.f32 1.442695, %v3014_v43 }
0x1410   : > { %v3095_v47 = vpop.f32.mrb[72].mxu1 }
0x1411   : > { %4786 = vpow2.f32 %v3015_v45  ;;  %v4572_v46 = vpop.f32.mrb[73].mxu1  ;;  %v3096_v48 = vadd.f32 %v3095_v47, %v3056_v44 }
0x1412   : > { %v3098_v31 = vpop.f32.mrb[74].mxu1  ;;  %4788 = vrcp.f32 %v2251_v56 }
0x1413   : > { %v3099_v49 = vadd.f32 %v3098_v31, %v3056_v44  ;;  %v4573_v50 = vpop.f32.mrb[75].mxu1 }
0x1415   : > { %v5524_v54 = vpack.c.bf16 %v3099_v49, %v3096_v48 }
0x1417   : > { %3326 = vrot.lane.b32.xlu1 %v5524_v54, %s5784_s10  ;;  %3211 = vrot.lane.b32.xlu0 %v5524_v54, %s5785_s2  ;;  %v3104_v55 = vsel %vm842_vm2, %v5524_v54, 0 }
0x1418   : > { %4575 = vmatpush3.bf16.xpose.msra.mxu0 %v3104_v55 }
0x1419   : > { %4586 = vmatprep.subr.bf16.mxu0 %v4852_v1 }
0x141b   : > { %v4787_v58 = vpop.eup %4786  ;;  %3441 = vrot.lane.b32.xlu0 %v5524_v54, %s5781_s5 }
0x141c   : > { %v3017_v59 = vadd.f32 1.0, %v4787_v58  ;;  %v4789_v61 = vpop.eup %4788 }
0x141d   : > { %v2253_v2 = vmul.f32 %v4789_v61, %v5362_v22 }
0x141e   : > { %4790 = vrcp.f32 %v3017_v59 }
0x141f   : > { %4577 = vmatmul.mubr.msk.bf16.vlgmr.msra.gmra.mrb[68].mxu0 %vm842_vm2, %v5210_v52 }
0x1420   : > { %4588 = vmatprep.mubr.msk.bf16.mxu0 %vm4853_vm0, %v4852_v1 }
0x1428   : > { %v4791_v63 = vpop.eup %4790 }
0x1429   : > { %v3019_v3 = vmul.f32 %v4791_v63, %v2887_v24 }
0x142b   : > { %v5540_v4 = vadd.f32 %v3019_v3, %v2253_v2 }
0x1489   : > { %v3212_v6 = vpop.permute.xlu0 %3211  ;;  %v3327_v8 = vpop.permute.xlu1 %3326 }
0x148a   : > { %v3214_v7 = vsel %vm842_vm2, %v3212_v6, 0  ;;  %v3329_v53 = vsel %vm842_vm2, %v3327_v8, 0 }
0x148b   : > { %4587 = vmatpush3.bf16.xpose.msra.mxu0 %v3214_v7 }
0x148c   : > { %4598 = vmatprep.subr.bf16.mxu0 %v4852_v1 }
0x148d   : > { %v3442_v52 = vpop.permute.xlu0 %3441 }
0x148e   : > { %v3444_v22 = vsel %vm842_vm2, %v3442_v52, 0 }
0x1492   : > { %4589 = vmatmul.mubr.msk.bf16.vlgmr.msra.gmra.mrb[72].mxu0 %vm842_vm2, %v5224_v57 }
0x1493   : > { %4599 = vmatpush3.bf16.xpose.msra.mxu0 %v3329_v53  ;;  %4600 = vmatprep.mubr.msk.bf16.mxu0 %vm4853_vm0, %v4852_v1 }
0x1494   : > { %4610 = vmatprep.subr.bf16.mxu0 %v4852_v1 }
0x149a   : > { %4601 = vmatmul.mubr.msk.bf16.vlgmr.msra.gmra.mrb[76].mxu0 %vm842_vm2, %v5232_v60 }
0x149b   : > { %4611 = vmatpush3.bf16.xpose.msra.mxu0 %v3444_v22  ;;  %4612 = vmatprep.mubr.msk.bf16.mxu0 %vm4853_vm0, %v4852_v1 }
0x149c   : > { %4622 = vmatprep.subr.bf16.mxu0 %v4852_v1 }
0x14a2   : > { %4613 = vmatmul.mubr.msk.bf16.vlgmr.msra.gmra.mrb[80].mxu0 %vm842_vm2, %v5240_v62 }
0x14a3   : > { %4626 = vmatprep.mubr.msk.bf16.mxu0 %vm4853_vm0, %v4852_v1 }
0x14f2   : > { %v3140_v57 = vpop.f32.mrb[68].mxu0 }
0x14f3   : > { %v3146_v9 = vmul.f32 0.35355338, %v3140_v57  ;;  %v4578_v10 = vpop.f32.mrb[69].mxu0 }
0x14f4   : > { %v3143_v11 = vpop.f32.mrb[70].mxu0 }
0x14f5   : > { %v4579_v28 = vpop.f32.mrb[71].mxu0  ;;  %v3147_v12 = vadd.f32 %v3146_v9, %v5249_v0 }
0x14f7   : > { %v3148_v60 = vsel %vm1600_vm12, %v3147_v12, -inf }
0x14f8   : > { %3149 = vmax.xlane.f32.xlu1 %v3148_v60 }
0x1509   : > { %3268 = vrot.lane.b32.xlu1 %v5524_v54, %s5783_s29 }
0x1565   : > { %v3250_v13 = vpop.f32.mrb[72].mxu0 }
0x1566   : > { %v3256_v23 = vmul.f32 0.35355338, %v3250_v13  ;;  %v4590_v14 = vpop.f32.mrb[73].mxu0 }
0x1567   : > { %v3253_v62 = vpop.f32.mrb[74].mxu0 }
0x1568   : > { %v4591_v15 = vpop.f32.mrb[75].mxu0  ;;  %v3257_v16 = vadd.f32 %v3256_v23, %v5249_v0 }
0x156a   : > { %v3258_v5 = vsel %vm1600_vm12, %v3257_v16, -inf }
0x156b   : > { %3259 = vmax.xlane.f32.xlu0 %v3258_v5 }
0x156d   : > { %v3365_v18 = vpop.f32.mrb[76].mxu0 }
0x156e   : > { %v3371_v20 = vmul.f32 0.35355338, %v3365_v18  ;;  %v4602_v21 = vpop.f32.mrb[77].mxu0 }
0x156f   : > { %v3368_v24 = vpop.f32.mrb[78].mxu0 }
0x1570   : > { %v4603_v25 = vpop.f32.mrb[79].mxu0  ;;  %v3372_v26 = vadd.f32 %v3371_v20, %v5249_v0 }
0x1572   : > { %v3373_v29 = vsel %vm1600_vm12, %v3372_v26, -inf }
0x1573   : > { %3374 = vmax.xlane.f32.xlu0 %v3373_v29 }
0x1575   : > { %v3480_v30 = vpop.f32.mrb[80].mxu0 }
0x1576   : > { %v3486_v17 = vmul.f32 0.35355338, %v3480_v30  ;;  %v4614_v19 = vpop.f32.mrb[81].mxu0  ;;  %v4718_v30 = vld [vmem:[%s5717_s13] sm:$0xff]  }
0x1577   : > { %v3483_v32 = vpop.f32.mrb[82].mxu0  ;;  %4623 = vmatpush3.bf16.msra.mxu0 %v4718_v30 }
0x1578   : > { %v4615_v33 = vpop.f32.mrb[83].mxu0  ;;  %v3487_v34 = vadd.f32 %v3486_v17, %v5249_v0  ;;  %4624 = vmatprep.subr.bf16.mxu0 %v4852_v1 }
0x1579   : > { %v4719_v33 = vld [vmem:[%s5717_s13 + $0x8] sm:$0xff]  }
0x157a   : > { %v3488_v35 = vsel %vm1600_vm12, %v3487_v34, -inf }
0x157b   : > { %3489 = vmax.xlane.f32.xlu1 %v3488_v35  ;;  %4625 = vmatpush3.bf16.msra.mxu0 %v4719_v33 }
0x157c   : > { %4638 = vmatprep.subr.bf16.mxu0 %v4852_v1 }
0x1585   : > { %v3150_v36 = vpop.xlane.xlu1 %3149 }
0x1586   : > { %v3151_v39 = vsub.f32 %v3147_v12, %v3150_v36 }
0x1588   : > { %v3152_v40 = vmul.f32 1.442695, %v3151_v39 }
0x1589   : > { %3159 = vrot.lane.b32.xlu0 %v5524_v54, %s4855_s4  ;;  %v3269_v46 = vpop.permute.xlu1 %3268  ;;  %s5786_s4 = sld [smem:[#allocation18_spill]] }
0x158a   : > { %4792 = vpow2.f32 %v3152_v40  ;;  %v3274_v55 = vsel %vm1617_vm13, %v3269_v46, 0  ;;  %v4720_v46 = vld [vmem:[%s5721_s17 + $0x40] sm:$0xff]  }
0x158c   : > { %3383 = vrot.lane.b32.xlu1 %v5524_v54, %s5782_s28 }
0x158d   : > { %3498 = vrot.lane.b32.xlu0 %v5524_v54, %s5777_s20 }
0x1594   : > { %v4793_v44 = vpop.eup %4792 }
0x1595   : > { %v3157_v50 = vpack.c.bf16 %v4793_v44, %v4793_v44  ;;  %v3154_v59 = vsel %vm1600_vm12, %v4793_v44, 0.0 }
0x15f8   : > { %v3260_v41 = vpop.xlane.xlu0 %3259 }
0x15f9   : > { %v3261_v42 = vsub.f32 %v3257_v16, %v3260_v41 }
0x15fb   : > { %v3262_v43 = vmul.f32 1.442695, %v3261_v42 }
0x15fd   : > { %4794 = vpow2.f32 %v3262_v43 }
0x1600   : > { %v3375_v0 = vpop.xlane.xlu0 %3374 }
0x1601   : > { %v3376_v45 = vsub.f32 %v3372_v26, %v3375_v0 }
0x1603   : > { %v3377_v47 = vmul.f32 1.442695, %v3376_v45 }
0x1604   : > { %v3160_v31 = vpop.permute.xlu0 %3159 }
0x1605   : > { %4796 = vpow2.f32 %v3377_v47  ;;  %v3165_v48 = vsel %vm1617_vm13, %v3160_v31, 0 }
0x1606   : > { %4581 = vmatpush3.bf16.msra.mxu1 %v3165_v48  ;;  %v4721_v48 = vld [vmem:[%s5721_s17 + $0x48] sm:$0xff]  }
0x1607   : > { %v4795_v49 = vpop.eup %4794  ;;  %4592 = vmatprep.subr.bf16.mxu1 %v4852_v1 }
0x1608   : > { %v3490_v51 = vpop.xlane.xlu1 %3489  ;;  %v3264_v54 = vsel %vm1600_vm12, %v4795_v49, 0.0  ;;  %v3267_v2 = vpack.c.bf16 %v4795_v49, %v4795_v49  ;;  %v3499_v7 = vpop.permute.xlu0 %3498  ;;  %v4169_v49 = vld [vmem:[%s5718_s14] ss:$0 sm:$0xff] }
0x1609   : > { %v3491_v56 = vsub.f32 %v3487_v34, %v3490_v51  ;;  %4583 = vmatmul.mubr.msk.bf16.vlgmr.msra.gmra.mrb[76].mxu1 %vm1600_vm12, %v3157_v50  ;;  %3265 = vadd.xlane.f32.xlu1 %v3264_v54  ;;  %v3504_v22 = vsel %vm1617_vm13, %v3499_v7, 0 }
0x160a   : > { %4593 = vmatpush3.bf16.msra.mxu1 %v3274_v55  ;;  %4594 = vmatprep.mubr.msk.bf16.mxu1 %vm4853_vm0, %v4852_v1 }
0x160b   : > { %v3492_v58 = vmul.f32 1.442695, %v3491_v56  ;;  %4604 = vmatprep.subr.bf16.mxu1 %v4852_v1 }
0x160c   : > { %v3384_v61 = vpop.permute.xlu1 %3383 }
0x160d   : > { %4798 = vpow2.f32 %v3492_v58  ;;  %3155 = vadd.xlane.f32.xlu1 %v3154_v59  ;;  %v3389_v6 = vsel %vm1617_vm13, %v3384_v61, 0 }
0x160f   : > { %v4797_v63 = vpop.eup %4796 }
0x1610   : > { %v3379_v3 = vsel %vm1600_vm12, %v4797_v63, 0.0  ;;  %v3382_v53 = vpack.c.bf16 %v4797_v63, %v4797_v63 }
0x1611   : > { %3380 = vadd.xlane.f32.xlu0 %v3379_v3  ;;  %4595 = vmatmul.mubr.msk.bf16.vlgmr.msra.gmra.mrb[80].mxu1 %vm1600_vm12, %v3267_v2 }
0x1612   : > { %4605 = vmatpush3.bf16.msra.mxu1 %v3389_v6  ;;  %4606 = vmatprep.mubr.msk.bf16.mxu1 %vm4853_vm0, %v4852_v1 }
0x1613   : > { %4616 = vmatprep.subr.bf16.mxu1 %v4852_v1 }
0x1617   : > { %v4799_v8 = vpop.eup %4798 }
0x1618   : > { %v3494_v52 = vsel %vm1600_vm12, %v4799_v8, 0.0  ;;  %v3497_v57 = vpack.c.bf16 %v4799_v8, %v4799_v8 }
0x1619   : > { %3495 = vadd.xlane.f32.xlu0 %v3494_v52  ;;  %4607 = vmatmul.mubr.msk.bf16.vlgmr.msra.gmra.mrb[84].mxu1 %vm1600_vm12, %v3382_v53  ;;  %v4722_v52 = vld [vmem:[%s5721_s17 + $0x50] sm:$0xff]  }
0x161a   : > { %4617 = vmatpush3.bf16.msra.mxu1 %v3504_v22  ;;  %4618 = vmatprep.mubr.msk.bf16.mxu1 %vm4853_vm0, %v4852_v1 }
0x161b   : > { %4630 = vmatprep.subr.bf16.mxu1 %v4852_v1 }
0x1621   : > { %4619 = vmatmul.mubr.msk.bf16.vlgmr.msra.gmra.mrb[88].mxu1 %vm1600_vm12, %v3497_v57 }
0x1622   : > { %4634 = vmatprep.mubr.msk.bf16.mxu1 %vm4853_vm0, %v4852_v1  ;;  %4631 = vmatpush3.bf16.msra.mxu1 %v4722_v52 }
0x1623   : > { %4632 = vmatprep.subr.bf16.mxu1 %v4852_v1 }
0x1696   : > { %v3266_v9 = vpop.xlane.xlu1 %3265 }
0x169a   : > { %v3156_v10 = vpop.xlane.xlu1 %3155 }
0x169b   : > { %4800 = vrcp.f32 %v3156_v10 }
0x169c   : > { %4802 = vrcp.f32 %v3266_v9 }
0x169e   : > { %v3381_v23 = vpop.xlane.xlu0 %3380 }
0x169f   : > { %4804 = vrcp.f32 %v3381_v23 }
0x16a5   : > { %v4801_v11 = vpop.eup %4800 }
0x16a6   : > { %v4803_v15 = vpop.eup %4802  ;;  %v3496_v21 = vpop.xlane.xlu0 %3495 }
0x16a7   : > { %4806 = vrcp.f32 %v3496_v21 }
0x16a9   : > { %v4805_v26 = vpop.eup %4804 }
0x16b1   : > { %v4807_v36 = vpop.eup %4806 }
0x16dc   : > { %v3201_v28 = vpop.f32.mrb[76].mxu1 }
0x16dd   : > { %v3208_v12 = vmul.f32 %v4801_v11, %v3201_v28  ;;  %v4584_v60 = vpop.f32.mrb[77].mxu1  ;;  %v4173_v11 = vld [vmem:[%s5719_s15] ss:$0 sm:$0xff] }
0x16de   : > { %v3204_v13 = vpop.f32.mrb[78].mxu1 }
0x16df   : > { %v3209_v14 = vpack.c.bf16 %v3208_v12, %v3208_v12  ;;  %v4585_v62 = vpop.f32.mrb[79].mxu1  ;;  %v4174_v12 = vld [vmem:[%s5720_s16] ss:$0 sm:$0xff] }
0x16e0   : > { %v4724_v62 = vld [vmem:[%s5723_s19] sm:$0xff]  }
0x16e1   : > { %3210 = vst.msk [vmem:[#allocation2] sm:$0xf] %vm953_vm7, %v3209_v14 }
0x16e4   : > { %v3310_v16 = vpop.f32.mrb[80].mxu1 }
0x16e5   : > { %v3317_v5 = vmul.f32 %v4803_v15, %v3310_v16  ;;  %v4596_v18 = vpop.f32.mrb[81].mxu1  ;;  %v4725_v15 = vld [vmem:[%s5723_s19 + $0x8] sm:$0xff]   ;;  %v4726_v16 = vld [vmem:[%s5725_s21] sm:$0xff]  }
0x16e6   : > { %v3313_v20 = vpop.f32.mrb[82].mxu1 }
0x16e7   : > { %v4214_v24 = vpack.c.bf16 %v3317_v5, %v3317_v5  ;;  %v4597_v25 = vpop.f32.mrb[83].mxu1  ;;  %v4727_v5 = vld [vmem:[%s5725_s21 + $0x8] sm:$0xff]   ;;  %v4190_v20 = vld [vmem:[%s5722_s18 + $0x2] ss:$0 sm:$0xff] }
0x16e9   : > { %3322 = vrot.lane.b32.xlu0 %v4214_v24, %s5778_s30 }
0x16ec   : > { %v3425_v29 = vpop.f32.mrb[84].mxu1 }
0x16ed   : > { %v3432_v17 = vmul.f32 %v4805_v26, %v3425_v29  ;;  %v4608_v19 = vpop.f32.mrb[85].mxu1 }
0x16ee   : > { %v3428_v32 = vpop.f32.mrb[86].mxu1 }
0x16ef   : > { %v4215_v34 = vpack.c.bf16 %v3432_v17, %v3432_v17  ;;  %v4609_v35 = vpop.f32.mrb[87].mxu1 }
0x16f1   : > { %3437 = vrot.lane.b32.xlu1 %v4215_v34, %s5779_s9 }
0x16f4   : > { %v3540_v39 = vpop.f32.mrb[88].mxu1 }
0x16f5   : > { %v3547_v40 = vmul.f32 %v4807_v36, %v3540_v39  ;;  %v4620_v41 = vpop.f32.mrb[89].mxu1 }
0x16f6   : > { %v3543_v42 = vpop.f32.mrb[90].mxu1  ;;  %v4729_v41 = vld [vmem:[%s5725_s21 + $0x18] sm:$0xff]  }
0x16f7   : > { %v4216_v43 = vpack.c.bf16 %v3547_v40, %v3547_v40  ;;  %v4621_v0 = vpop.f32.mrb[91].mxu1  ;;  %v4728_v40 = vld [vmem:[%s5725_s21 + $0x10] sm:$0xff]  }
0x16f9   : > { %3552 = vrot.lane.b32.xlu1 %v4216_v43, %s5780_s6 }
0x175b   : > { %v3323_v45 = vpop.permute.xlu0 %3322 }
0x175c   : > { %3325 = vst.msk [vmem:[#allocation2] sm:$0xf] %vm1074_vm8, %v3323_v45 }
0x1763   : > { %v3438_v47 = vpop.permute.xlu1 %3437 }
0x1764   : > { %3440 = vst.msk [vmem:[#allocation2] sm:$0xf] %vm1195_vm9, %v3438_v47 }
0x176b   : > { %v3553_v44 = vpop.permute.xlu1 %3552 }
0x176c   : > { %3555 = vst.msk [vmem:[#allocation2] sm:$0xf] %vm1316_vm10, %v3553_v44 }
0x1773   : > { %v3556_v31 = vld [vmem:[#allocation2] sm:$0xf] }
0x1774   : > { %4627 = vmatmul.mubr.msk.bf16.vlgmr.msra.gmra.mrb[84].mxu0 %vm785_vm1, %v3556_v31 }
0x1775   : > { %4639 = vmatpush3.bf16.msra.mxu0 %v4720_v46  ;;  %4642 = vmatprep.mubr.msk.bf16.mxu0 %vm4853_vm0, %v4852_v1 }
0x1776   : > { %4640 = vmatprep.subr.bf16.mxu0 %v4852_v1 }
0x1779   : > { %4641 = vmatpush3.bf16.msra.mxu0 %v4721_v48 }
0x177a   : > { %4654 = vmatprep.subr.bf16.mxu0 %v4852_v1 }
0x177c   : > { %4643 = vmatmul.mubr.msk.bf16.vlgmr.msra.gmra.mrb[88].mxu0 %vm785_vm1, %v5192_v38 }
0x177d   : > { %4662 = vmatprep.mubr.msk.bf16.mxu0 %vm4853_vm0, %v4852_v1  ;;  %4655 = vmatpush3.bf16.msra.mxu0 %v4726_v16 }
0x177e   : > { %4656 = vmatprep.subr.bf16.mxu0 %v4852_v1 }
0x1781   : > { %4657 = vmatpush3.bf16.msra.mxu0 %v4727_v5 }
0x1782   : > { %4658 = vmatprep.subr.bf16.mxu0 %v4852_v1 }
0x1785   : > { %4659 = vmatpush3.bf16.msra.mxu0 %v4728_v40 }
0x1786   : > { %4660 = vmatprep.subr.bf16.mxu0 %v4852_v1 }
0x1789   : > { %4661 = vmatpush3.bf16.msra.mxu0 %v4729_v41 }
0x1847   : > { %v3617_v50 = vpop.f32.mrb[84].mxu0 }
0x1848   : > { %v3618_v51 = vadd.f32 %v4169_v49, %v3617_v50  ;;  %v4628_v54 = vpop.f32.mrb[85].mxu0 }
0x1849   : > { %v3620_v55 = vpop.f32.mrb[86].mxu0 }
0x184a   : > { %v4629_v56 = vpop.f32.mrb[87].mxu0  ;;  %v3623_v58 = vadd.f32 %v3618_v51, %v5188_v37  ;;  %v4723_v37 = vld [vmem:[%s5721_s17 + $0x58] sm:$0xff]  }
0x184b   : > { %4633 = vmatpush3.bf16.msra.mxu1 %v4723_v37 }
0x184c   : > { %v3624_v59 = vsel %vm785_vm1, %v3623_v58, 0.0  ;;  %4646 = vmatprep.subr.bf16.mxu1 %v4852_v1 }
0x184d   : > { %3625 = vadd.xlane.f32.xlu0 %v3624_v59 }
0x184f   : > { %v3765_v61 = vpop.f32.mrb[88].mxu0 }
0x1850   : > { %v4644_v63 = vpop.f32.mrb[89].mxu0 }
0x1851   : > { %v3768_v38 = vpop.f32.mrb[90].mxu0 }
0x1852   : > { %v4645_v2 = vpop.f32.mrb[91].mxu0 }
0x18da   : > { %v3626_v3 = vpop.xlane.xlu0 %3625 }
0x18db   : > { %v3627_v6 = vmul.f32 0.03125, %v3626_v3 }
0x18dd   : > { %v3628_v7 = vsub.f32 %v3623_v58, %v3627_v6 }
0x18df   : > { %v3629_v8 = vmul.f32 %v3628_v7, %v3628_v7 }
0x18e1   : > { %v3630_v53 = vsel %vm785_vm1, %v3629_v8, 0.0 }
0x18e2   : > { %3631 = vadd.xlane.f32.xlu1 %v3630_v53  ;;  %v4202_v53 = vld [vmem:[%s5728_s24] ss:$0 sm:$0xff] }
0x196f   : > { %v3632_v22 = vpop.xlane.xlu1 %3631 }
0x1970   : > { %v3633_v57 = vmul.f32 0.03125, %v3632_v22 }
0x1972   : > { %v3634_v9 = vadd.f32 1e-05, %v3633_v57 }
0x1974   : > { %4808 = vrsqrt.f32 %v3634_v9 }
0x197e   : > { %v4809_v10 = vpop.eup %4808 }
0x197f   : > { %v3636_v28 = vmul.f32 %v4809_v10, %v3628_v7  ;;  %v4201_v7 = vld [vmem:[%s5727_s23] ss:$0 sm:$0xff] }
0x1981   : > { %v3644_v60 = vmul.f32 %v4173_v11, %v3636_v28 }
0x1983   : > { %v3652_v13 = vadd.f32 %v4174_v12, %v3644_v60 }
0x1985   : > { %v3653_v23 = vsel %vm5092_vm3, 0.0, %v3652_v13 }
0x1986   : > { %v3659_v14 = vpack.c.bf16 %v3653_v23, %v3653_v23 }
0x1988   : > { %4635 = vmatmul.mubr.msk.bf16.vlgmr.msra.gmra.mrb[92].mxu1 %vm785_vm1, %v3659_v14 }
0x1989   : > { %4650 = vmatprep.mubr.msk.bf16.mxu1 %vm4853_vm0, %v4852_v1  ;;  %4647 = vmatpush3.bf16.msra.mxu1 %v4724_v62 }
0x198a   : > { %4648 = vmatprep.subr.bf16.mxu1 %v4852_v1  ;;  %v4195_v1 = vld [vmem:[%s5726_s22] ss:$0 sm:$0xff] }
0x198d   : > { %4649 = vmatpush3.bf16.msra.mxu1 %v4725_v15 }
0x1a5b   : > { %v3713_v18 = vpop.f32.mrb[92].mxu1 }
0x1a5c   : > { %v3766_v21 = vadd.f32 %v3765_v61, %v3713_v18  ;;  %v4636_v24 = vpop.f32.mrb[93].mxu1 }
0x1a5d   : > { %v3716_v25 = vpop.f32.mrb[94].mxu1 }
0x1a5e   : > { %v3779_v26 = vadd.f32 %v4190_v20, %v3766_v21  ;;  %v4637_v29 = vpop.f32.mrb[95].mxu1 }
0x1a60   : > { %v3780_v30 = vsub.f32 0.0, %v3779_v26 }
0x1a62   : > { %v3781_v17 = vmul.f32 1.442695, %v3780_v30 }
0x1a64   : > { %4810 = vpow2.f32 %v3781_v17 }
0x1a6e   : > { %v4811_v19 = vpop.eup %4810 }
0x1a6f   : > { %v3783_v32 = vadd.f32 1.0, %v4811_v19 }
0x1a71   : > { %4812 = vrcp.f32 %v3783_v32 }
0x1a7b   : > { %v4813_v33 = vpop.eup %4812 }
0x1a7c   : > { %v3785_v34 = vmul.f32 %v4813_v33, %v3653_v23 }
0x1a7e   : > { %v3786_v35 = vadd.f32 %v3785_v34, %v5540_v4  ;;  %v4191_v4 = vld [vmem:[%s5786_s4] ss:$0 sm:$0xff] }
0x1a80   : > { %v3787_v36 = vmul.f32 0.57735026, %v3786_v35 }
0x1a82   : > { %v3788_v39 = vpack.c.bf16 %v3787_v36, %v3787_v36 }
0x1a84   : > { %4651 = vmatmul.mubr.msk.bf16.vlgmr.msra.gmra.mrb[96].mxu1 %vm785_vm1, %v3788_v39 }
0x1b57   : > { %v3849_v42 = vpop.f32.mrb[96].mxu1 }
0x1b58   : > { %v3850_v43 = vadd.f32 %v4191_v4, %v3849_v42  ;;  %v4652_v0 = vpop.f32.mrb[97].mxu1 }
0x1b59   : > { %v3852_v45 = vpop.f32.mrb[98].mxu1 }
0x1b5a   : > { %v3855_v47 = vmax.f32 %v3850_v43, 0.0  ;;  %v4653_v44 = vpop.f32.mrb[99].mxu1 }
0x1b5c   : > { %v3856_v46 = vpack.c.bf16 %v3855_v47, %v3855_v47 }
0x1b5e   : > { %4663 = vmatmul.mubr.msk.bf16.vlgmr.msra.gmra.mrb[92].mxu0 %vm3896_vm14, %v3856_v46 }
0x1c31   : > { %v3934_v31 = vpop.f32.mrb[92].mxu0 }
0x1c32   : > { %v3935_v48 = vadd.f32 %v4195_v1, %v3934_v31  ;;  %v4664_v49 = vpop.f32.mrb[93].mxu0 }
0x1c33   : > { %v3937_v50 = vpop.f32.mrb[94].mxu0 }
0x1c34   : > { %v4665_v51 = vpop.f32.mrb[95].mxu0  ;;  %v3940_v54 = vadd.f32 %v3935_v48, %v3787_v36 }
0x1c36   : > { %v3941_v55 = vsel %vm785_vm1, %v3940_v54, 0.0 }
0x1c37   : > { %3942 = vadd.xlane.f32.xlu0 %v3941_v55 }
0x1cc4   : > { %v3943_v56 = vpop.xlane.xlu0 %3942 }
0x1cc5   : > { %v3944_v58 = vmul.f32 0.03125, %v3943_v56 }
0x1cc7   : > { %v3945_v59 = vsub.f32 %v3940_v54, %v3944_v58 }
0x1cc9   : > { %v3946_v61 = vmul.f32 %v3945_v59, %v3945_v59 }
0x1ccb   : > { %v3947_v63 = vsel %vm785_vm1, %v3946_v61, 0.0 }
0x1ccc   : > { %3948 = vadd.xlane.f32.xlu0 %v3947_v63 }
0x1d59   : > { %v3949_v38 = vpop.xlane.xlu0 %3948 }
0x1d5a   : > { %v3950_v2 = vmul.f32 0.03125, %v3949_v38 }
0x1d5c   : > { %v3951_v3 = vadd.f32 1e-05, %v3950_v2 }
0x1d5e   : > { %4814 = vrsqrt.f32 %v3951_v3 }
0x1d68   : > { %v4815_v6 = vpop.eup %4814 }
0x1d69   : > { %v3953_v8 = vmul.f32 %v4815_v6, %v3945_v59 }
0x1d6b   : > { %v3961_v52 = vmul.f32 %v4201_v7, %v3953_v8 }
0x1d6d   : > { %v3969_v37 = vadd.f32 %v4202_v53, %v3961_v52 }
0x1d6f   : > { %v3970_v22 = vsel %vm5092_vm3, 0.0, %v3969_v37 }
0x1d70   : > { %v3971_v57 = vpack.c.bf16 %v3970_v22, %v3970_v22 }
0x1d72   : > { %3973 = vst.msk [vmem:[%s754_s8] sm:$0xf] %vm3972_vm15, %v3971_v57 }
0x1d73 PF: > { %s5788_s25 = sld [smem:[#allocation7_spill]] }
0x1d79   : > { %s45_s1 = sadd.s32 1, %s5788_s25  }
0x1d7a   : > { %p42_p0 = scmp.ge.s32.totalorder %s45_s1, 4  }
0x1d7c   :  { %44 = sbr.rel (!%p42_p0) target bundleno = 38 (0x26), region = 154 }

</bundles_post_ra>
